<compile_context>
chip_gen: v7x
topology: tpu7x:2x2x1
jax: 0.10.0
libtpu: 0.0.40
codegen_flags: <defaults>
</compile_context>

<pallas_src>
import numpy as np

import jax
import jax.numpy as jnp
from jax import lax
from jax.experimental import pallas as pl
from jax.experimental.pallas import tpu as pltpu


# ----------------------------------------------------------------------------
# The single fused kernel
# ----------------------------------------------------------------------------
def _lenet_kernel(x_ref, a1_ref, b1_ref, a2_ref, b2_ref,
                  wf1_ref, fb1_ref, wf2_ref, fb2_ref, wf3_ref, fb3_ref,
                  o_ref, xp_ref, p1_ref):
    f32 = jnp.float32
    B = x_ref.shape[0]

    # conv1 input: zero-pad 28x28 -> 32x32 inside VMEM (Conv2d padding=2).
    xp_ref[...] = jnp.zeros_like(xp_ref)
    xp_ref[:, 2:30, 2:30] = x_ref[...]

    b1v = b1_ref[...]            # (1, 84)  per-channel bias, pooled lane order
    b2v = b2_ref[...]            # (1, 80)

    for b in range(B):           # tiny static batch -> unrolled
        xpb = xp_ref[b]          # (32, 32)

        # ---- conv1: 5 banded matmuls; output lanes = [(x%2)*84 + co*14 + x//2]
        c1 = None
        for i in range(5):
            t = jnp.dot(xpb[i:i + 28, :], a1_ref[i],
                        preferred_element_type=f32)          # (28, 168)
            c1 = t if c1 is None else c1 + t

        # ---- 2x2 max-pool + bias + ReLU (bias/ReLU commute with max-pool)
        xm = jnp.maximum(c1[:, 0:84], c1[:, 84:168])          # pool over width
        for ty in range(14):                                  # pool over height
            r = jnp.maximum(xm[2 * ty:2 * ty + 1, :],
                            xm[2 * ty + 1:2 * ty + 2, :])
            p1_ref[ty:ty + 1, :] = jnp.maximum(r + b1v, 0.0)  # (1, 84)

        # ---- conv2: 5 banded matmuls; output lanes = [(x%2)*80 + co*5 + x//2]
        c2 = None
        for i in range(5):
            t = jnp.dot(p1_ref[i:i + 10, :], a2_ref[i],
                        preferred_element_type=f32)           # (10, 160)
            c2 = t if c2 is None else c2 + t

        # ---- 2x2 max-pool + bias + ReLU fused straight into fc1 row-accumulation
        xm2 = jnp.maximum(c2[:, 0:80], c2[:, 80:160])         # (10, 80)
        h1 = fb1_ref[...]                                     # (1, 120)
        for ty in range(5):
            r = jnp.maximum(xm2[2 * ty:2 * ty + 1, :],
                            xm2[2 * ty + 1:2 * ty + 2, :])
            p2_row = jnp.maximum(r + b2v, 0.0)                # (1, 80)
            h1 = h1 + jnp.dot(p2_row, wf1_ref[ty],
                              preferred_element_type=f32)     # (1, 120)
        h1 = jnp.maximum(h1, 0.0)                             # fc1 + ReLU

        # ---- fc2 + ReLU, fc3
        h2 = jnp.maximum(
            jnp.dot(h1, wf2_ref[...], preferred_element_type=f32) + fb2_ref[...],
            0.0)                                              # (1, 84)
        out_b = jnp.dot(h2, wf3_ref[...],
                        preferred_element_type=f32) + fb3_ref[...]   # (1, 10)
        o_ref[b:b + 1, :] = out_b


def _full_spec(shape):
    n = len(shape)
    return pl.BlockSpec(shape, lambda i, _n=n: (0,) * _n)


@jax.jit
def lenet_forward_pallas(kp, x):
    B = x.shape[0]
    x2 = x.reshape(B, 28, 28)                 # Cin=1 -> layout-free squeeze
    operands = (x2, kp["a1"], kp["b1r"], kp["a2"], kp["b2r"],
                kp["wf1"], kp["fb1"], kp["wf2"], kp["fb2"], kp["wf3"], kp["fb3"])
    in_specs = [_full_spec(op.shape) for op in operands]
    bytes_acc = sum(int(np.prod(op.shape)) * op.dtype.itemsize for op in operands)
    bytes_acc += B * 10 * 4
    flops = 2 * B * (5 * 28 * 32 * 168 + 5 * 10 * 84 * 160
                     + 5 * 80 * 120 + 120 * 84 + 84 * 10)
    return pl.pallas_call(
        _lenet_kernel,
        out_shape=jax.ShapeDtypeStruct((B, 10), jnp.float32),
        grid=(1,),
        in_specs=in_specs,
        out_specs=pl.BlockSpec((B, 10), lambda i: (0, 0)),
        scratch_shapes=[pltpu.VMEM((B, 32, 32), jnp.float32),   # padded input
                        pltpu.VMEM((14, 84), jnp.float32)],     # pooled conv1
        compiler_params=pltpu.CompilerParams(dimension_semantics=("arbitrary",)),
        cost_estimate=pl.CostEstimate(flops=flops, transcendentals=0,
                                      bytes_accessed=bytes_acc),
    )(*operands)


# ----------------------------------------------------------------------------
# One-time parameter preparation (banded conv matrices, folded layouts)
# ----------------------------------------------------------------------------
def prepare_params(p):
    w1 = np.asarray(p["w1"], np.float32)    # (6, 1, 5, 5)
    b1 = np.asarray(p["b1"], np.float32)    # (6,)
    w2 = np.asarray(p["w2"], np.float32)    # (16, 6, 5, 5)
    b2 = np.asarray(p["b2"], np.float32)    # (16,)
    fw1 = np.asarray(p["fw1"], np.float32)  # (120, 400)
    fb1 = np.asarray(p["fb1"], np.float32)
    fw2 = np.asarray(p["fw2"], np.float32)  # (84, 120)
    fb2 = np.asarray(p["fb2"], np.float32)
    fw3 = np.asarray(p["fw3"], np.float32)  # (10, 84)
    fb3 = np.asarray(p["fb3"], np.float32)

    # conv1 banded weights: a1[i, xin, lane], lane = (xo%2)*84 + co*14 + xo//2
    a1 = np.zeros((5, 32, 168), np.float32)
    b1r = np.zeros((1, 84), np.float32)
    for co in range(6):
        b1r[0, co * 14:(co + 1) * 14] = b1[co]
        for xo in range(28):
            lane = (xo % 2) * 84 + co * 14 + xo // 2
            for i in range(5):
                for j in range(5):
                    a1[i, xo + j, lane] = w1[co, 0, i, j]

    # conv2 banded weights: a2[i, ci*14+xin, lane], lane = (xo%2)*80 + co*5 + xo//2
    a2 = np.zeros((5, 84, 160), np.float32)
    b2r = np.zeros((1, 80), np.float32)
    for co in range(16):
        b2r[0, co * 5:(co + 1) * 5] = b2[co]
        for ci in range(6):
            for xo in range(10):
                lane = (xo % 2) * 80 + co * 5 + xo // 2
                for i in range(5):
                    for j in range(5):
                        a2[i, ci * 14 + xo + j, lane] = w2[co, ci, i, j]

    # fc1: wf1[y, ci*5+x, o] = fw1[o, ci*25 + y*5 + x]  (folds NCHW flatten order)
    wf1 = np.ascontiguousarray(
        np.transpose(fw1.reshape(120, 16, 5, 5), (2, 1, 3, 0)).reshape(5, 80, 120))

    return {
        "a1": jnp.asarray(a1), "b1r": jnp.asarray(b1r),
        "a2": jnp.asarray(a2), "b2r": jnp.asarray(b2r),
        "wf1": jnp.asarray(wf1), "fb1": jnp.asarray(fb1.reshape(1, 120)),
        "wf2": jnp.asarray(np.ascontiguousarray(fw2.T)),
        "fb2": jnp.asarray(fb2.reshape(1, 84)),
        "wf3": jnp.asarray(np.ascontiguousarray(fw3.T)),
        "fb3": jnp.asarray(fb3.reshape(1, 10)),
    }


# ----------------------------------------------------------------------------
# Pure-JAX reference and synthetic parameters
# ----------------------------------------------------------------------------
@jax.jit
def lenet_forward_ref(params, x):
    dn = ("NCHW", "OIHW", "NCHW")
    c1 = lax.conv_general_dilated(x, params["w1"], (1, 1), [(2, 2), (2, 2)],
                                  dimension_numbers=dn)
    c1 = jax.nn.relu(c1 + params["b1"].reshape(1, -1, 1, 1))
    p1 = lax.reduce_window(c1, -jnp.inf, lax.max, (1, 1, 2, 2), (1, 1, 2, 2), "VALID")
    c2 = lax.conv_general_dilated(p1, params["w2"], (1, 1), "VALID",
                                  dimension_numbers=dn)
    c2 = jax.nn.relu(c2 + params["b2"].reshape(1, -1, 1, 1))
    p2 = lax.reduce_window(c2, -jnp.inf, lax.max, (1, 1, 2, 2), (1, 1, 2, 2), "VALID")
    f = p2.reshape(p2.shape[0], -1)
    h1 = jax.nn.relu(f @ params["fw1"].T + params["fb1"])
    h2 = jax.nn.relu(h1 @ params["fw2"].T + params["fb2"])
    return h2 @ params["fw3"].T + params["fb3"]


def init_params(key):
    """Deterministic synthetic parameters with PyTorch-module shapes."""
    ks = jax.random.split(key, 10)

    def dense(k, shape, fan_in):
        return (jax.random.normal(k, shape, jnp.float32) / jnp.sqrt(fan_in)).astype(jnp.float32)

    return {
        "w1": dense(ks[0], (6, 1, 5, 5), 1 * 5 * 5),
        "b1": dense(ks[1], (6,), 25),
        "w2": dense(ks[2], (16, 6, 5, 5), 6 * 5 * 5),
        "b2": dense(ks[3], (16,), 150),
        "fw1": dense(ks[4], (120, 400), 400),
        "fb1": dense(ks[5], (120,), 400),
        "fw2": dense(ks[6], (84, 120), 120),
        "fb2": dense(ks[7], (84,), 120),
        "fw3": dense(ks[8], (10, 84), 84),
        "fb3": dense(ks[9], (10,), 84),
    }


if __name__ == "__main__":
    key = jax.random.PRNGKey(0)
    pkey, xkey = jax.random.split(key)
    params = init_params(pkey)
    kparams = prepare_params(params)   # one-time layout prep (outside the forward)
    # LeNet's fc1 (16*5*5) implies 28x28 single-channel inputs (MNIST); batch=2.
    x = jax.random.normal(xkey, (2, 1, 28, 28), jnp.float32)

    out = jax.block_until_ready(lenet_forward_pallas(kparams, x))
    assert out.shape == (2, 10) and out.dtype == jnp.float32

    ref = jax.block_until_ready(lenet_forward_ref(params, x))
    assert jnp.allclose(out, ref, atol=2e-3, rtol=2e-3), (out, ref)

    print("KERNEL_OK")
</pallas_src>

<mosaic_0001>
module attributes {stable_mosaic.version = 11 : i64} {
  func.func @_lenet_kernel(%arg0: i32, %arg1: memref<2x28x28xf32, #tpu.memory_space<vmem>>, %arg2: memref<5x32x168xf32, #tpu.memory_space<vmem>>, %arg3: memref<1x84xf32, #tpu.memory_space<vmem>>, %arg4: memref<5x84x160xf32, #tpu.memory_space<vmem>>, %arg5: memref<1x80xf32, #tpu.memory_space<vmem>>, %arg6: memref<5x80x120xf32, #tpu.memory_space<vmem>>, %arg7: memref<1x120xf32, #tpu.memory_space<vmem>>, %arg8: memref<120x84xf32, #tpu.memory_space<vmem>>, %arg9: memref<1x84xf32, #tpu.memory_space<vmem>>, %arg10: memref<84x10xf32, #tpu.memory_space<vmem>>, %arg11: memref<1x10xf32, #tpu.memory_space<vmem>>, %arg12: memref<2x10xf32, #tpu.memory_space<vmem>>, %arg13: memref<2x32x32xf32, #tpu.memory_space<vmem>>, %arg14: memref<14x84xf32, #tpu.memory_space<vmem>>) attributes {dimension_semantics = [#tpu.dimension_semantics<arbitrary>], iteration_bounds = array<i64: 1>, scalar_prefetch = 0 : i64, scratch_operands = 2 : i64, tpu.core_type = #tpu.core_type<tc>, window_params = [{pipeline_mode = #tpu.pipeline_mode<synchronous>, transform_indices = @transform_0, window_bounds = array<i64: 2, 28, 28>}, {pipeline_mode = #tpu.pipeline_mode<synchronous>, transform_indices = @transform_1, window_bounds = array<i64: 5, 32, 168>}, {pipeline_mode = #tpu.pipeline_mode<synchronous>, transform_indices = @transform_2, window_bounds = array<i64: 1, 84>}, {pipeline_mode = #tpu.pipeline_mode<synchronous>, transform_indices = @transform_3, window_bounds = array<i64: 5, 84, 160>}, {pipeline_mode = #tpu.pipeline_mode<synchronous>, transform_indices = @transform_4, window_bounds = array<i64: 1, 80>}, {pipeline_mode = #tpu.pipeline_mode<synchronous>, transform_indices = @transform_5, window_bounds = array<i64: 5, 80, 120>}, {pipeline_mode = #tpu.pipeline_mode<synchronous>, transform_indices = @transform_6, window_bounds = array<i64: 1, 120>}, {pipeline_mode = #tpu.pipeline_mode<synchronous>, transform_indices = @transform_7, window_bounds = array<i64: 120, 84>}, {pipeline_mode = #tpu.pipeline_mode<synchronous>, transform_indices = @transform_8, window_bounds = array<i64: 1, 84>}, {pipeline_mode = #tpu.pipeline_mode<synchronous>, transform_indices = @transform_9, window_bounds = array<i64: 84, 10>}, {pipeline_mode = #tpu.pipeline_mode<synchronous>, transform_indices = @transform_10, window_bounds = array<i64: 1, 10>}, {pipeline_mode = #tpu.pipeline_mode<synchronous>, transform_indices = @transform_11, window_bounds = array<i64: 2, 10>}]} {
    %cst = arith.constant 0.000000e+00 : f32
    %0 = vector.broadcast %cst : f32 to vector<2x32x32xf32>
    %c0 = arith.constant 0 : index
    %c0_0 = arith.constant 0 : index
    %c0_1 = arith.constant 0 : index
    %1 = vector.load %arg13[%c0, %c0_0, %c0_1] : memref<2x32x32xf32, #tpu.memory_space<vmem>>, vector<2x32x32xf32>
    tpu.vector_store %arg13[%c0, %c0_0, %c0_1], %0 {strides = array<i32>} : memref<2x32x32xf32, #tpu.memory_space<vmem>>, vector<2x32x32xf32>,
    %c0_2 = arith.constant 0 : index
    %c0_3 = arith.constant 0 : index
    %c0_4 = arith.constant 0 : index
    %2 = vector.load %arg1[%c0_2, %c0_3, %c0_4] : memref<2x28x28xf32, #tpu.memory_space<vmem>>, vector<2x28x28xf32>
    %c0_5 = arith.constant 0 : index
    %c2 = arith.constant 2 : index
    %c2_6 = arith.constant 2 : index
    %3 = vector.load %arg13[%c0_5, %c2, %c2_6] : memref<2x32x32xf32, #tpu.memory_space<vmem>>, vector<2x28x28xf32>
    tpu.vector_store %arg13[%c0_5, %c2, %c2_6], %2 {strides = array<i32>} : memref<2x32x32xf32, #tpu.memory_space<vmem>>, vector<2x28x28xf32>,
    %c0_7 = arith.constant 0 : index
    %c0_8 = arith.constant 0 : index
    %4 = vector.load %arg3[%c0_7, %c0_8] : memref<1x84xf32, #tpu.memory_space<vmem>>, vector<1x84xf32>
    %c0_9 = arith.constant 0 : index
    %c0_10 = arith.constant 0 : index
    %5 = vector.load %arg5[%c0_9, %c0_10] : memref<1x80xf32, #tpu.memory_space<vmem>>, vector<1x80xf32>
    %c0_11 = arith.constant 0 : index
    %c0_12 = arith.constant 0 : index
    %c0_13 = arith.constant 0 : index
    %6 = vector.load %arg13[%c0_11, %c0_12, %c0_13] : memref<2x32x32xf32, #tpu.memory_space<vmem>>, vector<1x32x32xf32>
    %7 = vector.shape_cast %6 : vector<1x32x32xf32> to vector<32x32xf32>
    %8 = vector.extract_strided_slice %7 {offsets = [0, 0], sizes = [28, 32], strides = [1, 1]} : vector<32x32xf32> to vector<28x32xf32>
    %c0_14 = arith.constant 0 : index
    %c0_15 = arith.constant 0 : index
    %c0_16 = arith.constant 0 : index
    %9 = vector.load %arg2[%c0_14, %c0_15, %c0_16] : memref<5x32x168xf32, #tpu.memory_space<vmem>>, vector<1x32x168xf32>
    %10 = vector.shape_cast %9 : vector<1x32x168xf32> to vector<32x168xf32>
    %cst_17 = arith.constant dense<0.000000e+00> : vector<28x168xf32>
    %11 = tpu.matmul %8, %10, %cst_17 {dimension_numbers = #tpu.dot_dimension_numbers<[1], [0], [0], [1], [0, 0, 1, 1], [], []>} : vector<28x32xf32>, vector<32x168xf32>, vector<28x168xf32> -> vector<28x168xf32>
    %12 = vector.extract_strided_slice %7 {offsets = [1, 0], sizes = [28, 32], strides = [1, 1]} : vector<32x32xf32> to vector<28x32xf32>
    %c1 = arith.constant 1 : index
    %c0_18 = arith.constant 0 : index
    %c0_19 = arith.constant 0 : index
    %13 = vector.load %arg2[%c1, %c0_18, %c0_19] : memref<5x32x168xf32, #tpu.memory_space<vmem>>, vector<1x32x168xf32>
    %14 = vector.shape_cast %13 : vector<1x32x168xf32> to vector<32x168xf32>
    %cst_20 = arith.constant dense<0.000000e+00> : vector<28x168xf32>
    %15 = tpu.matmul %12, %14, %cst_20 {dimension_numbers = #tpu.dot_dimension_numbers<[1], [0], [0], [1], [0, 0, 1, 1], [], []>} : vector<28x32xf32>, vector<32x168xf32>, vector<28x168xf32> -> vector<28x168xf32>
    %16 = arith.addf %11, %15 : vector<28x168xf32>
    %17 = vector.extract_strided_slice %7 {offsets = [2, 0], sizes = [28, 32], strides = [1, 1]} : vector<32x32xf32> to vector<28x32xf32>
    %c2_21 = arith.constant 2 : index
    %c0_22 = arith.constant 0 : index
    %c0_23 = arith.constant 0 : index
    %18 = vector.load %arg2[%c2_21, %c0_22, %c0_23] : memref<5x32x168xf32, #tpu.memory_space<vmem>>, vector<1x32x168xf32>
    %19 = vector.shape_cast %18 : vector<1x32x168xf32> to vector<32x168xf32>
    %cst_24 = arith.constant dense<0.000000e+00> : vector<28x168xf32>
    %20 = tpu.matmul %17, %19, %cst_24 {dimension_numbers = #tpu.dot_dimension_numbers<[1], [0], [0], [1], [0, 0, 1, 1], [], []>} : vector<28x32xf32>, vector<32x168xf32>, vector<28x168xf32> -> vector<28x168xf32>
    %21 = arith.addf %16, %20 : vector<28x168xf32>
    %22 = vector.extract_strided_slice %7 {offsets = [3, 0], sizes = [28, 32], strides = [1, 1]} : vector<32x32xf32> to vector<28x32xf32>
    %c3 = arith.constant 3 : index
    %c0_25 = arith.constant 0 : index
    %c0_26 = arith.constant 0 : index
    %23 = vector.load %arg2[%c3, %c0_25, %c0_26] : memref<5x32x168xf32, #tpu.memory_space<vmem>>, vector<1x32x168xf32>
    %24 = vector.shape_cast %23 : vector<1x32x168xf32> to vector<32x168xf32>
    %cst_27 = arith.constant dense<0.000000e+00> : vector<28x168xf32>
    %25 = tpu.matmul %22, %24, %cst_27 {dimension_numbers = #tpu.dot_dimension_numbers<[1], [0], [0], [1], [0, 0, 1, 1], [], []>} : vector<28x32xf32>, vector<32x168xf32>, vector<28x168xf32> -> vector<28x168xf32>
    %26 = arith.addf %21, %25 : vector<28x168xf32>
    %27 = vector.extract_strided_slice %7 {offsets = [4, 0], sizes = [28, 32], strides = [1, 1]} : vector<32x32xf32> to vector<28x32xf32>
    %c4 = arith.constant 4 : index
    %c0_28 = arith.constant 0 : index
    %c0_29 = arith.constant 0 : index
    %28 = vector.load %arg2[%c4, %c0_28, %c0_29] : memref<5x32x168xf32, #tpu.memory_space<vmem>>, vector<1x32x168xf32>
    %29 = vector.shape_cast %28 : vector<1x32x168xf32> to vector<32x168xf32>
    %cst_30 = arith.constant dense<0.000000e+00> : vector<28x168xf32>
    %30 = tpu.matmul %27, %29, %cst_30 {dimension_numbers = #tpu.dot_dimension_numbers<[1], [0], [0], [1], [0, 0, 1, 1], [], []>} : vector<28x32xf32>, vector<32x168xf32>, vector<28x168xf32> -> vector<28x168xf32>
    %31 = arith.addf %26, %30 : vector<28x168xf32>
    %32 = vector.extract_strided_slice %31 {offsets = [0, 0], sizes = [28, 84], strides = [1, 1]} : vector<28x168xf32> to vector<28x84xf32>
    %33 = vector.extract_strided_slice %31 {offsets = [0, 84], sizes = [28, 84], strides = [1, 1]} : vector<28x168xf32> to vector<28x84xf32>
    %34 = arith.maximumf %32, %33 : vector<28x84xf32>
    %35 = vector.extract_strided_slice %34 {offsets = [0, 0], sizes = [1, 84], strides = [1, 1]} : vector<28x84xf32> to vector<1x84xf32>
    %36 = vector.extract_strided_slice %34 {offsets = [1, 0], sizes = [1, 84], strides = [1, 1]} : vector<28x84xf32> to vector<1x84xf32>
    %37 = arith.maximumf %35, %36 : vector<1x84xf32>
    %38 = arith.addf %37, %4 : vector<1x84xf32>
    %cst_31 = arith.constant 0.000000e+00 : f32
    %39 = vector.broadcast %cst_31 : f32 to vector<1x84xf32>
    %40 = arith.maximumf %38, %39 : vector<1x84xf32>
    %c0_32 = arith.constant 0 : index
    %c0_33 = arith.constant 0 : index
    %41 = vector.load %arg14[%c0_32, %c0_33] : memref<14x84xf32, #tpu.memory_space<vmem>>, vector<1x84xf32>
    tpu.vector_store %arg14[%c0_32, %c0_33], %40 {strides = array<i32>} : memref<14x84xf32, #tpu.memory_space<vmem>>, vector<1x84xf32>,
    %42 = vector.extract_strided_slice %34 {offsets = [2, 0], sizes = [1, 84], strides = [1, 1]} : vector<28x84xf32> to vector<1x84xf32>
    %43 = vector.extract_strided_slice %34 {offsets = [3, 0], sizes = [1, 84], strides = [1, 1]} : vector<28x84xf32> to vector<1x84xf32>
    %44 = arith.maximumf %42, %43 : vector<1x84xf32>
    %45 = arith.addf %44, %4 : vector<1x84xf32>
    %cst_34 = arith.constant 0.000000e+00 : f32
    %46 = vector.broadcast %cst_34 : f32 to vector<1x84xf32>
    %47 = arith.maximumf %45, %46 : vector<1x84xf32>
    %c1_35 = arith.constant 1 : index
    %c0_36 = arith.constant 0 : index
    %48 = vector.load %arg14[%c1_35, %c0_36] : memref<14x84xf32, #tpu.memory_space<vmem>>, vector<1x84xf32>
    tpu.vector_store %arg14[%c1_35, %c0_36], %47 {strides = array<i32>} : memref<14x84xf32, #tpu.memory_space<vmem>>, vector<1x84xf32>,
    %49 = vector.extract_strided_slice %34 {offsets = [4, 0], sizes = [1, 84], strides = [1, 1]} : vector<28x84xf32> to vector<1x84xf32>
    %50 = vector.extract_strided_slice %34 {offsets = [5, 0], sizes = [1, 84], strides = [1, 1]} : vector<28x84xf32> to vector<1x84xf32>
    %51 = arith.maximumf %49, %50 : vector<1x84xf32>
    %52 = arith.addf %51, %4 : vector<1x84xf32>
    %cst_37 = arith.constant 0.000000e+00 : f32
    %53 = vector.broadcast %cst_37 : f32 to vector<1x84xf32>
    %54 = arith.maximumf %52, %53 : vector<1x84xf32>
    %c2_38 = arith.constant 2 : index
    %c0_39 = arith.constant 0 : index
    %55 = vector.load %arg14[%c2_38, %c0_39] : memref<14x84xf32, #tpu.memory_space<vmem>>, vector<1x84xf32>
    tpu.vector_store %arg14[%c2_38, %c0_39], %54 {strides = array<i32>} : memref<14x84xf32, #tpu.memory_space<vmem>>, vector<1x84xf32>,
    %56 = vector.extract_strided_slice %34 {offsets = [6, 0], sizes = [1, 84], strides = [1, 1]} : vector<28x84xf32> to vector<1x84xf32>
    %57 = vector.extract_strided_slice %34 {offsets = [7, 0], sizes = [1, 84], strides = [1, 1]} : vector<28x84xf32> to vector<1x84xf32>
    %58 = arith.maximumf %56, %57 : vector<1x84xf32>
    %59 = arith.addf %58, %4 : vector<1x84xf32>
    %cst_40 = arith.constant 0.000000e+00 : f32
    %60 = vector.broadcast %cst_40 : f32 to vector<1x84xf32>
    %61 = arith.maximumf %59, %60 : vector<1x84xf32>
    %c3_41 = arith.constant 3 : index
    %c0_42 = arith.constant 0 : index
    %62 = vector.load %arg14[%c3_41, %c0_42] : memref<14x84xf32, #tpu.memory_space<vmem>>, vector<1x84xf32>
    tpu.vector_store %arg14[%c3_41, %c0_42], %61 {strides = array<i32>} : memref<14x84xf32, #tpu.memory_space<vmem>>, vector<1x84xf32>,
    %63 = vector.extract_strided_slice %34 {offsets = [8, 0], sizes = [1, 84], strides = [1, 1]} : vector<28x84xf32> to vector<1x84xf32>
    %64 = vector.extract_strided_slice %34 {offsets = [9, 0], sizes = [1, 84], strides = [1, 1]} : vector<28x84xf32> to vector<1x84xf32>
    %65 = arith.maximumf %63, %64 : vector<1x84xf32>
    %66 = arith.addf %65, %4 : vector<1x84xf32>
    %cst_43 = arith.constant 0.000000e+00 : f32
    %67 = vector.broadcast %cst_43 : f32 to vector<1x84xf32>
    %68 = arith.maximumf %66, %67 : vector<1x84xf32>
    %c4_44 = arith.constant 4 : index
    %c0_45 = arith.constant 0 : index
    %69 = vector.load %arg14[%c4_44, %c0_45] : memref<14x84xf32, #tpu.memory_space<vmem>>, vector<1x84xf32>
    tpu.vector_store %arg14[%c4_44, %c0_45], %68 {strides = array<i32>} : memref<14x84xf32, #tpu.memory_space<vmem>>, vector<1x84xf32>,
    %70 = vector.extract_strided_slice %34 {offsets = [10, 0], sizes = [1, 84], strides = [1, 1]} : vector<28x84xf32> to vector<1x84xf32>
    %71 = vector.extract_strided_slice %34 {offsets = [11, 0], sizes = [1, 84], strides = [1, 1]} : vector<28x84xf32> to vector<1x84xf32>
    %72 = arith.maximumf %70, %71 : vector<1x84xf32>
    %73 = arith.addf %72, %4 : vector<1x84xf32>
    %cst_46 = arith.constant 0.000000e+00 : f32
    %74 = vector.broadcast %cst_46 : f32 to vector<1x84xf32>
    %75 = arith.maximumf %73, %74 : vector<1x84xf32>
    %c5 = arith.constant 5 : index
    %c0_47 = arith.constant 0 : index
    %76 = vector.load %arg14[%c5, %c0_47] : memref<14x84xf32, #tpu.memory_space<vmem>>, vector<1x84xf32>
    tpu.vector_store %arg14[%c5, %c0_47], %75 {strides = array<i32>} : memref<14x84xf32, #tpu.memory_space<vmem>>, vector<1x84xf32>,
    %77 = vector.extract_strided_slice %34 {offsets = [12, 0], sizes = [1, 84], strides = [1, 1]} : vector<28x84xf32> to vector<1x84xf32>
    %78 = vector.extract_strided_slice %34 {offsets = [13, 0], sizes = [1, 84], strides = [1, 1]} : vector<28x84xf32> to vector<1x84xf32>
    %79 = arith.maximumf %77, %78 : vector<1x84xf32>
    %80 = arith.addf %79, %4 : vector<1x84xf32>
    %cst_48 = arith.constant 0.000000e+00 : f32
    %81 = vector.broadcast %cst_48 : f32 to vector<1x84xf32>
    %82 = arith.maximumf %80, %81 : vector<1x84xf32>
    %c6 = arith.constant 6 : index
    %c0_49 = arith.constant 0 : index
    %83 = vector.load %arg14[%c6, %c0_49] : memref<14x84xf32, #tpu.memory_space<vmem>>, vector<1x84xf32>
    tpu.vector_store %arg14[%c6, %c0_49], %82 {strides = array<i32>} : memref<14x84xf32, #tpu.memory_space<vmem>>, vector<1x84xf32>,
    %84 = vector.extract_strided_slice %34 {offsets = [14, 0], sizes = [1, 84], strides = [1, 1]} : vector<28x84xf32> to vector<1x84xf32>
    %85 = vector.extract_strided_slice %34 {offsets = [15, 0], sizes = [1, 84], strides = [1, 1]} : vector<28x84xf32> to vector<1x84xf32>
    %86 = arith.maximumf %84, %85 : vector<1x84xf32>
    %87 = arith.addf %86, %4 : vector<1x84xf32>
    %cst_50 = arith.constant 0.000000e+00 : f32
    %88 = vector.broadcast %cst_50 : f32 to vector<1x84xf32>
    %89 = arith.maximumf %87, %88 : vector<1x84xf32>
    %c7 = arith.constant 7 : index
    %c0_51 = arith.constant 0 : index
    %90 = vector.load %arg14[%c7, %c0_51] : memref<14x84xf32, #tpu.memory_space<vmem>>, vector<1x84xf32>
    tpu.vector_store %arg14[%c7, %c0_51], %89 {strides = array<i32>} : memref<14x84xf32, #tpu.memory_space<vmem>>, vector<1x84xf32>,
    %91 = vector.extract_strided_slice %34 {offsets = [16, 0], sizes = [1, 84], strides = [1, 1]} : vector<28x84xf32> to vector<1x84xf32>
    %92 = vector.extract_strided_slice %34 {offsets = [17, 0], sizes = [1, 84], strides = [1, 1]} : vector<28x84xf32> to vector<1x84xf32>
    %93 = arith.maximumf %91, %92 : vector<1x84xf32>
    %94 = arith.addf %93, %4 : vector<1x84xf32>
    %cst_52 = arith.constant 0.000000e+00 : f32
    %95 = vector.broadcast %cst_52 : f32 to vector<1x84xf32>
    %96 = arith.maximumf %94, %95 : vector<1x84xf32>
    %c8 = arith.constant 8 : index
    %c0_53 = arith.constant 0 : index
    %97 = vector.load %arg14[%c8, %c0_53] : memref<14x84xf32, #tpu.memory_space<vmem>>, vector<1x84xf32>
    tpu.vector_store %arg14[%c8, %c0_53], %96 {strides = array<i32>} : memref<14x84xf32, #tpu.memory_space<vmem>>, vector<1x84xf32>,
    %98 = vector.extract_strided_slice %34 {offsets = [18, 0], sizes = [1, 84], strides = [1, 1]} : vector<28x84xf32> to vector<1x84xf32>
    %99 = vector.extract_strided_slice %34 {offsets = [19, 0], sizes = [1, 84], strides = [1, 1]} : vector<28x84xf32> to vector<1x84xf32>
    %100 = arith.maximumf %98, %99 : vector<1x84xf32>
    %101 = arith.addf %100, %4 : vector<1x84xf32>
    %cst_54 = arith.constant 0.000000e+00 : f32
    %102 = vector.broadcast %cst_54 : f32 to vector<1x84xf32>
    %103 = arith.maximumf %101, %102 : vector<1x84xf32>
    %c9 = arith.constant 9 : index
    %c0_55 = arith.constant 0 : index
    %104 = vector.load %arg14[%c9, %c0_55] : memref<14x84xf32, #tpu.memory_space<vmem>>, vector<1x84xf32>
    tpu.vector_store %arg14[%c9, %c0_55], %103 {strides = array<i32>} : memref<14x84xf32, #tpu.memory_space<vmem>>, vector<1x84xf32>,
    %105 = vector.extract_strided_slice %34 {offsets = [20, 0], sizes = [1, 84], strides = [1, 1]} : vector<28x84xf32> to vector<1x84xf32>
    %106 = vector.extract_strided_slice %34 {offsets = [21, 0], sizes = [1, 84], strides = [1, 1]} : vector<28x84xf32> to vector<1x84xf32>
    %107 = arith.maximumf %105, %106 : vector<1x84xf32>
    %108 = arith.addf %107, %4 : vector<1x84xf32>
    %cst_56 = arith.constant 0.000000e+00 : f32
    %109 = vector.broadcast %cst_56 : f32 to vector<1x84xf32>
    %110 = arith.maximumf %108, %109 : vector<1x84xf32>
    %c10 = arith.constant 10 : index
    %c0_57 = arith.constant 0 : index
    %111 = vector.load %arg14[%c10, %c0_57] : memref<14x84xf32, #tpu.memory_space<vmem>>, vector<1x84xf32>
    tpu.vector_store %arg14[%c10, %c0_57], %110 {strides = array<i32>} : memref<14x84xf32, #tpu.memory_space<vmem>>, vector<1x84xf32>,
    %112 = vector.extract_strided_slice %34 {offsets = [22, 0], sizes = [1, 84], strides = [1, 1]} : vector<28x84xf32> to vector<1x84xf32>
    %113 = vector.extract_strided_slice %34 {offsets = [23, 0], sizes = [1, 84], strides = [1, 1]} : vector<28x84xf32> to vector<1x84xf32>
    %114 = arith.maximumf %112, %113 : vector<1x84xf32>
    %115 = arith.addf %114, %4 : vector<1x84xf32>
    %cst_58 = arith.constant 0.000000e+00 : f32
    %116 = vector.broadcast %cst_58 : f32 to vector<1x84xf32>
    %117 = arith.maximumf %115, %116 : vector<1x84xf32>
    %c11 = arith.constant 11 : index
    %c0_59 = arith.constant 0 : index
    %118 = vector.load %arg14[%c11, %c0_59] : memref<14x84xf32, #tpu.memory_space<vmem>>, vector<1x84xf32>
    tpu.vector_store %arg14[%c11, %c0_59], %117 {strides = array<i32>} : memref<14x84xf32, #tpu.memory_space<vmem>>, vector<1x84xf32>,
    %119 = vector.extract_strided_slice %34 {offsets = [24, 0], sizes = [1, 84], strides = [1, 1]} : vector<28x84xf32> to vector<1x84xf32>
    %120 = vector.extract_strided_slice %34 {offsets = [25, 0], sizes = [1, 84], strides = [1, 1]} : vector<28x84xf32> to vector<1x84xf32>
    %121 = arith.maximumf %119, %120 : vector<1x84xf32>
    %122 = arith.addf %121, %4 : vector<1x84xf32>
    %cst_60 = arith.constant 0.000000e+00 : f32
    %123 = vector.broadcast %cst_60 : f32 to vector<1x84xf32>
    %124 = arith.maximumf %122, %123 : vector<1x84xf32>
    %c12 = arith.constant 12 : index
    %c0_61 = arith.constant 0 : index
    %125 = vector.load %arg14[%c12, %c0_61] : memref<14x84xf32, #tpu.memory_space<vmem>>, vector<1x84xf32>
    tpu.vector_store %arg14[%c12, %c0_61], %124 {strides = array<i32>} : memref<14x84xf32, #tpu.memory_space<vmem>>, vector<1x84xf32>,
    %126 = vector.extract_strided_slice %34 {offsets = [26, 0], sizes = [1, 84], strides = [1, 1]} : vector<28x84xf32> to vector<1x84xf32>
    %127 = vector.extract_strided_slice %34 {offsets = [27, 0], sizes = [1, 84], strides = [1, 1]} : vector<28x84xf32> to vector<1x84xf32>
    %128 = arith.maximumf %126, %127 : vector<1x84xf32>
    %129 = arith.addf %128, %4 : vector<1x84xf32>
    %cst_62 = arith.constant 0.000000e+00 : f32
    %130 = vector.broadcast %cst_62 : f32 to vector<1x84xf32>
    %131 = arith.maximumf %129, %130 : vector<1x84xf32>
    %c13 = arith.constant 13 : index
    %c0_63 = arith.constant 0 : index
    %132 = vector.load %arg14[%c13, %c0_63] : memref<14x84xf32, #tpu.memory_space<vmem>>, vector<1x84xf32>
    tpu.vector_store %arg14[%c13, %c0_63], %131 {strides = array<i32>} : memref<14x84xf32, #tpu.memory_space<vmem>>, vector<1x84xf32>,
    %c0_64 = arith.constant 0 : index
    %c0_65 = arith.constant 0 : index
    %133 = vector.load %arg14[%c0_64, %c0_65] : memref<14x84xf32, #tpu.memory_space<vmem>>, vector<10x84xf32>
    %c0_66 = arith.constant 0 : index
    %c0_67 = arith.constant 0 : index
    %c0_68 = arith.constant 0 : index
    %134 = vector.load %arg4[%c0_66, %c0_67, %c0_68] : memref<5x84x160xf32, #tpu.memory_space<vmem>>, vector<1x84x160xf32>
    %135 = vector.shape_cast %134 : vector<1x84x160xf32> to vector<84x160xf32>
    %cst_69 = arith.constant dense<0.000000e+00> : vector<10x160xf32>
    %136 = tpu.matmul %133, %135, %cst_69 {dimension_numbers = #tpu.dot_dimension_numbers<[1], [0], [0], [1], [0, 0, 1, 1], [], []>} : vector<10x84xf32>, vector<84x160xf32>, vector<10x160xf32> -> vector<10x160xf32>
    %c1_70 = arith.constant 1 : index
    %c0_71 = arith.constant 0 : index
    %137 = vector.load %arg14[%c1_70, %c0_71] : memref<14x84xf32, #tpu.memory_space<vmem>>, vector<10x84xf32>
    %c1_72 = arith.constant 1 : index
    %c0_73 = arith.constant 0 : index
    %c0_74 = arith.constant 0 : index
    %138 = vector.load %arg4[%c1_72, %c0_73, %c0_74] : memref<5x84x160xf32, #tpu.memory_space<vmem>>, vector<1x84x160xf32>
    %139 = vector.shape_cast %138 : vector<1x84x160xf32> to vector<84x160xf32>
    %cst_75 = arith.constant dense<0.000000e+00> : vector<10x160xf32>
    %140 = tpu.matmul %137, %139, %cst_75 {dimension_numbers = #tpu.dot_dimension_numbers<[1], [0], [0], [1], [0, 0, 1, 1], [], []>} : vector<10x84xf32>, vector<84x160xf32>, vector<10x160xf32> -> vector<10x160xf32>
    %141 = arith.addf %136, %140 : vector<10x160xf32>
    %c2_76 = arith.constant 2 : index
    %c0_77 = arith.constant 0 : index
    %142 = vector.load %arg14[%c2_76, %c0_77] : memref<14x84xf32, #tpu.memory_space<vmem>>, vector<10x84xf32>
    %c2_78 = arith.constant 2 : index
    %c0_79 = arith.constant 0 : index
    %c0_80 = arith.constant 0 : index
    %143 = vector.load %arg4[%c2_78, %c0_79, %c0_80] : memref<5x84x160xf32, #tpu.memory_space<vmem>>, vector<1x84x160xf32>
    %144 = vector.shape_cast %143 : vector<1x84x160xf32> to vector<84x160xf32>
    %cst_81 = arith.constant dense<0.000000e+00> : vector<10x160xf32>
    %145 = tpu.matmul %142, %144, %cst_81 {dimension_numbers = #tpu.dot_dimension_numbers<[1], [0], [0], [1], [0, 0, 1, 1], [], []>} : vector<10x84xf32>, vector<84x160xf32>, vector<10x160xf32> -> vector<10x160xf32>
    %146 = arith.addf %141, %145 : vector<10x160xf32>
    %c3_82 = arith.constant 3 : index
    %c0_83 = arith.constant 0 : index
    %147 = vector.load %arg14[%c3_82, %c0_83] : memref<14x84xf32, #tpu.memory_space<vmem>>, vector<10x84xf32>
    %c3_84 = arith.constant 3 : index
    %c0_85 = arith.constant 0 : index
    %c0_86 = arith.constant 0 : index
    %148 = vector.load %arg4[%c3_84, %c0_85, %c0_86] : memref<5x84x160xf32, #tpu.memory_space<vmem>>, vector<1x84x160xf32>
    %149 = vector.shape_cast %148 : vector<1x84x160xf32> to vector<84x160xf32>
    %cst_87 = arith.constant dense<0.000000e+00> : vector<10x160xf32>
    %150 = tpu.matmul %147, %149, %cst_87 {dimension_numbers = #tpu.dot_dimension_numbers<[1], [0], [0], [1], [0, 0, 1, 1], [], []>} : vector<10x84xf32>, vector<84x160xf32>, vector<10x160xf32> -> vector<10x160xf32>
    %151 = arith.addf %146, %150 : vector<10x160xf32>
    %c4_88 = arith.constant 4 : index
    %c0_89 = arith.constant 0 : index
    %152 = vector.load %arg14[%c4_88, %c0_89] : memref<14x84xf32, #tpu.memory_space<vmem>>, vector<10x84xf32>
    %c4_90 = arith.constant 4 : index
    %c0_91 = arith.constant 0 : index
    %c0_92 = arith.constant 0 : index
    %153 = vector.load %arg4[%c4_90, %c0_91, %c0_92] : memref<5x84x160xf32, #tpu.memory_space<vmem>>, vector<1x84x160xf32>
    %154 = vector.shape_cast %153 : vector<1x84x160xf32> to vector<84x160xf32>
    %cst_93 = arith.constant dense<0.000000e+00> : vector<10x160xf32>
    %155 = tpu.matmul %152, %154, %cst_93 {dimension_numbers = #tpu.dot_dimension_numbers<[1], [0], [0], [1], [0, 0, 1, 1], [], []>} : vector<10x84xf32>, vector<84x160xf32>, vector<10x160xf32> -> vector<10x160xf32>
    %156 = arith.addf %151, %155 : vector<10x160xf32>
    %157 = vector.extract_strided_slice %156 {offsets = [0, 0], sizes = [10, 80], strides = [1, 1]} : vector<10x160xf32> to vector<10x80xf32>
    %158 = vector.extract_strided_slice %156 {offsets = [0, 80], sizes = [10, 80], strides = [1, 1]} : vector<10x160xf32> to vector<10x80xf32>
    %159 = arith.maximumf %157, %158 : vector<10x80xf32>
    %c0_94 = arith.constant 0 : index
    %c0_95 = arith.constant 0 : index
    %160 = vector.load %arg7[%c0_94, %c0_95] : memref<1x120xf32, #tpu.memory_space<vmem>>, vector<1x120xf32>
    %161 = vector.extract_strided_slice %159 {offsets = [0, 0], sizes = [1, 80], strides = [1, 1]} : vector<10x80xf32> to vector<1x80xf32>
    %162 = vector.extract_strided_slice %159 {offsets = [1, 0], sizes = [1, 80], strides = [1, 1]} : vector<10x80xf32> to vector<1x80xf32>
    %163 = arith.maximumf %161, %162 : vector<1x80xf32>
    %164 = arith.addf %163, %5 : vector<1x80xf32>
    %cst_96 = arith.constant 0.000000e+00 : f32
    %165 = vector.broadcast %cst_96 : f32 to vector<1x80xf32>
    %166 = arith.maximumf %164, %165 : vector<1x80xf32>
    %c0_97 = arith.constant 0 : index
    %c0_98 = arith.constant 0 : index
    %c0_99 = arith.constant 0 : index
    %167 = vector.load %arg6[%c0_97, %c0_98, %c0_99] : memref<5x80x120xf32, #tpu.memory_space<vmem>>, vector<1x80x120xf32>
    %168 = vector.shape_cast %167 : vector<1x80x120xf32> to vector<80x120xf32>
    %cst_100 = arith.constant dense<0.000000e+00> : vector<1x120xf32>
    %169 = tpu.matmul %166, %168, %cst_100 {dimension_numbers = #tpu.dot_dimension_numbers<[1], [0], [0], [1], [0, 0, 1, 1], [], []>} : vector<1x80xf32>, vector<80x120xf32>, vector<1x120xf32> -> vector<1x120xf32>
    %170 = arith.addf %160, %169 : vector<1x120xf32>
    %171 = vector.extract_strided_slice %159 {offsets = [2, 0], sizes = [1, 80], strides = [1, 1]} : vector<10x80xf32> to vector<1x80xf32>
    %172 = vector.extract_strided_slice %159 {offsets = [3, 0], sizes = [1, 80], strides = [1, 1]} : vector<10x80xf32> to vector<1x80xf32>
    %173 = arith.maximumf %171, %172 : vector<1x80xf32>
    %174 = arith.addf %173, %5 : vector<1x80xf32>
    %cst_101 = arith.constant 0.000000e+00 : f32
    %175 = vector.broadcast %cst_101 : f32 to vector<1x80xf32>
    %176 = arith.maximumf %174, %175 : vector<1x80xf32>
    %c1_102 = arith.constant 1 : index
    %c0_103 = arith.constant 0 : index
    %c0_104 = arith.constant 0 : index
    %177 = vector.load %arg6[%c1_102, %c0_103, %c0_104] : memref<5x80x120xf32, #tpu.memory_space<vmem>>, vector<1x80x120xf32>
    %178 = vector.shape_cast %177 : vector<1x80x120xf32> to vector<80x120xf32>
    %cst_105 = arith.constant dense<0.000000e+00> : vector<1x120xf32>
    %179 = tpu.matmul %176, %178, %cst_105 {dimension_numbers = #tpu.dot_dimension_numbers<[1], [0], [0], [1], [0, 0, 1, 1], [], []>} : vector<1x80xf32>, vector<80x120xf32>, vector<1x120xf32> -> vector<1x120xf32>
    %180 = arith.addf %170, %179 : vector<1x120xf32>
    %181 = vector.extract_strided_slice %159 {offsets = [4, 0], sizes = [1, 80], strides = [1, 1]} : vector<10x80xf32> to vector<1x80xf32>
    %182 = vector.extract_strided_slice %159 {offsets = [5, 0], sizes = [1, 80], strides = [1, 1]} : vector<10x80xf32> to vector<1x80xf32>
    %183 = arith.maximumf %181, %182 : vector<1x80xf32>
    %184 = arith.addf %183, %5 : vector<1x80xf32>
    %cst_106 = arith.constant 0.000000e+00 : f32
    %185 = vector.broadcast %cst_106 : f32 to vector<1x80xf32>
    %186 = arith.maximumf %184, %185 : vector<1x80xf32>
    %c2_107 = arith.constant 2 : index
    %c0_108 = arith.constant 0 : index
    %c0_109 = arith.constant 0 : index
    %187 = vector.load %arg6[%c2_107, %c0_108, %c0_109] : memref<5x80x120xf32, #tpu.memory_space<vmem>>, vector<1x80x120xf32>
    %188 = vector.shape_cast %187 : vector<1x80x120xf32> to vector<80x120xf32>
    %cst_110 = arith.constant dense<0.000000e+00> : vector<1x120xf32>
    %189 = tpu.matmul %186, %188, %cst_110 {dimension_numbers = #tpu.dot_dimension_numbers<[1], [0], [0], [1], [0, 0, 1, 1], [], []>} : vector<1x80xf32>, vector<80x120xf32>, vector<1x120xf32> -> vector<1x120xf32>
    %190 = arith.addf %180, %189 : vector<1x120xf32>
    %191 = vector.extract_strided_slice %159 {offsets = [6, 0], sizes = [1, 80], strides = [1, 1]} : vector<10x80xf32> to vector<1x80xf32>
    %192 = vector.extract_strided_slice %159 {offsets = [7, 0], sizes = [1, 80], strides = [1, 1]} : vector<10x80xf32> to vector<1x80xf32>
    %193 = arith.maximumf %191, %192 : vector<1x80xf32>
    %194 = arith.addf %193, %5 : vector<1x80xf32>
    %cst_111 = arith.constant 0.000000e+00 : f32
    %195 = vector.broadcast %cst_111 : f32 to vector<1x80xf32>
    %196 = arith.maximumf %194, %195 : vector<1x80xf32>
    %c3_112 = arith.constant 3 : index
    %c0_113 = arith.constant 0 : index
    %c0_114 = arith.constant 0 : index
    %197 = vector.load %arg6[%c3_112, %c0_113, %c0_114] : memref<5x80x120xf32, #tpu.memory_space<vmem>>, vector<1x80x120xf32>
    %198 = vector.shape_cast %197 : vector<1x80x120xf32> to vector<80x120xf32>
    %cst_115 = arith.constant dense<0.000000e+00> : vector<1x120xf32>
    %199 = tpu.matmul %196, %198, %cst_115 {dimension_numbers = #tpu.dot_dimension_numbers<[1], [0], [0], [1], [0, 0, 1, 1], [], []>} : vector<1x80xf32>, vector<80x120xf32>, vector<1x120xf32> -> vector<1x120xf32>
    %200 = arith.addf %190, %199 : vector<1x120xf32>
    %201 = vector.extract_strided_slice %159 {offsets = [8, 0], sizes = [1, 80], strides = [1, 1]} : vector<10x80xf32> to vector<1x80xf32>
    %202 = vector.extract_strided_slice %159 {offsets = [9, 0], sizes = [1, 80], strides = [1, 1]} : vector<10x80xf32> to vector<1x80xf32>
    %203 = arith.maximumf %201, %202 : vector<1x80xf32>
    %204 = arith.addf %203, %5 : vector<1x80xf32>
    %cst_116 = arith.constant 0.000000e+00 : f32
    %205 = vector.broadcast %cst_116 : f32 to vector<1x80xf32>
    %206 = arith.maximumf %204, %205 : vector<1x80xf32>
    %c4_117 = arith.constant 4 : index
    %c0_118 = arith.constant 0 : index
    %c0_119 = arith.constant 0 : index
    %207 = vector.load %arg6[%c4_117, %c0_118, %c0_119] : memref<5x80x120xf32, #tpu.memory_space<vmem>>, vector<1x80x120xf32>
    %208 = vector.shape_cast %207 : vector<1x80x120xf32> to vector<80x120xf32>
    %cst_120 = arith.constant dense<0.000000e+00> : vector<1x120xf32>
    %209 = tpu.matmul %206, %208, %cst_120 {dimension_numbers = #tpu.dot_dimension_numbers<[1], [0], [0], [1], [0, 0, 1, 1], [], []>} : vector<1x80xf32>, vector<80x120xf32>, vector<1x120xf32> -> vector<1x120xf32>
    %210 = arith.addf %200, %209 : vector<1x120xf32>
    %cst_121 = arith.constant 0.000000e+00 : f32
    %211 = vector.broadcast %cst_121 : f32 to vector<1x120xf32>
    %212 = arith.maximumf %210, %211 : vector<1x120xf32>
    %c0_122 = arith.constant 0 : index
    %c0_123 = arith.constant 0 : index
    %213 = vector.load %arg8[%c0_122, %c0_123] : memref<120x84xf32, #tpu.memory_space<vmem>>, vector<120x84xf32>
    %cst_124 = arith.constant dense<0.000000e+00> : vector<1x84xf32>
    %214 = tpu.matmul %212, %213, %cst_124 {dimension_numbers = #tpu.dot_dimension_numbers<[1], [0], [0], [1], [0, 0, 1, 1], [], []>} : vector<1x120xf32>, vector<120x84xf32>, vector<1x84xf32> -> vector<1x84xf32>
    %c0_125 = arith.constant 0 : index
    %c0_126 = arith.constant 0 : index
    %215 = vector.load %arg9[%c0_125, %c0_126] : memref<1x84xf32, #tpu.memory_space<vmem>>, vector<1x84xf32>
    %216 = arith.addf %214, %215 : vector<1x84xf32>
    %cst_127 = arith.constant 0.000000e+00 : f32
    %217 = vector.broadcast %cst_127 : f32 to vector<1x84xf32>
    %218 = arith.maximumf %216, %217 : vector<1x84xf32>
    %c0_128 = arith.constant 0 : index
    %c0_129 = arith.constant 0 : index
    %219 = vector.load %arg10[%c0_128, %c0_129] : memref<84x10xf32, #tpu.memory_space<vmem>>, vector<84x10xf32>
    %cst_130 = arith.constant dense<0.000000e+00> : vector<1x10xf32>
    %220 = tpu.matmul %218, %219, %cst_130 {dimension_numbers = #tpu.dot_dimension_numbers<[1], [0], [0], [1], [0, 0, 1, 1], [], []>} : vector<1x84xf32>, vector<84x10xf32>, vector<1x10xf32> -> vector<1x10xf32>
    %c0_131 = arith.constant 0 : index
    %c0_132 = arith.constant 0 : index
    %221 = vector.load %arg11[%c0_131, %c0_132] : memref<1x10xf32, #tpu.memory_space<vmem>>, vector<1x10xf32>
    %222 = arith.addf %220, %221 : vector<1x10xf32>
    %c0_133 = arith.constant 0 : index
    %c0_134 = arith.constant 0 : index
    %223 = vector.load %arg12[%c0_133, %c0_134] : memref<2x10xf32, #tpu.memory_space<vmem>>, vector<1x10xf32>
    tpu.vector_store %arg12[%c0_133, %c0_134], %222 {strides = array<i32>} : memref<2x10xf32, #tpu.memory_space<vmem>>, vector<1x10xf32>,
    %c1_135 = arith.constant 1 : index
    %c0_136 = arith.constant 0 : index
    %c0_137 = arith.constant 0 : index
    %224 = vector.load %arg13[%c1_135, %c0_136, %c0_137] : memref<2x32x32xf32, #tpu.memory_space<vmem>>, vector<1x32x32xf32>
    %225 = vector.shape_cast %224 : vector<1x32x32xf32> to vector<32x32xf32>
    %226 = vector.extract_strided_slice %225 {offsets = [0, 0], sizes = [28, 32], strides = [1, 1]} : vector<32x32xf32> to vector<28x32xf32>
    %c0_138 = arith.constant 0 : index
    %c0_139 = arith.constant 0 : index
    %c0_140 = arith.constant 0 : index
    %227 = vector.load %arg2[%c0_138, %c0_139, %c0_140] : memref<5x32x168xf32, #tpu.memory_space<vmem>>, vector<1x32x168xf32>
    %228 = vector.shape_cast %227 : vector<1x32x168xf32> to vector<32x168xf32>
    %cst_141 = arith.constant dense<0.000000e+00> : vector<28x168xf32>
    %229 = tpu.matmul %226, %228, %cst_141 {dimension_numbers = #tpu.dot_dimension_numbers<[1], [0], [0], [1], [0, 0, 1, 1], [], []>} : vector<28x32xf32>, vector<32x168xf32>, vector<28x168xf32> -> vector<28x168xf32>
    %230 = vector.extract_strided_slice %225 {offsets = [1, 0], sizes = [28, 32], strides = [1, 1]} : vector<32x32xf32> to vector<28x32xf32>
    %c1_142 = arith.constant 1 : index
    %c0_143 = arith.constant 0 : index
    %c0_144 = arith.constant 0 : index
    %231 = vector.load %arg2[%c1_142, %c0_143, %c0_144] : memref<5x32x168xf32, #tpu.memory_space<vmem>>, vector<1x32x168xf32>
    %232 = vector.shape_cast %231 : vector<1x32x168xf32> to vector<32x168xf32>
    %cst_145 = arith.constant dense<0.000000e+00> : vector<28x168xf32>
    %233 = tpu.matmul %230, %232, %cst_145 {dimension_numbers = #tpu.dot_dimension_numbers<[1], [0], [0], [1], [0, 0, 1, 1], [], []>} : vector<28x32xf32>, vector<32x168xf32>, vector<28x168xf32> -> vector<28x168xf32>
    %234 = arith.addf %229, %233 : vector<28x168xf32>
    %235 = vector.extract_strided_slice %225 {offsets = [2, 0], sizes = [28, 32], strides = [1, 1]} : vector<32x32xf32> to vector<28x32xf32>
    %c2_146 = arith.constant 2 : index
    %c0_147 = arith.constant 0 : index
    %c0_148 = arith.constant 0 : index
    %236 = vector.load %arg2[%c2_146, %c0_147, %c0_148] : memref<5x32x168xf32, #tpu.memory_space<vmem>>, vector<1x32x168xf32>
    %237 = vector.shape_cast %236 : vector<1x32x168xf32> to vector<32x168xf32>
    %cst_149 = arith.constant dense<0.000000e+00> : vector<28x168xf32>
    %238 = tpu.matmul %235, %237, %cst_149 {dimension_numbers = #tpu.dot_dimension_numbers<[1], [0], [0], [1], [0, 0, 1, 1], [], []>} : vector<28x32xf32>, vector<32x168xf32>, vector<28x168xf32> -> vector<28x168xf32>
    %239 = arith.addf %234, %238 : vector<28x168xf32>
    %240 = vector.extract_strided_slice %225 {offsets = [3, 0], sizes = [28, 32], strides = [1, 1]} : vector<32x32xf32> to vector<28x32xf32>
    %c3_150 = arith.constant 3 : index
    %c0_151 = arith.constant 0 : index
    %c0_152 = arith.constant 0 : index
    %241 = vector.load %arg2[%c3_150, %c0_151, %c0_152] : memref<5x32x168xf32, #tpu.memory_space<vmem>>, vector<1x32x168xf32>
    %242 = vector.shape_cast %241 : vector<1x32x168xf32> to vector<32x168xf32>
    %cst_153 = arith.constant dense<0.000000e+00> : vector<28x168xf32>
    %243 = tpu.matmul %240, %242, %cst_153 {dimension_numbers = #tpu.dot_dimension_numbers<[1], [0], [0], [1], [0, 0, 1, 1], [], []>} : vector<28x32xf32>, vector<32x168xf32>, vector<28x168xf32> -> vector<28x168xf32>
    %244 = arith.addf %239, %243 : vector<28x168xf32>
    %245 = vector.extract_strided_slice %225 {offsets = [4, 0], sizes = [28, 32], strides = [1, 1]} : vector<32x32xf32> to vector<28x32xf32>
    %c4_154 = arith.constant 4 : index
    %c0_155 = arith.constant 0 : index
    %c0_156 = arith.constant 0 : index
    %246 = vector.load %arg2[%c4_154, %c0_155, %c0_156] : memref<5x32x168xf32, #tpu.memory_space<vmem>>, vector<1x32x168xf32>
    %247 = vector.shape_cast %246 : vector<1x32x168xf32> to vector<32x168xf32>
    %cst_157 = arith.constant dense<0.000000e+00> : vector<28x168xf32>
    %248 = tpu.matmul %245, %247, %cst_157 {dimension_numbers = #tpu.dot_dimension_numbers<[1], [0], [0], [1], [0, 0, 1, 1], [], []>} : vector<28x32xf32>, vector<32x168xf32>, vector<28x168xf32> -> vector<28x168xf32>
    %249 = arith.addf %244, %248 : vector<28x168xf32>
    %250 = vector.extract_strided_slice %249 {offsets = [0, 0], sizes = [28, 84], strides = [1, 1]} : vector<28x168xf32> to vector<28x84xf32>
    %251 = vector.extract_strided_slice %249 {offsets = [0, 84], sizes = [28, 84], strides = [1, 1]} : vector<28x168xf32> to vector<28x84xf32>
    %252 = arith.maximumf %250, %251 : vector<28x84xf32>
    %253 = vector.extract_strided_slice %252 {offsets = [0, 0], sizes = [1, 84], strides = [1, 1]} : vector<28x84xf32> to vector<1x84xf32>
    %254 = vector.extract_strided_slice %252 {offsets = [1, 0], sizes = [1, 84], strides = [1, 1]} : vector<28x84xf32> to vector<1x84xf32>
    %255 = arith.maximumf %253, %254 : vector<1x84xf32>
    %256 = arith.addf %255, %4 : vector<1x84xf32>
    %cst_158 = arith.constant 0.000000e+00 : f32
    %257 = vector.broadcast %cst_158 : f32 to vector<1x84xf32>
    %258 = arith.maximumf %256, %257 : vector<1x84xf32>
    %c0_159 = arith.constant 0 : index
    %c0_160 = arith.constant 0 : index
    %259 = vector.load %arg14[%c0_159, %c0_160] : memref<14x84xf32, #tpu.memory_space<vmem>>, vector<1x84xf32>
    tpu.vector_store %arg14[%c0_159, %c0_160], %258 {strides = array<i32>} : memref<14x84xf32, #tpu.memory_space<vmem>>, vector<1x84xf32>,
    %260 = vector.extract_strided_slice %252 {offsets = [2, 0], sizes = [1, 84], strides = [1, 1]} : vector<28x84xf32> to vector<1x84xf32>
    %261 = vector.extract_strided_slice %252 {offsets = [3, 0], sizes = [1, 84], strides = [1, 1]} : vector<28x84xf32> to vector<1x84xf32>
    %262 = arith.maximumf %260, %261 : vector<1x84xf32>
    %263 = arith.addf %262, %4 : vector<1x84xf32>
    %cst_161 = arith.constant 0.000000e+00 : f32
    %264 = vector.broadcast %cst_161 : f32 to vector<1x84xf32>
    %265 = arith.maximumf %263, %264 : vector<1x84xf32>
    %c1_162 = arith.constant 1 : index
    %c0_163 = arith.constant 0 : index
    %266 = vector.load %arg14[%c1_162, %c0_163] : memref<14x84xf32, #tpu.memory_space<vmem>>, vector<1x84xf32>
    tpu.vector_store %arg14[%c1_162, %c0_163], %265 {strides = array<i32>} : memref<14x84xf32, #tpu.memory_space<vmem>>, vector<1x84xf32>,
    %267 = vector.extract_strided_slice %252 {offsets = [4, 0], sizes = [1, 84], strides = [1, 1]} : vector<28x84xf32> to vector<1x84xf32>
    %268 = vector.extract_strided_slice %252 {offsets = [5, 0], sizes = [1, 84], strides = [1, 1]} : vector<28x84xf32> to vector<1x84xf32>
    %269 = arith.maximumf %267, %268 : vector<1x84xf32>
    %270 = arith.addf %269, %4 : vector<1x84xf32>
    %cst_164 = arith.constant 0.000000e+00 : f32
    %271 = vector.broadcast %cst_164 : f32 to vector<1x84xf32>
    %272 = arith.maximumf %270, %271 : vector<1x84xf32>
    %c2_165 = arith.constant 2 : index
    %c0_166 = arith.constant 0 : index
    %273 = vector.load %arg14[%c2_165, %c0_166] : memref<14x84xf32, #tpu.memory_space<vmem>>, vector<1x84xf32>
    tpu.vector_store %arg14[%c2_165, %c0_166], %272 {strides = array<i32>} : memref<14x84xf32, #tpu.memory_space<vmem>>, vector<1x84xf32>,
    %274 = vector.extract_strided_slice %252 {offsets = [6, 0], sizes = [1, 84], strides = [1, 1]} : vector<28x84xf32> to vector<1x84xf32>
    %275 = vector.extract_strided_slice %252 {offsets = [7, 0], sizes = [1, 84], strides = [1, 1]} : vector<28x84xf32> to vector<1x84xf32>
    %276 = arith.maximumf %274, %275 : vector<1x84xf32>
    %277 = arith.addf %276, %4 : vector<1x84xf32>
    %cst_167 = arith.constant 0.000000e+00 : f32
    %278 = vector.broadcast %cst_167 : f32 to vector<1x84xf32>
    %279 = arith.maximumf %277, %278 : vector<1x84xf32>
    %c3_168 = arith.constant 3 : index
    %c0_169 = arith.constant 0 : index
    %280 = vector.load %arg14[%c3_168, %c0_169] : memref<14x84xf32, #tpu.memory_space<vmem>>, vector<1x84xf32>
    tpu.vector_store %arg14[%c3_168, %c0_169], %279 {strides = array<i32>} : memref<14x84xf32, #tpu.memory_space<vmem>>, vector<1x84xf32>,
    %281 = vector.extract_strided_slice %252 {offsets = [8, 0], sizes = [1, 84], strides = [1, 1]} : vector<28x84xf32> to vector<1x84xf32>
    %282 = vector.extract_strided_slice %252 {offsets = [9, 0], sizes = [1, 84], strides = [1, 1]} : vector<28x84xf32> to vector<1x84xf32>
    %283 = arith.maximumf %281, %282 : vector<1x84xf32>
    %284 = arith.addf %283, %4 : vector<1x84xf32>
    %cst_170 = arith.constant 0.000000e+00 : f32
    %285 = vector.broadcast %cst_170 : f32 to vector<1x84xf32>
    %286 = arith.maximumf %284, %285 : vector<1x84xf32>
    %c4_171 = arith.constant 4 : index
    %c0_172 = arith.constant 0 : index
    %287 = vector.load %arg14[%c4_171, %c0_172] : memref<14x84xf32, #tpu.memory_space<vmem>>, vector<1x84xf32>
    tpu.vector_store %arg14[%c4_171, %c0_172], %286 {strides = array<i32>} : memref<14x84xf32, #tpu.memory_space<vmem>>, vector<1x84xf32>,
    %288 = vector.extract_strided_slice %252 {offsets = [10, 0], sizes = [1, 84], strides = [1, 1]} : vector<28x84xf32> to vector<1x84xf32>
    %289 = vector.extract_strided_slice %252 {offsets = [11, 0], sizes = [1, 84], strides = [1, 1]} : vector<28x84xf32> to vector<1x84xf32>
    %290 = arith.maximumf %288, %289 : vector<1x84xf32>
    %291 = arith.addf %290, %4 : vector<1x84xf32>
    %cst_173 = arith.constant 0.000000e+00 : f32
    %292 = vector.broadcast %cst_173 : f32 to vector<1x84xf32>
    %293 = arith.maximumf %291, %292 : vector<1x84xf32>
    %c5_174 = arith.constant 5 : index
    %c0_175 = arith.constant 0 : index
    %294 = vector.load %arg14[%c5_174, %c0_175] : memref<14x84xf32, #tpu.memory_space<vmem>>, vector<1x84xf32>
    tpu.vector_store %arg14[%c5_174, %c0_175], %293 {strides = array<i32>} : memref<14x84xf32, #tpu.memory_space<vmem>>, vector<1x84xf32>,
    %295 = vector.extract_strided_slice %252 {offsets = [12, 0], sizes = [1, 84], strides = [1, 1]} : vector<28x84xf32> to vector<1x84xf32>
    %296 = vector.extract_strided_slice %252 {offsets = [13, 0], sizes = [1, 84], strides = [1, 1]} : vector<28x84xf32> to vector<1x84xf32>
    %297 = arith.maximumf %295, %296 : vector<1x84xf32>
    %298 = arith.addf %297, %4 : vector<1x84xf32>
    %cst_176 = arith.constant 0.000000e+00 : f32
    %299 = vector.broadcast %cst_176 : f32 to vector<1x84xf32>
    %300 = arith.maximumf %298, %299 : vector<1x84xf32>
    %c6_177 = arith.constant 6 : index
    %c0_178 = arith.constant 0 : index
    %301 = vector.load %arg14[%c6_177, %c0_178] : memref<14x84xf32, #tpu.memory_space<vmem>>, vector<1x84xf32>
    tpu.vector_store %arg14[%c6_177, %c0_178], %300 {strides = array<i32>} : memref<14x84xf32, #tpu.memory_space<vmem>>, vector<1x84xf32>,
    %302 = vector.extract_strided_slice %252 {offsets = [14, 0], sizes = [1, 84], strides = [1, 1]} : vector<28x84xf32> to vector<1x84xf32>
    %303 = vector.extract_strided_slice %252 {offsets = [15, 0], sizes = [1, 84], strides = [1, 1]} : vector<28x84xf32> to vector<1x84xf32>
    %304 = arith.maximumf %302, %303 : vector<1x84xf32>
    %305 = arith.addf %304, %4 : vector<1x84xf32>
    %cst_179 = arith.constant 0.000000e+00 : f32
    %306 = vector.broadcast %cst_179 : f32 to vector<1x84xf32>
    %307 = arith.maximumf %305, %306 : vector<1x84xf32>
    %c7_180 = arith.constant 7 : index
    %c0_181 = arith.constant 0 : index
    %308 = vector.load %arg14[%c7_180, %c0_181] : memref<14x84xf32, #tpu.memory_space<vmem>>, vector<1x84xf32>
    tpu.vector_store %arg14[%c7_180, %c0_181], %307 {strides = array<i32>} : memref<14x84xf32, #tpu.memory_space<vmem>>, vector<1x84xf32>,
    %309 = vector.extract_strided_slice %252 {offsets = [16, 0], sizes = [1, 84], strides = [1, 1]} : vector<28x84xf32> to vector<1x84xf32>
    %310 = vector.extract_strided_slice %252 {offsets = [17, 0], sizes = [1, 84], strides = [1, 1]} : vector<28x84xf32> to vector<1x84xf32>
    %311 = arith.maximumf %309, %310 : vector<1x84xf32>
    %312 = arith.addf %311, %4 : vector<1x84xf32>
    %cst_182 = arith.constant 0.000000e+00 : f32
    %313 = vector.broadcast %cst_182 : f32 to vector<1x84xf32>
    %314 = arith.maximumf %312, %313 : vector<1x84xf32>
    %c8_183 = arith.constant 8 : index
    %c0_184 = arith.constant 0 : index
    %315 = vector.load %arg14[%c8_183, %c0_184] : memref<14x84xf32, #tpu.memory_space<vmem>>, vector<1x84xf32>
    tpu.vector_store %arg14[%c8_183, %c0_184], %314 {strides = array<i32>} : memref<14x84xf32, #tpu.memory_space<vmem>>, vector<1x84xf32>,
    %316 = vector.extract_strided_slice %252 {offsets = [18, 0], sizes = [1, 84], strides = [1, 1]} : vector<28x84xf32> to vector<1x84xf32>
    %317 = vector.extract_strided_slice %252 {offsets = [19, 0], sizes = [1, 84], strides = [1, 1]} : vector<28x84xf32> to vector<1x84xf32>
    %318 = arith.maximumf %316, %317 : vector<1x84xf32>
    %319 = arith.addf %318, %4 : vector<1x84xf32>
    %cst_185 = arith.constant 0.000000e+00 : f32
    %320 = vector.broadcast %cst_185 : f32 to vector<1x84xf32>
    %321 = arith.maximumf %319, %320 : vector<1x84xf32>
    %c9_186 = arith.constant 9 : index
    %c0_187 = arith.constant 0 : index
    %322 = vector.load %arg14[%c9_186, %c0_187] : memref<14x84xf32, #tpu.memory_space<vmem>>, vector<1x84xf32>
    tpu.vector_store %arg14[%c9_186, %c0_187], %321 {strides = array<i32>} : memref<14x84xf32, #tpu.memory_space<vmem>>, vector<1x84xf32>,
    %323 = vector.extract_strided_slice %252 {offsets = [20, 0], sizes = [1, 84], strides = [1, 1]} : vector<28x84xf32> to vector<1x84xf32>
    %324 = vector.extract_strided_slice %252 {offsets = [21, 0], sizes = [1, 84], strides = [1, 1]} : vector<28x84xf32> to vector<1x84xf32>
    %325 = arith.maximumf %323, %324 : vector<1x84xf32>
    %326 = arith.addf %325, %4 : vector<1x84xf32>
    %cst_188 = arith.constant 0.000000e+00 : f32
    %327 = vector.broadcast %cst_188 : f32 to vector<1x84xf32>
    %328 = arith.maximumf %326, %327 : vector<1x84xf32>
    %c10_189 = arith.constant 10 : index
    %c0_190 = arith.constant 0 : index
    %329 = vector.load %arg14[%c10_189, %c0_190] : memref<14x84xf32, #tpu.memory_space<vmem>>, vector<1x84xf32>
    tpu.vector_store %arg14[%c10_189, %c0_190], %328 {strides = array<i32>} : memref<14x84xf32, #tpu.memory_space<vmem>>, vector<1x84xf32>,
    %330 = vector.extract_strided_slice %252 {offsets = [22, 0], sizes = [1, 84], strides = [1, 1]} : vector<28x84xf32> to vector<1x84xf32>
    %331 = vector.extract_strided_slice %252 {offsets = [23, 0], sizes = [1, 84], strides = [1, 1]} : vector<28x84xf32> to vector<1x84xf32>
    %332 = arith.maximumf %330, %331 : vector<1x84xf32>
    %333 = arith.addf %332, %4 : vector<1x84xf32>
    %cst_191 = arith.constant 0.000000e+00 : f32
    %334 = vector.broadcast %cst_191 : f32 to vector<1x84xf32>
    %335 = arith.maximumf %333, %334 : vector<1x84xf32>
    %c11_192 = arith.constant 11 : index
    %c0_193 = arith.constant 0 : index
    %336 = vector.load %arg14[%c11_192, %c0_193] : memref<14x84xf32, #tpu.memory_space<vmem>>, vector<1x84xf32>
    tpu.vector_store %arg14[%c11_192, %c0_193], %335 {strides = array<i32>} : memref<14x84xf32, #tpu.memory_space<vmem>>, vector<1x84xf32>,
    %337 = vector.extract_strided_slice %252 {offsets = [24, 0], sizes = [1, 84], strides = [1, 1]} : vector<28x84xf32> to vector<1x84xf32>
    %338 = vector.extract_strided_slice %252 {offsets = [25, 0], sizes = [1, 84], strides = [1, 1]} : vector<28x84xf32> to vector<1x84xf32>
    %339 = arith.maximumf %337, %338 : vector<1x84xf32>
    %340 = arith.addf %339, %4 : vector<1x84xf32>
    %cst_194 = arith.constant 0.000000e+00 : f32
    %341 = vector.broadcast %cst_194 : f32 to vector<1x84xf32>
    %342 = arith.maximumf %340, %341 : vector<1x84xf32>
    %c12_195 = arith.constant 12 : index
    %c0_196 = arith.constant 0 : index
    %343 = vector.load %arg14[%c12_195, %c0_196] : memref<14x84xf32, #tpu.memory_space<vmem>>, vector<1x84xf32>
    tpu.vector_store %arg14[%c12_195, %c0_196], %342 {strides = array<i32>} : memref<14x84xf32, #tpu.memory_space<vmem>>, vector<1x84xf32>,
    %344 = vector.extract_strided_slice %252 {offsets = [26, 0], sizes = [1, 84], strides = [1, 1]} : vector<28x84xf32> to vector<1x84xf32>
    %345 = vector.extract_strided_slice %252 {offsets = [27, 0], sizes = [1, 84], strides = [1, 1]} : vector<28x84xf32> to vector<1x84xf32>
    %346 = arith.maximumf %344, %345 : vector<1x84xf32>
    %347 = arith.addf %346, %4 : vector<1x84xf32>
    %cst_197 = arith.constant 0.000000e+00 : f32
    %348 = vector.broadcast %cst_197 : f32 to vector<1x84xf32>
    %349 = arith.maximumf %347, %348 : vector<1x84xf32>
    %c13_198 = arith.constant 13 : index
    %c0_199 = arith.constant 0 : index
    %350 = vector.load %arg14[%c13_198, %c0_199] : memref<14x84xf32, #tpu.memory_space<vmem>>, vector<1x84xf32>
    tpu.vector_store %arg14[%c13_198, %c0_199], %349 {strides = array<i32>} : memref<14x84xf32, #tpu.memory_space<vmem>>, vector<1x84xf32>,
    %c0_200 = arith.constant 0 : index
    %c0_201 = arith.constant 0 : index
    %351 = vector.load %arg14[%c0_200, %c0_201] : memref<14x84xf32, #tpu.memory_space<vmem>>, vector<10x84xf32>
    %c0_202 = arith.constant 0 : index
    %c0_203 = arith.constant 0 : index
    %c0_204 = arith.constant 0 : index
    %352 = vector.load %arg4[%c0_202, %c0_203, %c0_204] : memref<5x84x160xf32, #tpu.memory_space<vmem>>, vector<1x84x160xf32>
    %353 = vector.shape_cast %352 : vector<1x84x160xf32> to vector<84x160xf32>
    %cst_205 = arith.constant dense<0.000000e+00> : vector<10x160xf32>
    %354 = tpu.matmul %351, %353, %cst_205 {dimension_numbers = #tpu.dot_dimension_numbers<[1], [0], [0], [1], [0, 0, 1, 1], [], []>} : vector<10x84xf32>, vector<84x160xf32>, vector<10x160xf32> -> vector<10x160xf32>
    %c1_206 = arith.constant 1 : index
    %c0_207 = arith.constant 0 : index
    %355 = vector.load %arg14[%c1_206, %c0_207] : memref<14x84xf32, #tpu.memory_space<vmem>>, vector<10x84xf32>
    %c1_208 = arith.constant 1 : index
    %c0_209 = arith.constant 0 : index
    %c0_210 = arith.constant 0 : index
    %356 = vector.load %arg4[%c1_208, %c0_209, %c0_210] : memref<5x84x160xf32, #tpu.memory_space<vmem>>, vector<1x84x160xf32>
    %357 = vector.shape_cast %356 : vector<1x84x160xf32> to vector<84x160xf32>
    %cst_211 = arith.constant dense<0.000000e+00> : vector<10x160xf32>
    %358 = tpu.matmul %355, %357, %cst_211 {dimension_numbers = #tpu.dot_dimension_numbers<[1], [0], [0], [1], [0, 0, 1, 1], [], []>} : vector<10x84xf32>, vector<84x160xf32>, vector<10x160xf32> -> vector<10x160xf32>
    %359 = arith.addf %354, %358 : vector<10x160xf32>
    %c2_212 = arith.constant 2 : index
    %c0_213 = arith.constant 0 : index
    %360 = vector.load %arg14[%c2_212, %c0_213] : memref<14x84xf32, #tpu.memory_space<vmem>>, vector<10x84xf32>
    %c2_214 = arith.constant 2 : index
    %c0_215 = arith.constant 0 : index
    %c0_216 = arith.constant 0 : index
    %361 = vector.load %arg4[%c2_214, %c0_215, %c0_216] : memref<5x84x160xf32, #tpu.memory_space<vmem>>, vector<1x84x160xf32>
    %362 = vector.shape_cast %361 : vector<1x84x160xf32> to vector<84x160xf32>
    %cst_217 = arith.constant dense<0.000000e+00> : vector<10x160xf32>
    %363 = tpu.matmul %360, %362, %cst_217 {dimension_numbers = #tpu.dot_dimension_numbers<[1], [0], [0], [1], [0, 0, 1, 1], [], []>} : vector<10x84xf32>, vector<84x160xf32>, vector<10x160xf32> -> vector<10x160xf32>
    %364 = arith.addf %359, %363 : vector<10x160xf32>
    %c3_218 = arith.constant 3 : index
    %c0_219 = arith.constant 0 : index
    %365 = vector.load %arg14[%c3_218, %c0_219] : memref<14x84xf32, #tpu.memory_space<vmem>>, vector<10x84xf32>
    %c3_220 = arith.constant 3 : index
    %c0_221 = arith.constant 0 : index
    %c0_222 = arith.constant 0 : index
    %366 = vector.load %arg4[%c3_220, %c0_221, %c0_222] : memref<5x84x160xf32, #tpu.memory_space<vmem>>, vector<1x84x160xf32>
    %367 = vector.shape_cast %366 : vector<1x84x160xf32> to vector<84x160xf32>
    %cst_223 = arith.constant dense<0.000000e+00> : vector<10x160xf32>
    %368 = tpu.matmul %365, %367, %cst_223 {dimension_numbers = #tpu.dot_dimension_numbers<[1], [0], [0], [1], [0, 0, 1, 1], [], []>} : vector<10x84xf32>, vector<84x160xf32>, vector<10x160xf32> -> vector<10x160xf32>
    %369 = arith.addf %364, %368 : vector<10x160xf32>
    %c4_224 = arith.constant 4 : index
    %c0_225 = arith.constant 0 : index
    %370 = vector.load %arg14[%c4_224, %c0_225] : memref<14x84xf32, #tpu.memory_space<vmem>>, vector<10x84xf32>
    %c4_226 = arith.constant 4 : index
    %c0_227 = arith.constant 0 : index
    %c0_228 = arith.constant 0 : index
    %371 = vector.load %arg4[%c4_226, %c0_227, %c0_228] : memref<5x84x160xf32, #tpu.memory_space<vmem>>, vector<1x84x160xf32>
    %372 = vector.shape_cast %371 : vector<1x84x160xf32> to vector<84x160xf32>
    %cst_229 = arith.constant dense<0.000000e+00> : vector<10x160xf32>
    %373 = tpu.matmul %370, %372, %cst_229 {dimension_numbers = #tpu.dot_dimension_numbers<[1], [0], [0], [1], [0, 0, 1, 1], [], []>} : vector<10x84xf32>, vector<84x160xf32>, vector<10x160xf32> -> vector<10x160xf32>
    %374 = arith.addf %369, %373 : vector<10x160xf32>
    %375 = vector.extract_strided_slice %374 {offsets = [0, 0], sizes = [10, 80], strides = [1, 1]} : vector<10x160xf32> to vector<10x80xf32>
    %376 = vector.extract_strided_slice %374 {offsets = [0, 80], sizes = [10, 80], strides = [1, 1]} : vector<10x160xf32> to vector<10x80xf32>
    %377 = arith.maximumf %375, %376 : vector<10x80xf32>
    %c0_230 = arith.constant 0 : index
    %c0_231 = arith.constant 0 : index
    %378 = vector.load %arg7[%c0_230, %c0_231] : memref<1x120xf32, #tpu.memory_space<vmem>>, vector<1x120xf32>
    %379 = vector.extract_strided_slice %377 {offsets = [0, 0], sizes = [1, 80], strides = [1, 1]} : vector<10x80xf32> to vector<1x80xf32>
    %380 = vector.extract_strided_slice %377 {offsets = [1, 0], sizes = [1, 80], strides = [1, 1]} : vector<10x80xf32> to vector<1x80xf32>
    %381 = arith.maximumf %379, %380 : vector<1x80xf32>
    %382 = arith.addf %381, %5 : vector<1x80xf32>
    %cst_232 = arith.constant 0.000000e+00 : f32
    %383 = vector.broadcast %cst_232 : f32 to vector<1x80xf32>
    %384 = arith.maximumf %382, %383 : vector<1x80xf32>
    %c0_233 = arith.constant 0 : index
    %c0_234 = arith.constant 0 : index
    %c0_235 = arith.constant 0 : index
    %385 = vector.load %arg6[%c0_233, %c0_234, %c0_235] : memref<5x80x120xf32, #tpu.memory_space<vmem>>, vector<1x80x120xf32>
    %386 = vector.shape_cast %385 : vector<1x80x120xf32> to vector<80x120xf32>
    %cst_236 = arith.constant dense<0.000000e+00> : vector<1x120xf32>
    %387 = tpu.matmul %384, %386, %cst_236 {dimension_numbers = #tpu.dot_dimension_numbers<[1], [0], [0], [1], [0, 0, 1, 1], [], []>} : vector<1x80xf32>, vector<80x120xf32>, vector<1x120xf32> -> vector<1x120xf32>
    %388 = arith.addf %378, %387 : vector<1x120xf32>
    %389 = vector.extract_strided_slice %377 {offsets = [2, 0], sizes = [1, 80], strides = [1, 1]} : vector<10x80xf32> to vector<1x80xf32>
    %390 = vector.extract_strided_slice %377 {offsets = [3, 0], sizes = [1, 80], strides = [1, 1]} : vector<10x80xf32> to vector<1x80xf32>
    %391 = arith.maximumf %389, %390 : vector<1x80xf32>
    %392 = arith.addf %391, %5 : vector<1x80xf32>
    %cst_237 = arith.constant 0.000000e+00 : f32
    %393 = vector.broadcast %cst_237 : f32 to vector<1x80xf32>
    %394 = arith.maximumf %392, %393 : vector<1x80xf32>
    %c1_238 = arith.constant 1 : index
    %c0_239 = arith.constant 0 : index
    %c0_240 = arith.constant 0 : index
    %395 = vector.load %arg6[%c1_238, %c0_239, %c0_240] : memref<5x80x120xf32, #tpu.memory_space<vmem>>, vector<1x80x120xf32>
    %396 = vector.shape_cast %395 : vector<1x80x120xf32> to vector<80x120xf32>
    %cst_241 = arith.constant dense<0.000000e+00> : vector<1x120xf32>
    %397 = tpu.matmul %394, %396, %cst_241 {dimension_numbers = #tpu.dot_dimension_numbers<[1], [0], [0], [1], [0, 0, 1, 1], [], []>} : vector<1x80xf32>, vector<80x120xf32>, vector<1x120xf32> -> vector<1x120xf32>
    %398 = arith.addf %388, %397 : vector<1x120xf32>
    %399 = vector.extract_strided_slice %377 {offsets = [4, 0], sizes = [1, 80], strides = [1, 1]} : vector<10x80xf32> to vector<1x80xf32>
    %400 = vector.extract_strided_slice %377 {offsets = [5, 0], sizes = [1, 80], strides = [1, 1]} : vector<10x80xf32> to vector<1x80xf32>
    %401 = arith.maximumf %399, %400 : vector<1x80xf32>
    %402 = arith.addf %401, %5 : vector<1x80xf32>
    %cst_242 = arith.constant 0.000000e+00 : f32
    %403 = vector.broadcast %cst_242 : f32 to vector<1x80xf32>
    %404 = arith.maximumf %402, %403 : vector<1x80xf32>
    %c2_243 = arith.constant 2 : index
    %c0_244 = arith.constant 0 : index
    %c0_245 = arith.constant 0 : index
    %405 = vector.load %arg6[%c2_243, %c0_244, %c0_245] : memref<5x80x120xf32, #tpu.memory_space<vmem>>, vector<1x80x120xf32>
    %406 = vector.shape_cast %405 : vector<1x80x120xf32> to vector<80x120xf32>
    %cst_246 = arith.constant dense<0.000000e+00> : vector<1x120xf32>
    %407 = tpu.matmul %404, %406, %cst_246 {dimension_numbers = #tpu.dot_dimension_numbers<[1], [0], [0], [1], [0, 0, 1, 1], [], []>} : vector<1x80xf32>, vector<80x120xf32>, vector<1x120xf32> -> vector<1x120xf32>
    %408 = arith.addf %398, %407 : vector<1x120xf32>
    %409 = vector.extract_strided_slice %377 {offsets = [6, 0], sizes = [1, 80], strides = [1, 1]} : vector<10x80xf32> to vector<1x80xf32>
    %410 = vector.extract_strided_slice %377 {offsets = [7, 0], sizes = [1, 80], strides = [1, 1]} : vector<10x80xf32> to vector<1x80xf32>
    %411 = arith.maximumf %409, %410 : vector<1x80xf32>
    %412 = arith.addf %411, %5 : vector<1x80xf32>
    %cst_247 = arith.constant 0.000000e+00 : f32
    %413 = vector.broadcast %cst_247 : f32 to vector<1x80xf32>
    %414 = arith.maximumf %412, %413 : vector<1x80xf32>
    %c3_248 = arith.constant 3 : index
    %c0_249 = arith.constant 0 : index
    %c0_250 = arith.constant 0 : index
    %415 = vector.load %arg6[%c3_248, %c0_249, %c0_250] : memref<5x80x120xf32, #tpu.memory_space<vmem>>, vector<1x80x120xf32>
    %416 = vector.shape_cast %415 : vector<1x80x120xf32> to vector<80x120xf32>
    %cst_251 = arith.constant dense<0.000000e+00> : vector<1x120xf32>
    %417 = tpu.matmul %414, %416, %cst_251 {dimension_numbers = #tpu.dot_dimension_numbers<[1], [0], [0], [1], [0, 0, 1, 1], [], []>} : vector<1x80xf32>, vector<80x120xf32>, vector<1x120xf32> -> vector<1x120xf32>
    %418 = arith.addf %408, %417 : vector<1x120xf32>
    %419 = vector.extract_strided_slice %377 {offsets = [8, 0], sizes = [1, 80], strides = [1, 1]} : vector<10x80xf32> to vector<1x80xf32>
    %420 = vector.extract_strided_slice %377 {offsets = [9, 0], sizes = [1, 80], strides = [1, 1]} : vector<10x80xf32> to vector<1x80xf32>
    %421 = arith.maximumf %419, %420 : vector<1x80xf32>
    %422 = arith.addf %421, %5 : vector<1x80xf32>
    %cst_252 = arith.constant 0.000000e+00 : f32
    %423 = vector.broadcast %cst_252 : f32 to vector<1x80xf32>
    %424 = arith.maximumf %422, %423 : vector<1x80xf32>
    %c4_253 = arith.constant 4 : index
    %c0_254 = arith.constant 0 : index
    %c0_255 = arith.constant 0 : index
    %425 = vector.load %arg6[%c4_253, %c0_254, %c0_255] : memref<5x80x120xf32, #tpu.memory_space<vmem>>, vector<1x80x120xf32>
    %426 = vector.shape_cast %425 : vector<1x80x120xf32> to vector<80x120xf32>
    %cst_256 = arith.constant dense<0.000000e+00> : vector<1x120xf32>
    %427 = tpu.matmul %424, %426, %cst_256 {dimension_numbers = #tpu.dot_dimension_numbers<[1], [0], [0], [1], [0, 0, 1, 1], [], []>} : vector<1x80xf32>, vector<80x120xf32>, vector<1x120xf32> -> vector<1x120xf32>
    %428 = arith.addf %418, %427 : vector<1x120xf32>
    %cst_257 = arith.constant 0.000000e+00 : f32
    %429 = vector.broadcast %cst_257 : f32 to vector<1x120xf32>
    %430 = arith.maximumf %428, %429 : vector<1x120xf32>
    %c0_258 = arith.constant 0 : index
    %c0_259 = arith.constant 0 : index
    %431 = vector.load %arg8[%c0_258, %c0_259] : memref<120x84xf32, #tpu.memory_space<vmem>>, vector<120x84xf32>
    %cst_260 = arith.constant dense<0.000000e+00> : vector<1x84xf32>
    %432 = tpu.matmul %430, %431, %cst_260 {dimension_numbers = #tpu.dot_dimension_numbers<[1], [0], [0], [1], [0, 0, 1, 1], [], []>} : vector<1x120xf32>, vector<120x84xf32>, vector<1x84xf32> -> vector<1x84xf32>
    %c0_261 = arith.constant 0 : index
    %c0_262 = arith.constant 0 : index
    %433 = vector.load %arg9[%c0_261, %c0_262] : memref<1x84xf32, #tpu.memory_space<vmem>>, vector<1x84xf32>
    %434 = arith.addf %432, %433 : vector<1x84xf32>
    %cst_263 = arith.constant 0.000000e+00 : f32
    %435 = vector.broadcast %cst_263 : f32 to vector<1x84xf32>
    %436 = arith.maximumf %434, %435 : vector<1x84xf32>
    %c0_264 = arith.constant 0 : index
    %c0_265 = arith.constant 0 : index
    %437 = vector.load %arg10[%c0_264, %c0_265] : memref<84x10xf32, #tpu.memory_space<vmem>>, vector<84x10xf32>
    %cst_266 = arith.constant dense<0.000000e+00> : vector<1x10xf32>
    %438 = tpu.matmul %436, %437, %cst_266 {dimension_numbers = #tpu.dot_dimension_numbers<[1], [0], [0], [1], [0, 0, 1, 1], [], []>} : vector<1x84xf32>, vector<84x10xf32>, vector<1x10xf32> -> vector<1x10xf32>
    %c0_267 = arith.constant 0 : index
    %c0_268 = arith.constant 0 : index
    %439 = vector.load %arg11[%c0_267, %c0_268] : memref<1x10xf32, #tpu.memory_space<vmem>>, vector<1x10xf32>
    %440 = arith.addf %438, %439 : vector<1x10xf32>
    %c1_269 = arith.constant 1 : index
    %c0_270 = arith.constant 0 : index
    %441 = vector.load %arg12[%c1_269, %c0_270] : memref<2x10xf32, #tpu.memory_space<vmem>>, vector<1x10xf32>
    tpu.vector_store %arg12[%c1_269, %c0_270], %440 {strides = array<i32>} : memref<2x10xf32, #tpu.memory_space<vmem>>, vector<1x10xf32>,
    return
  }
  func.func @transform_0(%arg0: i32) -> (i32, i32, i32) {
    %c0_i32 = arith.constant 0 : i32
    %c0_i32_0 = arith.constant 0 : i32
    %c0_i32_1 = arith.constant 0 : i32
    %c0_i32_2 = arith.constant 0 : i32
    return %c0_i32, %c0_i32_0, %c0_i32_1 : i32, i32, i32
  }
  func.func @transform_1(%arg0: i32) -> (i32, i32, i32) {
    %c0_i32 = arith.constant 0 : i32
    %c0_i32_0 = arith.constant 0 : i32
    %c0_i32_1 = arith.constant 0 : i32
    %c0_i32_2 = arith.constant 0 : i32
    return %c0_i32, %c0_i32_0, %c0_i32_1 : i32, i32, i32
  }
  func.func @transform_2(%arg0: i32) -> (i32, i32) {
    %c0_i32 = arith.constant 0 : i32
    %c0_i32_0 = arith.constant 0 : i32
    %c0_i32_1 = arith.constant 0 : i32
    return %c0_i32, %c0_i32_0 : i32, i32
  }
  func.func @transform_3(%arg0: i32) -> (i32, i32, i32) {
    %c0_i32 = arith.constant 0 : i32
    %c0_i32_0 = arith.constant 0 : i32
    %c0_i32_1 = arith.constant 0 : i32
    %c0_i32_2 = arith.constant 0 : i32
    return %c0_i32, %c0_i32_0, %c0_i32_1 : i32, i32, i32
  }
  func.func @transform_4(%arg0: i32) -> (i32, i32) {
    %c0_i32 = arith.constant 0 : i32
    %c0_i32_0 = arith.constant 0 : i32
    %c0_i32_1 = arith.constant 0 : i32
    return %c0_i32, %c0_i32_0 : i32, i32
  }
  func.func @transform_5(%arg0: i32) -> (i32, i32, i32) {
    %c0_i32 = arith.constant 0 : i32
    %c0_i32_0 = arith.constant 0 : i32
    %c0_i32_1 = arith.constant 0 : i32
    %c0_i32_2 = arith.constant 0 : i32
    return %c0_i32, %c0_i32_0, %c0_i32_1 : i32, i32, i32
  }
  func.func @transform_6(%arg0: i32) -> (i32, i32) {
    %c0_i32 = arith.constant 0 : i32
    %c0_i32_0 = arith.constant 0 : i32
    %c0_i32_1 = arith.constant 0 : i32
    return %c0_i32, %c0_i32_0 : i32, i32
  }
  func.func @transform_7(%arg0: i32) -> (i32, i32) {
    %c0_i32 = arith.constant 0 : i32
    %c0_i32_0 = arith.constant 0 : i32
    %c0_i32_1 = arith.constant 0 : i32
    return %c0_i32, %c0_i32_0 : i32, i32
  }
  func.func @transform_8(%arg0: i32) -> (i32, i32) {
    %c0_i32 = arith.constant 0 : i32
    %c0_i32_0 = arith.constant 0 : i32
    %c0_i32_1 = arith.constant 0 : i32
    return %c0_i32, %c0_i32_0 : i32, i32
  }
  func.func @transform_9(%arg0: i32) -> (i32, i32) {
    %c0_i32 = arith.constant 0 : i32
    %c0_i32_0 = arith.constant 0 : i32
    %c0_i32_1 = arith.constant 0 : i32
    return %c0_i32, %c0_i32_0 : i32, i32
  }
  func.func @transform_10(%arg0: i32) -> (i32, i32) {
    %c0_i32 = arith.constant 0 : i32
    %c0_i32_0 = arith.constant 0 : i32
    %c0_i32_1 = arith.constant 0 : i32
    return %c0_i32, %c0_i32_0 : i32, i32
  }
  func.func @transform_11(%arg0: i32) -> (i32, i32) {
    %c0_i32 = arith.constant 0 : i32
    %c0_i32_0 = arith.constant 0 : i32
    %c0_i32_1 = arith.constant 0 : i32
    return %c0_i32, %c0_i32_0 : i32, i32
  }
}

</mosaic_0001>

<bundles_post_ra>
// kernel: lenet_forward_pallas.1
= control target key start
LH: loop header
LB: loop body
LE: loop exit
PB: predicated region body
PF: predicated region fallthrough
CT: control target
= control target key end

     0   :  { %s5486_s23 = smov 2   ;;  %vm39_vm0 = vcmask 261120   ;;  %v5487_v5 = vmov 0.0   ;;  %s7489_s0 = inlined_call_operand.vmem [shape: f32[2,28,28], index: 0, kind: input, shape index: {}]   ;;  %s7490_s1 = inlined_call_operand.vmem [shape: f32[5,32,168], index: 1, kind: input, shape index: {}]   ;;  %s7491_s2 = inlined_call_operand.vmem [shape: f32[1,84], index: 2, kind: input, shape index: {}]   ;;  %s7492_s3 = inlined_call_operand.vmem [shape: f32[5,84,160], index: 3, kind: input, shape index: {}]   ;;  %s7493_s4 = inlined_call_operand.vmem [shape: f32[1,80], index: 4, kind: input, shape index: {}]   ;;  %s7494_s5 = inlined_call_operand.vmem [shape: f32[5,80,120], index: 5, kind: input, shape index: {}]   ;;  %s7495_s6 = inlined_call_operand.vmem [shape: f32[1,120], index: 6, kind: input, shape index: {}]   ;;  %s7496_s7 = inlined_call_operand.vmem [shape: f32[120,84], index: 7, kind: input, shape index: {}]   ;;  %s7497_s8 = inlined_call_operand.vmem [shape: f32[1,84], index: 8, kind: input, shape index: {}]   ;;  %s7498_s9 = inlined_call_operand.vmem [shape: f32[84,10], index: 9, kind: input, shape index: {}]   ;;  %s7499_s10 = inlined_call_operand.vmem [shape: f32[1,10], index: 10, kind: input, shape index: {}]   ;;  %s7500_s11 = inlined_call_operand.hbm [shape: f32[2,10], index: 11, kind: output, shape index: {}]  }
   0x1   :  { %v50_v0 = vld [vmem:[%s7489_s0 + $0x10] sm:$0xff]  ;;  %v48_v1 = vld [vmem:[%s7489_s0] sm:$0xff]  ;;  %v51_v2 = vld [vmem:[%s7489_s0 + $0x18] sm:$0xf]  ;;  %42 = vst.msk [vmem:[#allocation2 + $0x10] sm:$0xff] %vm39_vm0, %v5487_v5  ;;  %205 = vmatprep.mubr.f32.mxu0 %v5487_v5  ;;  %912 = vmatprep.mubr.f32.mxu1 %v5487_v5 }
   0x2   :  { %68 = vrot.lane.b32.xlu1 %v50_v0, %s5486_s23  ;;  %64 = vrot.lane.b32.xlu0 %v48_v1, %s5486_s23  ;;  %v49_v3 = vld [vmem:[%s7489_s0 + $0x8] sm:$0xff]  ;;  %43 = vst.msk [vmem:[#allocation2 + $0x18] sm:$0xff] %vm39_vm0, %v5487_v5  ;;  %40 = vst.msk [vmem:[#allocation2] sm:$0xff] %vm39_vm0, %v5487_v5  ;;  %v3912_v6 = vld [vmem:[%s7490_s1 + $0x58] sm:$0xff] }
   0x3   :  { %v3910_v4 = vld [vmem:[%s7490_s1 + $0x48] sm:$0xff]  ;;  %41 = vst.msk [vmem:[#allocation2 + $0x8] sm:$0xff] %vm39_vm0, %v5487_v5  ;;  %44 = vst.msk [vmem:[#allocation2 + $0x20] sm:$0xff] %vm39_vm0, %v5487_v5  ;;  %v3909_v7 = vld [vmem:[%s7490_s1 + $0x40] sm:$0xff] }
   0x4   :  { %45 = vst.msk [vmem:[#allocation2 + $0x28] sm:$0xff] %vm39_vm0, %v5487_v5  ;;  %46 = vst.msk [vmem:[#allocation2 + $0x30] sm:$0xff] %vm39_vm0, %v5487_v5  ;;  %v3911_v8 = vld [vmem:[%s7490_s1 + $0x50] sm:$0xff]  ;;  %v4837_v9 = vpack.c.bf16 %v3912_v6, %v3910_v4  ;;  %v3914_v11 = vld [vmem:[%s7490_s1 + $0x68] sm:$0xff] }
   0x5   :  { %47 = vst.msk [vmem:[#allocation2 + $0x38] sm:$0xff] %vm39_vm0, %v5487_v5  ;;  %v4839_v10 = vpack.c.bf16 %v3911_v8, %v3909_v7  ;;  %v3916_v12 = vld [vmem:[%s7490_s1 + $0x78] sm:$0xff]  ;;  %v3913_v14 = vld [vmem:[%s7490_s1 + $0x60] sm:$0xff]  ;;  %v3915_v15 = vld [vmem:[%s7490_s1 + $0x70] sm:$0xff] }
   0x6   :  { %v4841_v13 = vpack.c.bf16 %v3916_v12, %v3914_v11  ;;  %70 = vrot.lane.b32.xlu1 %v51_v2, %s5486_s23  ;;  %66 = vrot.lane.b32.xlu0 %v49_v3, %s5486_s23  ;;  %v105_v16 = vld [vmem:[%s7490_s1 + $0x8] sm:$0xff]  ;;  %v107_v17 = vld [vmem:[%s7490_s1 + $0x18] sm:$0xff] }
   0x7   :  { %4838 = vmatprep.subr.bf16.mxu0 %v4837_v9 }
   0x8   :  { %16 = vsyncpa [#allocation5], 0  ;;  %4840 = vmatpush1.bf16.msra.mxu0 %v4839_v10  ;;  %v4843_v18 = vpack.c.bf16 %v3915_v15, %v3913_v14  ;;  %v4845_v19 = vpack.c.bf16 %v107_v17, %v105_v16  ;;  %vm88_vm1 = vcmask 244752   ;;  %vm92_vm2 = vcmask 240656   ;;  %v104_v25 = vld [vmem:[%s7490_s1] sm:$0xff]  ;;  %v106_v26 = vld [vmem:[%s7490_s1 + $0x10] sm:$0xff] }
   0x9   :  { %4842 = vmatprep.subr.bf16.mxu0 %v4841_v13  ;;  %v109_v27 = vld [vmem:[%s7490_s1 + $0x28] sm:$0xff]  ;;  %v111_v28 = vld [vmem:[%s7490_s1 + $0x38] sm:$0xff]  ;;  %vm125_vm3 = vcmask 1046528   ;;  %v4847_v33 = vpack.c.bf16 %v106_v26, %v104_v25  ;;  %v108_v34 = vld [vmem:[%s7490_s1 + $0x20] sm:$0xff]  ;;  %vm580_vm4 = vcmask 1043456   ;;  %vm336_vm5 = vcmask 1045504  }
   0xa   :  { %v110_v35 = vld [vmem:[%s7490_s1 + $0x30] sm:$0xff]  ;;  %v4849_v37 = vpack.c.bf16 %v111_v28, %v109_v27  ;;  %v3926_v40 = vld [vmem:[%s7490_s1 + $0x88] sm:$0xff]  ;;  %v3928_v41 = vld [vmem:[%s7490_s1 + $0x98] sm:$0xff]  ;;  %vm458_vm6 = vcmask 1044480   ;;  %s5488_s13 = smov 44   ;;  %vm717_vm7 = vcmask 359424  }
   0xb   :  { %v4851_v42 = vpack.c.bf16 %v110_v35, %v108_v34  ;;  %v4853_v48 = vpack.c.bf16 %v3928_v41, %v3926_v40  ;;  %v3925_v54 = vld [vmem:[%s7490_s1 + $0x80] sm:$0xff]  ;;  %v3927_v55 = vld [vmem:[%s7490_s1 + $0x90] sm:$0xff]  ;;  %v3930_v56 = vld [vmem:[%s7490_s1 + $0xa8] sm:$0xff]  ;;  %vm736_vm8 = vcmask 679936   ;;  %vm746_vm9 = vcmask 681986   ;;  %s5490_s19 = smov 48  }
   0xc   :  { %4844 = vmatpush1.bf16.msra.mxu0 %v4843_v18  ;;  %v3932_v57 = vld [vmem:[%s7490_s1 + $0xb8] sm:$0xff]  ;;  %v4855_v58 = vpack.c.bf16 %v3927_v55, %v3925_v54  ;;  %v3929_v60 = vld [vmem:[%s7490_s1 + $0xa0] sm:$0xff]  ;;  %v3931_v61 = vld [vmem:[%s7490_s1 + $0xb0] sm:$0xff]  ;;  %vm748_vm10 = vcmask 684036   ;;  %vm750_vm11 = vcmask 686086   ;;  %vm835_vm12 = vcmask 687104  }
   0xd   :  { %4846 = vmatprep.subr.bf16.mxu0 %v4845_v19  ;;  %v4857_v59 = vpack.c.bf16 %v3932_v57, %v3930_v56  ;;  %v3938_v62 = vld [vmem:[%s7490_s1 + $0xc8] sm:$0xff]  ;;  %v3940_v63 = vld [vmem:[%s7490_s1 + $0xd8] sm:$0xff]  ;;  %v4859_v0 = vpack.c.bf16 %v3931_v61, %v3929_v60  ;;  %v3937_v2 = vld [vmem:[%s7490_s1 + $0xc0] sm:$0xff]  ;;  %vm5491_vm13 = vmmov 0   ;;  %vm1380_vm14 = vcmask 392192  }
   0xe   :  { %v4861_v1 = vpack.c.bf16 %v3940_v63, %v3938_v62  ;;  %v3939_v3 = vld [vmem:[%s7490_s1 + $0xd0] sm:$0xff]  ;;  %v3942_v6 = vld [vmem:[%s7490_s1 + $0xe8] sm:$0xff]  ;;  %v3944_v7 = vld [vmem:[%s7490_s1 + $0xf8] sm:$0xff]  ;;  %vm7501_vm15 = vcmask 654336  }
   0xf   :  { %v4863_v9 = vpack.c.bf16 %v3939_v3, %v3937_v2  ;;  %v4865_v10 = vpack.c.bf16 %v3944_v7, %v3942_v6  ;;  %v3941_v11 = vld [vmem:[%s7490_s1 + $0xe0] sm:$0xff]  ;;  %v3943_v12 = vld [vmem:[%s7490_s1 + $0xf0] sm:$0xff]  ;;  %v3950_v15 = vld [vmem:[%s7490_s1 + $0x108] sm:$0xff] }
  0x10   :  { %v3952_v16 = vld [vmem:[%s7490_s1 + $0x118] sm:$0xff]  ;;  %v4867_v17 = vpack.c.bf16 %v3943_v12, %v3941_v11  ;;  %v3954_v26 = vld [vmem:[%s7490_s1 + $0x128] sm:$0xff]  ;;  %v3969_v55 = vld [vmem:[%s7492_s3 + $0xf0] sm:$0xff] }
  0x11   :  { %v4869_v18 = vpack.c.bf16 %v3952_v16, %v3950_v15  ;;  %v3956_v27 = vld [vmem:[%s7490_s1 + $0x138] sm:$0xff]  ;;  %v3964_v40 = vld [vmem:[%s7492_s3 + $0xc8] sm:$0xff]  ;;  %v3971_v56 = vld [vmem:[%s7492_s3 + $0x100] sm:$0xff] }
  0x12   :  { %v3974_v60 = vld [vmem:[%s7492_s3 + $0x118] sm:$0xff]  ;;  %v3976_v61 = vld [vmem:[%s7492_s3 + $0x128] sm:$0xff]  ;;  %v3973_v63 = vld [vmem:[%s7492_s3 + $0x110] sm:$0xff] }
  0x13   :  { %v4889_v62 = vpack.c.bf16 %v3976_v61, %v3974_v60  ;;  %v3980_v6 = vld [vmem:[%s7492_s3 + $0x148] sm:$0xff]  ;;  %v3982_v12 = vld [vmem:[%s7492_s3 + $0x158] sm:$0xf]  ;;  %v3981_v16 = vld [vmem:[%s7492_s3 + $0x150] sm:$0xf] }
  0x14   :  { %v791_v15 = vld [vmem:[%s7492_s3 + $0x18] sm:$0xff] }
  0x74   :  { %v69_v20 = vpop.permute.xlu1 %68  ;;  %v65_v21 = vpop.permute.xlu0 %64 }
  0x75   :  { %91 = vst.msk [vmem:[#allocation2 + $0x12] sm:$0xff] %vm88_vm1, %v69_v20  ;;  %89 = vst.msk [vmem:[#allocation2 + $0x2] sm:$0xff] %vm88_vm1, %v65_v21 }
  0x78   :  { %v71_v22 = vpop.permute.xlu1 %70  ;;  %v67_v23 = vpop.permute.xlu0 %66 }
  0x79   :  { %93 = vst.msk [vmem:[#allocation2 + $0x1a] sm:$0xf] %vm92_vm2, %v71_v22  ;;  %v3949_v22 = vld [vmem:[%s7490_s1 + $0x100] sm:$0xff] }
  0x7a   :  { %90 = vst.msk [vmem:[#allocation2 + $0xa] sm:$0xff] %vm88_vm1, %v67_v23  ;;  %v3951_v23 = vld [vmem:[%s7490_s1 + $0x110] sm:$0xff] }
  0x7c   :  { %v5621_v24 = vld [vmem:[#allocation2] sm:$0xff] }
  0x7d   :  { %v126_v31 = vrot.slane %v5621_v24, 1  ;;  %v581_v43 = vrot.slane %v5621_v24, 4  ;;  %v337_v8 = vrot.slane %v5621_v24, 2  ;;  %v459_v28 = vrot.slane %v5621_v24, 3 }
  0x80   :  { %v5647_v36 = vld [vmem:[#allocation2 + $0x18] sm:$0xff] }
  0x81   :  { %v5635_v29 = vld [vmem:[#allocation2 + $0x8] sm:$0xff]  ;;  %v5637_v30 = vld [vmem:[#allocation2 + $0x10] sm:$0xff]  ;;  %v586_v46 = vrot.slane %v5647_v36, 4  ;;  %v131_v47 = vrot.slane %v5647_v36, 1  ;;  %v342_v20 = vrot.slane %v5647_v36, 2 }
  0x82   :  { %v127_v32 = vrot.slane %v5635_v29, 1  ;;  %v129_v39 = vrot.slane %v5637_v30, 1  ;;  %v582_v44 = vrot.slane %v5635_v29, 4  ;;  %v584_v45 = vrot.slane %v5637_v30, 4 }
  0x83   :  { %v338_v4 = vrot.slane %v5635_v29, 2  ;;  %v340_v14 = vrot.slane %v5637_v30, 2  ;;  %v460_v25 = vrot.slane %v5635_v29, 3  ;;  %v462_v35 = vrot.slane %v5637_v30, 3 }
  0x84   :  { %v128_v38 = vsel %vm125_vm3, %v126_v31, %v127_v32  ;;  %v130_v49 = vsel %vm125_vm3, %v127_v32, %v129_v39  ;;  %v5666_v50 = vsel %vm580_vm4, %v581_v43, %v582_v44  ;;  %v5669_v51 = vsel %vm580_vm4, %v582_v44, %v584_v45  ;;  %v3963_v43 = vld [vmem:[%s7492_s3 + $0xc0] sm:$0xff]  ;;  %v3966_v44 = vld [vmem:[%s7492_s3 + $0xd8] sm:$0xff] }
  0x85   :  { %3917 = vmatmul.mubr.msk.f32.vlgmr.msra.gmra.mrb[0].mxu0 %vm39_vm0, %v128_v38  ;;  %v5674_v52 = vsel %vm580_vm4, %v584_v45, %v586_v46  ;;  %v132_v53 = vsel %vm125_vm3, %v129_v39, %v131_v47  ;;  %v339_v13 = vsel %vm336_vm5, %v337_v8, %v338_v4  ;;  %v341_v19 = vsel %vm336_vm5, %v338_v4, %v340_v14  ;;  %v3968_v45 = vld [vmem:[%s7492_s3 + $0xe8] sm:$0xff]  ;;  %v3978_v4 = vld [vmem:[%s7492_s3 + $0x138] sm:$0xff]  ;;  %v3977_v8 = vld [vmem:[%s7492_s3 + $0x130] sm:$0xff] }
  0x86   :  { %4848 = vmatpush1.bf16.msra.mxu0 %v4847_v33  ;;  %211 = vmatprep.mubr.f32.mxu0 %v5487_v5  ;;  %v343_v21 = vsel %vm336_vm5, %v340_v14, %v342_v20  ;;  %v4871_v31 = vpack.c.bf16 %v3951_v23, %v3949_v22  ;;  %v4873_v32 = vpack.c.bf16 %v3956_v27, %v3954_v26  ;;  %v3955_v33 = vld [vmem:[%s7490_s1 + $0x130] sm:$0xff]  ;;  %v464_v38 = vrot.slane %v5647_v36, 3  ;;  %v98_v23 = vld [vmem:[%s7491_s2] sm:$0x1] }
  0x87   :  { %4850 = vmatprep.subr.bf16.mxu0 %v4849_v37  ;;  %v461_v34 = vsel %vm458_vm6, %v459_v28, %v460_v25  ;;  %v463_v37 = vsel %vm458_vm6, %v460_v25, %v462_v35  ;;  %v4893_v7 = vpack.c.bf16 %v3980_v6, %v3978_v4  ;;  %v792_v6 = vld [vmem:[%s7492_s3 + $0x20] sm:$0xff] }
  0x88   :  { %v465_v39 = vsel %vm458_vm6, %v462_v35, %v464_v38 }
  0x89   :  { %3918 = vmatmul.mubr.msk.f32.gmra.mrb[2].mxu0 %vm39_vm0, %v130_v49 }
  0x8a   :  { %217 = vmatprep.mubr.f32.mxu0 %v5487_v5  ;;  %4852 = vmatpush1.bf16.msra.mxu0 %v4851_v42  ;;  %v3961_v42 = vld [vmem:[%s7492_s3 + $0xb0] sm:$0xff] }
  0x8b   :  { %4854 = vmatprep.subr.bf16.mxu0 %v4853_v48  ;;  %v3967_v48 = vld [vmem:[%s7492_s3 + $0xe0] sm:$0xff] }
  0x8d   :  { %3919 = vmatmul.mubr.msk.f32.gmra.mrb[4].mxu0 %vm39_vm0, %v132_v53  ;;  %v3972_v53 = vld [vmem:[%s7492_s3 + $0x108] sm:$0xff] }
  0x8e   :  { %223 = vmatprep.mubr.f32.mxu0 %v5487_v5 }
  0x91   :  { %3920 = vmatmul.mubr.msk.f32.gmra.mrb[6].mxu0 %vm39_vm0, %v131_v47  ;;  %v3965_v47 = vld [vmem:[%s7492_s3 + $0xd0] sm:$0xff] }
  0x92   :  { %302 = vmatprep.mubr.f32.mxu0 %v5487_v5 }
  0x95   :  { %3921 = vmatmul.mubr.msk.f32.vlgmr.msra.gmra.mrb[0].mxu0 %vm39_vm0, %v5621_v24 }
  0x96   :  { %4856 = vmatpush1.bf16.msra.mxu0 %v4855_v58  ;;  %308 = vmatprep.mubr.f32.mxu0 %v5487_v5  ;;  %v4887_v58 = vpack.c.bf16 %v3971_v56, %v3969_v55 }
  0x97   :  { %4858 = vmatprep.subr.bf16.mxu0 %v4857_v59 }
  0x99   :  { %3922 = vmatmul.mubr.msk.f32.gmra.mrb[2].mxu0 %vm39_vm0, %v5635_v29  ;;  %v3953_v29 = vld [vmem:[%s7490_s1 + $0x120] sm:$0xff] }
  0x9a   :  { %314 = vmatprep.mubr.f32.mxu0 %v5487_v5  ;;  %4860 = vmatpush1.bf16.msra.mxu0 %v4859_v0  ;;  %v4875_v24 = vpack.c.bf16 %v3955_v33, %v3953_v29  ;;  %v3975_v0 = vld [vmem:[%s7492_s3 + $0x120] sm:$0xff] }
  0x9b   :  { %4862 = vmatprep.subr.bf16.mxu0 %v4861_v1  ;;  %v4891_v2 = vpack.c.bf16 %v3975_v0, %v3973_v63  ;;  %v788_v63 = vld [vmem:[%s7492_s3] sm:$0xff]  ;;  %v790_v0 = vld [vmem:[%s7492_s3 + $0x10] sm:$0xff] }
  0x9d   :  { %3923 = vmatmul.mubr.msk.f32.gmra.mrb[4].mxu0 %vm39_vm0, %v5637_v30  ;;  %v3962_v30 = vld [vmem:[%s7492_s3 + $0xb8] sm:$0xff] }
  0x9e   :  { %320 = vmatprep.mubr.f32.mxu0 %v5487_v5  ;;  %v4877_v41 = vpack.c.bf16 %v3964_v40, %v3962_v30 }
  0xa0   :  { %4878 = vmatprep.subr.bf16.mxu1 %v4877_v41 }
  0xa1   :  { %3924 = vmatmul.mubr.msk.f32.gmra.mrb[6].mxu0 %vm39_vm0, %v5647_v36  ;;  %v4879_v36 = vpack.c.bf16 %v3963_v43, %v3961_v42 }
  0xa2   :  { %416 = vmatprep.mubr.f32.mxu0 %v5487_v5 }
  0xa3   :  { %4880 = vmatpush1.bf16.msra.mxu1 %v4879_v36 }
  0xa5   :  { %3933 = vmatmul.mubr.msk.f32.vlgmr.msra.gmra.mrb[0].mxu0 %vm39_vm0, %v339_v13  ;;  %v789_v13 = vld [vmem:[%s7492_s3 + $0x8] sm:$0xff] }
  0xa6   :  { %4864 = vmatpush1.bf16.msra.mxu0 %v4863_v9  ;;  %422 = vmatprep.mubr.f32.mxu0 %v5487_v5  ;;  %v3979_v9 = vld [vmem:[%s7492_s3 + $0x140] sm:$0xff] }
  0xa7   :  { %4866 = vmatprep.subr.bf16.mxu0 %v4865_v10  ;;  %v4895_v11 = vpack.c.bf16 %v3979_v9, %v3977_v8  ;;  %v797_v9 = vld [vmem:[%s7492_s3 + $0x48] sm:$0xff] }
  0xa9   :  { %3934 = vmatmul.mubr.msk.f32.gmra.mrb[2].mxu0 %vm39_vm0, %v341_v19 }
  0xaa   :  { %428 = vmatprep.mubr.f32.mxu0 %v5487_v5  ;;  %4868 = vmatpush1.bf16.msra.mxu0 %v4867_v17  ;;  %v4897_v17 = vpack.c.bf16 %v791_v15, %v789_v13  ;;  %v796_v13 = vld [vmem:[%s7492_s3 + $0x40] sm:$0xff] }
  0xab   :  { %4870 = vmatprep.subr.bf16.mxu0 %v4869_v18  ;;  %v739_v18 = vlaneseq }
  0xad   :  { %3935 = vmatmul.mubr.msk.f32.gmra.mrb[4].mxu0 %vm39_vm0, %v343_v21  ;;  %v5885_v19 = vshrl.u32 %v739_v18, 7 }
  0xae   :  { %434 = vmatprep.mubr.f32.mxu0 %v5487_v5 }
  0xaf   :  { %v741_v21 = vsub.s32 0, %v5885_v19  ;;  %v4078_v19 = vld [vmem:[%s7494_s5 + $0x90] sm:$0xff] }
  0xb1   :  { %3936 = vmatmul.mubr.msk.f32.gmra.mrb[6].mxu0 %vm39_vm0, %v342_v20  ;;  %v5894_v28 = vrot.slane %v98_v23, %v741_v21 }
  0xb2   :  { %538 = vmatprep.mubr.f32.mxu0 %v5487_v5 }
  0xb5   :  { %3945 = vmatmul.mubr.msk.f32.vlgmr.msra.gmra.mrb[0].mxu0 %vm39_vm0, %v461_v34 }
  0xb6   :  { %4872 = vmatpush1.bf16.msra.mxu0 %v4871_v31  ;;  %544 = vmatprep.mubr.f32.mxu0 %v5487_v5 }
  0xb7   :  { %4874 = vmatprep.subr.bf16.mxu0 %v4873_v32 }
  0xb9   :  { %3946 = vmatmul.mubr.msk.f32.gmra.mrb[2].mxu0 %vm39_vm0, %v463_v37 }
  0xba   :  { %550 = vmatprep.mubr.f32.mxu0 %v5487_v5  ;;  %4876 = vmatpush1.bf16.msra.mxu0 %v4875_v24 }
  0xbd   :  { %3947 = vmatmul.mubr.msk.f32.gmra.mrb[4].mxu0 %vm39_vm0, %v465_v39 }
  0xbe   :  { %556 = vmatprep.mubr.f32.mxu0 %v5487_v5 }
  0xc1   :  { %3948 = vmatmul.mubr.msk.f32.gmra.mrb[6].mxu0 %vm39_vm0, %v464_v38 }
  0xc2   :  { %660 = vmatprep.mubr.f32.mxu0 %v5487_v5 }
  0xc5   :  { %3957 = vmatmul.mubr.msk.f32.vlgmr.msra.gmra.mrb[0].mxu0 %vm39_vm0, %v5666_v50  ;;  %v4883_v50 = vpack.c.bf16 %v3967_v48, %v3965_v47 }
  0xc6   :  { %666 = vmatprep.mubr.f32.mxu0 %v5487_v5 }
  0xc9   :  { %3958 = vmatmul.mubr.msk.f32.gmra.mrb[2].mxu0 %vm39_vm0, %v5669_v51 }
  0xca   :  { %672 = vmatprep.mubr.f32.mxu0 %v5487_v5 }
  0xcd   :  { %3959 = vmatmul.mubr.msk.f32.gmra.mrb[4].mxu0 %vm39_vm0, %v5674_v52  ;;  %v3970_v52 = vld [vmem:[%s7492_s3 + $0xf8] sm:$0xff] }
  0xce   :  { %678 = vmatprep.mubr.f32.mxu0 %v5487_v5  ;;  %v4885_v54 = vpack.c.bf16 %v3972_v53, %v3970_v52 }
  0xd1   :  { %3960 = vmatmul.mubr.msk.f32.gmra.mrb[6].mxu0 %vm39_vm0, %v586_v46  ;;  %v4881_v46 = vpack.c.bf16 %v3968_v45, %v3966_v44 }
  0xd2   :  { %4511 = vmatprep.mubr.msk.f32.mxu0 %vm5491_vm13, %v5487_v5 }
  0xd3   :  { %4882 = vmatprep.subr.bf16.mxu1 %v4881_v46 }
  0xd4   :  { %4884 = vmatpush1.bf16.msra.mxu1 %v4883_v50 }
  0xd5   :  { %4886 = vmatprep.subr.bf16.mxu1 %v4885_v54 }
  0xd8   :  { %4888 = vmatpush1.bf16.msra.mxu1 %v4887_v58 }
  0xd9   :  { %4890 = vmatprep.subr.bf16.mxu1 %v4889_v62 }
  0xdc   :  { %4892 = vmatpush1.bf16.msra.mxu1 %v4891_v2  ;;  %v795_v2 = vld [vmem:[%s7492_s3 + $0x38] sm:$0xff] }
  0xdd   :  { %4894 = vmatprep.subr.bf16.mxu1 %v4893_v7  ;;  %v794_v7 = vld [vmem:[%s7492_s3 + $0x30] sm:$0xff] }
  0xe0   :  { %4896 = vmatpush1.bf16.msra.mxu1 %v4895_v11  ;;  %v4903_v11 = vpack.c.bf16 %v794_v7, %v792_v6  ;;  %v4017_v6 = vld [vmem:[%s7492_s3 + $0x210] sm:$0xff]  ;;  %v4019_v7 = vld [vmem:[%s7492_s3 + $0x220] sm:$0xff] }
  0xe1   :  { %3983 = vmatprep.subr.msk.mxu1 %vm580_vm4, %v3982_v12 }
  0xe4   :  { %3984 = vmatpush1.msk.msra.mxu1 %vm580_vm4, %v3981_v16  ;;  %v801_v16 = vld [vmem:[%s7492_s3 + $0x68] sm:$0xff] }
  0xe5   :  { %4898 = vmatprep.subr.bf16.mxu1 %v4897_v17  ;;  %v803_v17 = vld [vmem:[%s7492_s3 + $0x78] sm:$0xff] }
 0x198   :  { %v662_v49 = vpop.f32.mrb[0].mxu0 }
 0x199   :  { %701 = vrot.lane.b32.xlu0 %v662_v49, %s5488_s13  ;;  %v664_v51 = vpop.f32.mrb[1].mxu0 }
 0x19a   :  { %703 = vrot.lane.b32.xlu1 %v664_v51, %s5488_s13 }
 0x19c   :  { %v668_v57 = vpop.f32.mrb[2].mxu0 }
 0x19d   :  { %705 = vrot.lane.b32.xlu0 %v668_v57, %s5488_s13  ;;  %v670_v59 = vpop.f32.mrb[3].mxu0 }
 0x19e   :  { %707 = vrot.lane.b32.xlu1 %v670_v59, %s5488_s13 }
 0x1a0   :  { %v674_v1 = vpop.f32.mrb[4].mxu0 }
 0x1a1   :  { %709 = vrot.lane.b32.xlu0 %v674_v1, %s5488_s13  ;;  %v676_v3 = vpop.f32.mrb[5].mxu0 }
 0x1a2   :  { %711 = vrot.lane.b32.xlu1 %v676_v3, %s5488_s13  ;;  %v4899_v3 = vpack.c.bf16 %v790_v0, %v788_v63  ;;  %v4007_v63 = vld [vmem:[%s7492_s3 + $0x1e0] sm:$0xff]  ;;  %v4009_v0 = vld [vmem:[%s7492_s3 + $0x1f0] sm:$0xff] }
 0x1a4   :  { %v680_v10 = vpop.f32.mrb[6].mxu0 }
 0x1a5   :  { %713 = vrot.lane.b32.xlu0 %v680_v10, %s5488_s13  ;;  %v682_v14 = vpop.f32.mrb[7].mxu0 }
 0x1a6   :  { %715 = vrot.lane.b32.xlu1 %v682_v14, %s5488_s13  ;;  %v798_v14 = vld [vmem:[%s7492_s3 + $0x50] sm:$0xff] }
 0x1a7   :  { %v4907_v18 = vpack.c.bf16 %v798_v14, %v796_v13  ;;  %v4021_v14 = vld [vmem:[%s7492_s3 + $0x230] sm:$0xff] }
 0x20b   :  { %v702_v20 = vpop.permute.xlu0 %701 }
 0x20c   :  { %v704_v22 = vpop.permute.xlu1 %703 }
 0x20d   :  { %v718_v25 = vsel %vm717_vm7, %v702_v20, %v704_v22  ;;  %v4909_v20 = vpack.c.bf16 %v803_v17, %v801_v16  ;;  %v800_v22 = vld [vmem:[%s7492_s3 + $0x60] sm:$0xff]  ;;  %v4026_v17 = vld [vmem:[%s7492_s3 + $0x258] sm:$0xff] }
 0x20e   :  { %v726_v26 = vmax.f32 %v662_v49, %v718_v25  ;;  %v805_v25 = vld [vmem:[%s7492_s3 + $0x88] sm:$0xff] }
 0x20f   :  { %v706_v27 = vpop.permute.xlu0 %705 }
 0x210   :  { %v731_v31 = vrot.slane %v726_v26, 1  ;;  %v708_v32 = vpop.permute.xlu1 %707 }
 0x211   :  { %v719_v29 = vsel %vm717_vm7, %v706_v27, %v708_v32  ;;  %v804_v32 = vld [vmem:[%s7492_s3 + $0x80] sm:$0xff] }
 0x212   :  { %v733_v33 = vmax.f32 %v726_v26, %v731_v31  ;;  %v727_v34 = vmax.f32 %v668_v57, %v719_v29  ;;  %v807_v26 = vld [vmem:[%s7492_s3 + $0x98] sm:$0xff]  ;;  %v806_v29 = vld [vmem:[%s7492_s3 + $0x90] sm:$0xff] }
 0x213   :  { %v710_v35 = vpop.permute.xlu0 %709  ;;  %v4913_v31 = vpack.c.bf16 %v807_v26, %v805_v25  ;;  %v4027_v25 = vld [vmem:[%s7492_s3 + $0x260] sm:$0xff] }
 0x214   :  { %v734_v24 = vadd.f32 %v733_v33, %v98_v23  ;;  %v744_v37 = vadd.f32 %v5894_v28, %v733_v33  ;;  %v753_v38 = vrot.slane %v727_v34, 1  ;;  %v712_v39 = vpop.permute.xlu1 %711  ;;  %v4915_v33 = vpack.c.bf16 %v806_v29, %v804_v32 }
 0x215   :  { %v720_v30 = vsel %vm717_vm7, %v710_v35, %v712_v39  ;;  %v3992_v35 = vld [vmem:[%s7492_s3 + $0x168] sm:$0xff] }
 0x216   :  { %v735_v40 = vmax.f32 %v734_v24, 0.0  ;;  %v745_v41 = vmax.f32 %v744_v37, 0.0  ;;  %v755_v42 = vmax.f32 %v727_v34, %v753_v38  ;;  %v728_v43 = vmax.f32 %v674_v1, %v720_v30  ;;  %v793_v1 = vld [vmem:[%s7492_s3 + $0x28] sm:$0xff]  ;;  %v3994_v24 = vld [vmem:[%s7492_s3 + $0x178] sm:$0xff]  ;;  %v3991_v37 = vld [vmem:[%s7492_s3 + $0x160] sm:$0xff] }
 0x217   :  { %v714_v36 = vpop.permute.xlu0 %713  ;;  %v4901_v4 = vpack.c.bf16 %v795_v2, %v793_v1  ;;  %v809_v34 = vld [vmem:[%s7492_s3 + $0xa8] sm:$0xf]  ;;  %v3993_v38 = vld [vmem:[%s7492_s3 + $0x170] sm:$0xff]  ;;  %v3998_v30 = vld [vmem:[%s7492_s3 + $0x198] sm:$0xff]  ;;  %v4935_v1 = vpack.c.bf16 %v4009_v0, %v4007_v63 }
 0x218   :  { %737 = vst.msk [vmem:[#allocation3] sm:$0x1] %vm736_vm8, %v735_v40  ;;  %v756_v44 = vadd.f32 %v755_v42, %v98_v23  ;;  %v759_v45 = vadd.f32 %v755_v42, %v5894_v28  ;;  %v765_v46 = vrot.slane %v728_v43, 1  ;;  %v716_v47 = vpop.permute.xlu1 %715  ;;  %v3996_v39 = vld [vmem:[%s7492_s3 + $0x188] sm:$0xff]  ;;  %v808_v40 = vld [vmem:[%s7492_s3 + $0xa0] sm:$0xf]  ;;  %v4919_v42 = vpack.c.bf16 %v3993_v38, %v3991_v37 }
 0x219   :  { %747 = vst.msk [vmem:[#allocation3 - $0x1] sm:$0x4] %vm746_vm9, %v745_v41  ;;  %v721_v48 = vsel %vm717_vm7, %v714_v36, %v716_v47  ;;  %v3995_v36 = vld [vmem:[%s7492_s3 + $0x180] sm:$0xff]  ;;  %v4002_v47 = vld [vmem:[%s7492_s3 + $0x1b8] sm:$0xff]  ;;  %v4012_v2 = vld [vmem:[%s7492_s3 + $0x208] sm:$0xf] }
 0x21a   :  { %749 = vst.msk [vmem:[#allocation3 - $0x2] sm:$0x10] %vm748_vm10, %v745_v41  ;;  %v757_v49 = vmax.f32 %v756_v44, 0.0  ;;  %v760_v50 = vmax.f32 %v759_v45, 0.0  ;;  %v767_v51 = vmax.f32 %v728_v43, %v765_v46  ;;  %v729_v52 = vmax.f32 %v680_v10, %v721_v48  ;;  %v799_v10 = vld [vmem:[%s7492_s3 + $0x58] sm:$0xff]  ;;  %v3997_v44 = vld [vmem:[%s7492_s3 + $0x190] sm:$0xff] }
 0x21b   :  { %751 = vst.msk [vmem:[#allocation3 - $0x3] sm:$0x40] %vm750_vm11, %v745_v41  ;;  %v4905_v12 = vpack.c.bf16 %v799_v10, %v797_v9  ;;  %v4917_v41 = vpack.c.bf16 %v3994_v24, %v3992_v35  ;;  %v4921_v43 = vpack.c.bf16 %v3998_v30, %v3996_v39  ;;  %v4000_v46 = vld [vmem:[%s7492_s3 + $0x1a8] sm:$0xff]  ;;  %v4923_v48 = vpack.c.bf16 %v3997_v44, %v3995_v36  ;;  %v4011_v10 = vld [vmem:[%s7492_s3 + $0x200] sm:$0xf]  ;;  %v4034_v35 = vld [vmem:[%s7492_s3 + $0x298] sm:$0xff] }
 0x21c   :  { %758 = vst.msk [vmem:[#allocation3 + $0x4] sm:$0x1] %vm736_vm8, %v757_v49  ;;  %v768_v53 = vadd.f32 %v767_v51, %v98_v23  ;;  %v771_v54 = vadd.f32 %v767_v51, %v5894_v28  ;;  %v777_v55 = vrot.slane %v729_v52, 1  ;;  %v4925_v49 = vpack.c.bf16 %v4002_v47, %v4000_v46  ;;  %v4001_v51 = vld [vmem:[%s7492_s3 + $0x1b0] sm:$0xff]  ;;  %v4024_v9 = vld [vmem:[%s7492_s3 + $0x248] sm:$0xff]  ;;  %v4035_v30 = vld [vmem:[%s7492_s3 + $0x2a0] sm:$0xff] }
 0x21d   :  { %761 = vst.msk [vmem:[#allocation3 + $0x3] sm:$0x4] %vm746_vm9, %v760_v50  ;;  %v4036_v24 = vld [vmem:[%s7492_s3 + $0x2a8] sm:$0xff]  ;;  %v4033_v39 = vld [vmem:[%s7492_s3 + $0x290] sm:$0xff]  ;;  %v4043_v36 = vld [vmem:[%s7492_s3 + $0x2c0] sm:$0xff] }
 0x21e   :  { %762 = vst.msk [vmem:[#allocation3 + $0x2] sm:$0x10] %vm748_vm10, %v760_v50  ;;  %v769_v56 = vmax.f32 %v768_v53, 0.0  ;;  %v772_v57 = vmax.f32 %v771_v54, 0.0  ;;  %v779_v58 = vmax.f32 %v729_v52, %v777_v55  ;;  %v4004_v53 = vld [vmem:[%s7492_s3 + $0x1c8] sm:$0xff]  ;;  %v4006_v54 = vld [vmem:[%s7492_s3 + $0x1d8] sm:$0xff]  ;;  %v4953_v38 = vpack.c.bf16 %v4036_v24, %v4034_v35 }
 0x21f   :  { %763 = vst.msk [vmem:[#allocation3 + $0x1] sm:$0x40] %vm750_vm11, %v760_v50  ;;  %v3999_v50 = vld [vmem:[%s7492_s3 + $0x1a0] sm:$0xff]  ;;  %v4045_v44 = vld [vmem:[%s7492_s3 + $0x2d0] sm:$0xff]  ;;  %v4050_v46 = vld [vmem:[%s7492_s3 + $0x2f8] sm:$0xff] }
 0x220   :  { %770 = vst.msk [vmem:[#allocation3 + $0x8] sm:$0x1] %vm736_vm8, %v769_v56  ;;  %v780_v59 = vadd.f32 %v779_v58, %v98_v23  ;;  %v783_v60 = vadd.f32 %v779_v58, %v5894_v28  ;;  %v802_v23 = vld [vmem:[%s7492_s3 + $0x70] sm:$0xff]  ;;  %v4927_v55 = vpack.c.bf16 %v4001_v51, %v3999_v50  ;;  %v4929_v56 = vpack.c.bf16 %v4006_v54, %v4004_v53  ;;  %v4047_v51 = vld [vmem:[%s7492_s3 + $0x2e0] sm:$0xff]  ;;  %v4052_v54 = vld [vmem:[%s7492_s3 + $0x308] sm:$0xff] }
 0x221   :  { %773 = vst.msk [vmem:[#allocation3 + $0x7] sm:$0x4] %vm746_vm9, %v772_v57  ;;  %v4911_v27 = vpack.c.bf16 %v802_v23, %v800_v22  ;;  %v4005_v58 = vld [vmem:[%s7492_s3 + $0x1d0] sm:$0xff] }
 0x222   :  { %774 = vst.msk [vmem:[#allocation3 + $0x6] sm:$0x10] %vm748_vm10, %v772_v57  ;;  %v781_v61 = vmax.f32 %v780_v59, 0.0  ;;  %v784_v62 = vmax.f32 %v783_v60, 0.0  ;;  %v4008_v59 = vld [vmem:[%s7492_s3 + $0x1e8] sm:$0xff]  ;;  %v4010_v60 = vld [vmem:[%s7492_s3 + $0x1f8] sm:$0xff] }
 0x223   :  { %775 = vst.msk [vmem:[#allocation3 + $0x5] sm:$0x40] %vm750_vm11, %v772_v57  ;;  %v4003_v57 = vld [vmem:[%s7492_s3 + $0x1c0] sm:$0xff]  ;;  %v4025_v23 = vld [vmem:[%s7492_s3 + $0x250] sm:$0xff] }
 0x224   :  { %782 = vst.msk [vmem:[#allocation3 + $0xc] sm:$0x1] %vm736_vm8, %v781_v61  ;;  %v4931_v61 = vpack.c.bf16 %v4005_v58, %v4003_v57  ;;  %v4947_v32 = vpack.c.bf16 %v4027_v25, %v4025_v23  ;;  %v4037_v47 = vld [vmem:[%s7492_s3 + $0x2b0] sm:$0xf]  ;;  %v4051_v58 = vld [vmem:[%s7492_s3 + $0x300] sm:$0xff] }
 0x225   :  { %785 = vst.msk [vmem:[#allocation3 + $0xb] sm:$0x4] %vm746_vm9, %v784_v62  ;;  %v4933_v62 = vpack.c.bf16 %v4010_v60, %v4008_v59  ;;  %v4053_v59 = vld [vmem:[%s7492_s3 + $0x310] sm:$0xff]  ;;  %v1398_v25 = vld [vmem:[%s7494_s5 + $0x20] sm:$0xff] }
 0x226   :  { %v786_v45 = vld [vmem:[#allocation3] sm:$0xff]  ;;  %v4967_v63 = vpack.c.bf16 %v4053_v59, %v4051_v58 }
 0x227   :  { %v810_v8 = vld [vmem:[#allocation3 + $0x1] sm:$0xff] }
 0x228   :  { %3985 = vmatmul.mubr.msk.f32.vlgmr.msra.gmra.mrb[0].mxu1 %vm835_vm12, %v810_v8  ;;  %v787_v52 = vld [vmem:[#allocation3 + $0x8] sm:$0x3]  ;;  %v4022_v8 = vld [vmem:[%s7492_s3 + $0x238] sm:$0xff] }
 0x229   :  { %4900 = vmatpush1.bf16.msra.mxu1 %v4899_v3  ;;  %918 = vmatprep.mubr.f32.mxu1 %v5487_v5  ;;  %v811_v15 = vld [vmem:[#allocation3 + $0x9] sm:$0x3]  ;;  %v4018_v3 = vld [vmem:[%s7492_s3 + $0x218] sm:$0xff]  ;;  %v4941_v13 = vpack.c.bf16 %v4024_v9, %v4022_v8  ;;  %v4059_v8 = vld [vmem:[%s7492_s3 + $0x340] sm:$0xff] }
 0x22a   :  { %4902 = vmatprep.subr.bf16.mxu1 %v4901_v4  ;;  %v4020_v4 = vld [vmem:[%s7492_s3 + $0x228] sm:$0xff]  ;;  %v4061_v9 = vld [vmem:[%s7492_s3 + $0x350] sm:$0xff] }
 0x22b   :  { %v1014_v16 = vld [vmem:[#allocation3 + $0x2] sm:$0xff]  ;;  %v1015_v26 = vld [vmem:[#allocation3 + $0xa] sm:$0x3] }
 0x22c   :  { %3986 = vmatmul.mubr.msk.f32.gmra.mrb[2].mxu1 %vm835_vm12, %v811_v15  ;;  %v4023_v15 = vld [vmem:[%s7492_s3 + $0x240] sm:$0xff]  ;;  %v1133_v60 = vld [vmem:[#allocation3 + $0xb] sm:$0x3] }
 0x22d   :  { %4904 = vmatpush1.bf16.msra.mxu1 %v4903_v11  ;;  %1001 = vmatprep.mubr.f32.mxu1 %v5487_v5  ;;  %v4937_v11 = vpack.c.bf16 %v4020_v4, %v4018_v3  ;;  %v1132_v53 = vld [vmem:[#allocation3 + $0x3] sm:$0xff]  ;;  %v4062_v4 = vld [vmem:[%s7492_s3 + $0x358] sm:$0xff] }
 0x22e   :  { %4906 = vmatprep.subr.bf16.mxu1 %v4905_v12  ;;  %v4939_v12 = vpack.c.bf16 %v4019_v7, %v4017_v6  ;;  %v4060_v3 = vld [vmem:[%s7492_s3 + $0x348] sm:$0xff] }
 0x22f   :  { %v4973_v7 = vpack.c.bf16 %v4062_v4, %v4060_v3  ;;  %v4072_v4 = vld [vmem:[%s7494_s5 + $0x60] sm:$0xff] }
 0x231   :  { %4908 = vmatpush1.bf16.msra.mxu1 %v4907_v18  ;;  %v4028_v18 = vld [vmem:[%s7492_s3 + $0x268] sm:$0xff] }
 0x232   :  { %4910 = vmatprep.subr.bf16.mxu1 %v4909_v20  ;;  %v4943_v20 = vpack.c.bf16 %v4023_v15, %v4021_v14  ;;  %v4945_v22 = vpack.c.bf16 %v4028_v18, %v4026_v17  ;;  %v1251_v14 = vld [vmem:[#allocation3 + $0xc] sm:$0x3]  ;;  %v1394_v15 = vld [vmem:[%s7494_s5] sm:$0xff]  ;;  %v1396_v17 = vld [vmem:[%s7494_s5 + $0x10] sm:$0xff]  ;;  %v5489_v18 = vmov 0.0|0.0  }
 0x233   :  { %4977 = vmatprep.subr.bf16.mxu0 %v5489_v18 }
 0x235   :  { %4912 = vmatpush1.bf16.msra.mxu1 %v4911_v27  ;;  %v4030_v27 = vld [vmem:[%s7492_s3 + $0x278] sm:$0xff] }
 0x236   :  { %4914 = vmatprep.subr.bf16.mxu1 %v4913_v31  ;;  %v4032_v31 = vld [vmem:[%s7492_s3 + $0x288] sm:$0xff] }
 0x237   :  { %v4949_v29 = vpack.c.bf16 %v4032_v31, %v4030_v27  ;;  %v1400_v31 = vld [vmem:[%s7494_s5 + $0x30] sm:$0xff] }
 0x239   :  { %4916 = vmatpush1.bf16.msra.mxu1 %v4915_v33  ;;  %v4029_v33 = vld [vmem:[%s7492_s3 + $0x270] sm:$0xff] }
 0x23a   :  { %3987 = vmatprep.subr.msk.mxu1 %vm580_vm4, %v809_v34  ;;  %v4031_v34 = vld [vmem:[%s7492_s3 + $0x280] sm:$0xff] }
 0x23b   :  { %v4951_v37 = vpack.c.bf16 %v4031_v34, %v4029_v33  ;;  %v1402_v33 = vld [vmem:[%s7494_s5 + $0x40] sm:$0xff]  ;;  %v1403_v34 = vld [vmem:[%s7494_s5 + $0x48] sm:$0xff] }
 0x23c   :  { %v4990_v35 = vpack.c.bf16 %v1403_v34, %v1402_v33  ;;  %v4087_v34 = vld [vmem:[%s7494_s5 + $0xd0] sm:$0xff] }
 0x23d   :  { %3988 = vmatpush1.msk.msra.mxu1 %vm580_vm4, %v808_v40  ;;  %v4955_v40 = vpack.c.bf16 %v4035_v30, %v4033_v39  ;;  %v1835_v30 = vld [vmem:[%s7496_s7] sm:$0xff] }
 0x23e   :  { %3989 = vmatmul.mubr.msk.f32.vlgmr.msra.gmra.mrb[0].mxu1 %vm835_vm12, %v786_v45  ;;  %4918 = vmatprep.subr.bf16.mxu1 %v4917_v41  ;;  %v4038_v41 = vld [vmem:[%s7492_s3 + $0x2b8] sm:$0xf]  ;;  %v4048_v45 = vld [vmem:[%s7492_s3 + $0x2e8] sm:$0xff] }
 0x23f   :  { %4920 = vmatpush1.bf16.msra.mxu1 %v4919_v42  ;;  %1007 = vmatprep.mubr.f32.mxu1 %v5487_v5  ;;  %v4044_v42 = vld [vmem:[%s7492_s3 + $0x2c8] sm:$0xff]  ;;  %v4961_v50 = vpack.c.bf16 %v4050_v46, %v4048_v45 }
 0x240   :  { %4922 = vmatprep.subr.bf16.mxu1 %v4921_v43  ;;  %v4046_v43 = vld [vmem:[%s7492_s3 + $0x2d8] sm:$0xff]  ;;  %v1840_v45 = vld [vmem:[%s7496_s7 + $0x28] sm:$0xff] }
 0x242   :  { %3990 = vmatmul.mubr.msk.f32.gmra.mrb[2].mxu1 %vm835_vm12, %v787_v52  ;;  %v4049_v52 = vld [vmem:[%s7492_s3 + $0x2f0] sm:$0xff] }
 0x243   :  { %4924 = vmatpush1.bf16.msra.mxu1 %v4923_v48  ;;  %1115 = vmatprep.mubr.f32.mxu1 %v5487_v5  ;;  %v4957_v48 = vpack.c.bf16 %v4046_v43, %v4044_v42  ;;  %v1838_v43 = vld [vmem:[%s7496_s7 + $0x18] sm:$0xff] }
 0x244   :  { %4926 = vmatprep.subr.bf16.mxu1 %v4925_v49  ;;  %v4959_v49 = vpack.c.bf16 %v4045_v44, %v4043_v36  ;;  %v1839_v44 = vld [vmem:[%s7496_s7 + $0x20] sm:$0xff] }
 0x245   :  { %v5059_v46 = vpack.c.bf16 %v1840_v45, %v1839_v44  ;;  %v4095_v44 = vld [vmem:[%s7494_s5 + $0x108] sm:$0xff] }
 0x247   :  { %4928 = vmatpush1.bf16.msra.mxu1 %v4927_v55  ;;  %v4054_v55 = vld [vmem:[%s7492_s3 + $0x318] sm:$0xff] }
 0x248   :  { %4930 = vmatprep.subr.bf16.mxu1 %v4929_v56  ;;  %v4963_v56 = vpack.c.bf16 %v4049_v52, %v4047_v51  ;;  %v4965_v57 = vpack.c.bf16 %v4054_v55, %v4052_v54  ;;  %v1844_v51 = vld [vmem:[%s7496_s7 + $0x48] sm:$0xff]  ;;  %v1846_v54 = vld [vmem:[%s7496_s7 + $0x58] sm:$0xff] }
 0x24b   :  { %4932 = vmatpush1.bf16.msra.mxu1 %v4931_v61  ;;  %v4056_v61 = vld [vmem:[%s7492_s3 + $0x328] sm:$0xff] }
 0x24c   :  { %4934 = vmatprep.subr.bf16.mxu1 %v4933_v62  ;;  %v4058_v62 = vld [vmem:[%s7492_s3 + $0x338] sm:$0xff] }
 0x24d   :  { %v4969_v0 = vpack.c.bf16 %v4058_v62, %v4056_v61  ;;  %v4070_v62 = vld [vmem:[%s7494_s5 + $0x50] sm:$0xff] }
 0x24f   :  { %4936 = vmatpush1.bf16.msra.mxu1 %v4935_v1  ;;  %v4055_v1 = vld [vmem:[%s7492_s3 + $0x320] sm:$0xff] }
 0x250   :  { %4013 = vmatprep.subr.msk.mxu1 %vm580_vm4, %v4012_v2  ;;  %v4057_v2 = vld [vmem:[%s7492_s3 + $0x330] sm:$0xff] }
 0x251   :  { %v4971_v6 = vpack.c.bf16 %v4057_v2, %v4055_v1 }
 0x253   :  { %4014 = vmatpush1.msk.msra.mxu1 %vm580_vm4, %v4011_v10  ;;  %v4975_v10 = vpack.c.bf16 %v4061_v9, %v4059_v8  ;;  %v4074_v8 = vld [vmem:[%s7494_s5 + $0x70] sm:$0xff]  ;;  %v4075_v9 = vld [vmem:[%s7494_s5 + $0x78] sm:$0xff] }
 0x254   :  { %4015 = vmatmul.mubr.msk.f32.vlgmr.msra.gmra.mrb[0].mxu1 %vm835_vm12, %v1014_v16  ;;  %4938 = vmatprep.subr.bf16.mxu1 %v4937_v11  ;;  %v4064_v11 = vld [vmem:[%s7492_s3 + $0x368] sm:$0xf] }
 0x255   :  { %4940 = vmatpush1.bf16.msra.mxu1 %v4939_v12  ;;  %1121 = vmatprep.mubr.f32.mxu1 %v5487_v5  ;;  %v4063_v12 = vld [vmem:[%s7492_s3 + $0x360] sm:$0xf]  ;;  %v1395_v16 = vld [vmem:[%s7494_s5 + $0x8] sm:$0xff] }
 0x256   :  { %4942 = vmatprep.subr.bf16.mxu1 %v4941_v13  ;;  %v1250_v13 = vld [vmem:[#allocation3 + $0x4] sm:$0xff] }
 0x258   :  { %4016 = vmatmul.mubr.msk.f32.gmra.mrb[2].mxu1 %vm835_vm12, %v1015_v26  ;;  %v1399_v26 = vld [vmem:[%s7494_s5 + $0x28] sm:$0xff] }
 0x259   :  { %4944 = vmatpush1.bf16.msra.mxu1 %v4943_v20  ;;  %1233 = vmatprep.mubr.f32.mxu1 %v5487_v5  ;;  %v4978_v20 = vpack.c.bf16 %v1395_v16, %v1394_v15  ;;  %v4984_v27 = vpack.c.bf16 %v1399_v26, %v1398_v25  ;;  %v4083_v26 = vld [vmem:[%s7494_s5 + $0xb0] sm:$0xff] }
 0x25a   :  { %4946 = vmatprep.subr.bf16.mxu1 %v4945_v22  ;;  %v1397_v22 = vld [vmem:[%s7494_s5 + $0x18] sm:$0xff] }
 0x25b   :  { %4979 = vmatpush3.bf16.msra.mxu0 %v4978_v20  ;;  %v4981_v23 = vpack.c.bf16 %v1397_v22, %v1396_v17  ;;  %v4081_v20 = vld [vmem:[%s7494_s5 + $0xa0] sm:$0xff]  ;;  %v4082_v22 = vld [vmem:[%s7494_s5 + $0xa8] sm:$0xff] }
 0x25c   :  { %4980 = vmatprep.subr.bf16.mxu0 %v5489_v18 }
 0x25d   :  { %4948 = vmatpush1.bf16.msra.mxu1 %v4947_v32  ;;  %v1401_v32 = vld [vmem:[%s7494_s5 + $0x38] sm:$0xff] }
 0x25e   :  { %4950 = vmatprep.subr.bf16.mxu1 %v4949_v29  ;;  %v4987_v29 = vpack.c.bf16 %v1401_v32, %v1400_v31  ;;  %v4085_v32 = vld [vmem:[%s7494_s5 + $0xc0] sm:$0xff] }
 0x25f   :  { %4982 = vmatpush3.bf16.msra.mxu0 %v4981_v23  ;;  %v5008_v23 = vpack.c.bf16 %v4082_v22, %v4081_v20  ;;  %v52_v20 = vld [vmem:[%s7489_s0 + $0x20] sm:$0xff]  ;;  %v53_v22 = vld [vmem:[%s7489_s0 + $0x28] sm:$0xff] }
 0x260   :  { %4983 = vmatprep.subr.bf16.mxu0 %v5489_v18 }
 0x261   :  { %4952 = vmatpush1.bf16.msra.mxu1 %v4951_v37 }
 0x262   :  { %4954 = vmatprep.subr.bf16.mxu1 %v4953_v38 }
 0x263   :  { %4985 = vmatpush3.bf16.msra.mxu0 %v4984_v27  ;;  %v4084_v27 = vld [vmem:[%s7494_s5 + $0xb8] sm:$0xff] }
 0x264   :  { %4986 = vmatprep.subr.bf16.mxu0 %v5489_v18  ;;  %v5011_v31 = vpack.c.bf16 %v4084_v27, %v4083_v26 }
 0x265   :  { %4956 = vmatpush1.bf16.msra.mxu1 %v4955_v40  ;;  %v1836_v40 = vld [vmem:[%s7496_s7 + $0x8] sm:$0xff] }
 0x266   :  { %4039 = vmatprep.subr.msk.mxu1 %vm580_vm4, %v4038_v41  ;;  %v1837_v41 = vld [vmem:[%s7496_s7 + $0x10] sm:$0xff]  ;;  %v5053_v42 = vpack.c.bf16 %v1836_v40, %v1835_v30 }
 0x267   :  { %4988 = vmatpush3.bf16.msra.mxu0 %v4987_v29  ;;  %v5056_v36 = vpack.c.bf16 %v1838_v43, %v1837_v41  ;;  %v4086_v29 = vld [vmem:[%s7494_s5 + $0xc8] sm:$0xff]  ;;  %v4092_v40 = vld [vmem:[%s7494_s5 + $0xf0] sm:$0xff]  ;;  %v4093_v41 = vld [vmem:[%s7494_s5 + $0xf8] sm:$0xff] }
 0x268   :  { %4989 = vmatprep.subr.bf16.mxu0 %v5489_v18  ;;  %v5014_v33 = vpack.c.bf16 %v4086_v29, %v4085_v32  ;;  %v1926_v32 = vld [vmem:[%s7498_s9] sm:$0xff]  ;;  %v1927_v29 = vld [vmem:[%s7498_s9 + $0x8] sm:$0xff] }
 0x269   :  { %4040 = vmatpush1.msk.msra.mxu1 %vm580_vm4, %v4037_v47  ;;  %v1841_v47 = vld [vmem:[%s7496_s7 + $0x30] sm:$0xff] }
 0x26a   :  { %4041 = vmatmul.mubr.msk.f32.vlgmr.msra.gmra.mrb[0].mxu1 %vm835_vm12, %v1132_v53  ;;  %4958 = vmatprep.subr.bf16.mxu1 %v4957_v48  ;;  %v1842_v48 = vld [vmem:[%s7496_s7 + $0x38] sm:$0xff]  ;;  %v1845_v53 = vld [vmem:[%s7496_s7 + $0x50] sm:$0xff] }
 0x26b   :  { %4960 = vmatpush1.bf16.msra.mxu1 %v4959_v49  ;;  %1239 = vmatprep.mubr.f32.mxu1 %v5487_v5  ;;  %v5062_v49 = vpack.c.bf16 %v1842_v48, %v1841_v47  ;;  %v5068_v55 = vpack.c.bf16 %v1846_v54, %v1845_v53  ;;  %v4097_v47 = vld [vmem:[%s7494_s5 + $0x118] sm:$0xff] }
 0x26c   :  { %4962 = vmatprep.subr.bf16.mxu1 %v4961_v50  ;;  %4991 = vmatpush3.bf16.msra.mxu0 %v4990_v35  ;;  %v1843_v50 = vld [vmem:[%s7496_s7 + $0x40] sm:$0xff]  ;;  %v4088_v35 = vld [vmem:[%s7494_s5 + $0xd8] sm:$0xff] }
 0x26d   :  { %4992 = vmatprep.subr.bf16.mxu0 %v5489_v18  ;;  %v5065_v52 = vpack.c.bf16 %v1844_v51, %v1843_v50  ;;  %v4099_v50 = vld [vmem:[%s7494_s5 + $0x128] sm:$0xff]  ;;  %v4101_v53 = vld [vmem:[%s7494_s5 + $0x138] sm:$0xff] }
 0x26e   :  { %4042 = vmatmul.mubr.msk.f32.gmra.mrb[2].mxu1 %vm835_vm12, %v1133_v60 }
 0x26f   :  { %4964 = vmatpush1.bf16.msra.mxu1 %v4963_v56  ;;  %1351 = vmatprep.mubr.f32.mxu1 %v5487_v5 }
 0x270   :  { %4966 = vmatprep.subr.bf16.mxu1 %v4965_v57 }
 0x273   :  { %4968 = vmatpush1.bf16.msra.mxu1 %v4967_v63  ;;  %v4071_v63 = vld [vmem:[%s7494_s5 + $0x58] sm:$0xff] }
 0x274   :  { %4970 = vmatprep.subr.bf16.mxu1 %v4969_v0  ;;  %v6302_v0 = vld [vmem:[%s7493_s4] sm:$0x1]  ;;  %v4993_v2 = vpack.c.bf16 %v4071_v63, %v4070_v62  ;;  %v4106_v62 = vld [vmem:[%s7494_s5 + $0x158] sm:$0xff] }
 0x277   :  { %4972 = vmatpush1.bf16.msra.mxu1 %v4971_v6  ;;  %v4073_v6 = vld [vmem:[%s7494_s5 + $0x68] sm:$0xff] }
 0x278   :  { %4974 = vmatprep.subr.bf16.mxu1 %v4973_v7  ;;  %v4996_v7 = vpack.c.bf16 %v4073_v6, %v4072_v4  ;;  %v4108_v4 = vld [vmem:[%s7494_s5 + $0x168] sm:$0xff] }
 0x27b   :  { %4976 = vmatpush1.bf16.msra.mxu1 %v4975_v10  ;;  %v4999_v10 = vpack.c.bf16 %v4075_v9, %v4074_v8  ;;  %v4109_v8 = vld [vmem:[%s7494_s5 + $0x170] sm:$0xff] }
 0x27c   :  { %4065 = vmatprep.subr.msk.mxu1 %vm580_vm4, %v4064_v11  ;;  %v6324_v11 = vrot.slane %v6302_v0, %v741_v21  ;;  %v4079_v21 = vld [vmem:[%s7494_s5 + $0x98] sm:$0xff] }
 0x27d   :  { %v5005_v16 = vpack.c.bf16 %v4079_v21, %v4078_v19  ;;  %v1847_v21 = vld [vmem:[%s7496_s7 + $0x60] sm:$0xff] }
 0x27f   :  { %4066 = vmatpush1.msk.msra.mxu1 %vm580_vm4, %v4063_v12  ;;  %v4076_v12 = vld [vmem:[%s7494_s5 + $0x80] sm:$0xff] }
 0x280   :  { %4067 = vmatmul.mubr.msk.f32.vlgmr.msra.gmra.mrb[0].mxu1 %vm835_vm12, %v1250_v13  ;;  %5052 = vmatprep.subr.bf16.mxu1 %v5489_v18  ;;  %v4077_v13 = vld [vmem:[%s7494_s5 + $0x88] sm:$0xff] }
 0x281   :  { %1357 = vmatprep.mubr.f32.mxu1 %v5487_v5  ;;  %5054 = vmatpush3.bf16.msra.mxu1 %v5053_v42  ;;  %v5023_v42 = vpack.c.bf16 %v4093_v41, %v4092_v40  ;;  %v1930_v41 = vld [vmem:[%s7498_s9 + $0x20] sm:$0xff] }
 0x282   :  { %5055 = vmatprep.subr.bf16.mxu1 %v5489_v18 }
 0x284   :  { %4068 = vmatmul.mubr.msk.f32.gmra.mrb[2].mxu1 %vm835_vm12, %v1251_v14  ;;  %v5002_v14 = vpack.c.bf16 %v4077_v13, %v4076_v12  ;;  %v4111_v12 = vld [vmem:[%s7494_s5 + $0x180] sm:$0xff]  ;;  %v4112_v13 = vld [vmem:[%s7494_s5 + $0x188] sm:$0xff] }
 0x285   :  { %4636 = vmatprep.mubr.msk.f32.mxu1 %vm5491_vm13, %v5487_v5  ;;  %5057 = vmatpush3.bf16.msra.mxu1 %v5056_v36  ;;  %v4094_v36 = vld [vmem:[%s7494_s5 + $0x100] sm:$0xff] }
 0x286   :  { %5058 = vmatprep.subr.bf16.mxu1 %v5489_v18  ;;  %v5026_v45 = vpack.c.bf16 %v4095_v44, %v4094_v36  ;;  %v1932_v36 = vld [vmem:[%s7498_s9 + $0x30] sm:$0xff]  ;;  %v1933_v44 = vld [vmem:[%s7498_s9 + $0x38] sm:$0xff] }
 0x289   :  { %5060 = vmatpush3.bf16.msra.mxu1 %v5059_v46  ;;  %v4096_v46 = vld [vmem:[%s7494_s5 + $0x110] sm:$0xff] }
 0x28a   :  { %5061 = vmatprep.subr.bf16.mxu1 %v5489_v18  ;;  %v5029_v48 = vpack.c.bf16 %v4097_v47, %v4096_v46  ;;  %v1934_v46 = vld [vmem:[%s7498_s9 + $0x40] sm:$0xff]  ;;  %v1935_v47 = vld [vmem:[%s7498_s9 + $0x48] sm:$0xff] }
 0x28d   :  { %5063 = vmatpush3.bf16.msra.mxu1 %v5062_v49  ;;  %v4098_v49 = vld [vmem:[%s7494_s5 + $0x120] sm:$0xff] }
 0x28e   :  { %5064 = vmatprep.subr.bf16.mxu1 %v5489_v18  ;;  %v5032_v51 = vpack.c.bf16 %v4099_v50, %v4098_v49 }
 0x291   :  { %5066 = vmatpush3.bf16.msra.mxu1 %v5065_v52  ;;  %v4100_v52 = vld [vmem:[%s7494_s5 + $0x130] sm:$0xff] }
 0x292   :  { %5067 = vmatprep.subr.bf16.mxu1 %v5489_v18  ;;  %v5035_v54 = vpack.c.bf16 %v4101_v53, %v4100_v52  ;;  %v4118_v52 = vld [vmem:[%s7490_s1 + $0x48] sm:$0xff]  ;;  %v4120_v53 = vld [vmem:[%s7490_s1 + $0x58] sm:$0xff] }
 0x295   :  { %5069 = vmatpush3.bf16.msra.mxu1 %v5068_v55  ;;  %v4103_v55 = vld [vmem:[%s7494_s5 + $0x140] sm:$0xff] }
 0x296   :  { %5070 = vmatprep.subr.bf16.mxu1 %v5489_v18 }
 0x353   :  { %v1353_v24 = vpop.f32.mrb[0].mxu1 }
 0x354   :  { %1372 = vrot.lane.b32.xlu0 %v1353_v24, %s5490_s19  ;;  %v1355_v37 = vpop.f32.mrb[1].mxu1 }
 0x355   :  { %1374 = vrot.lane.b32.xlu1 %v1355_v37, %s5490_s19  ;;  %v4089_v37 = vld [vmem:[%s7494_s5 + $0xe0] sm:$0xff] }
 0x357   :  { %v6245_v38 = vpop.f32.mrb[2].mxu1 }
 0x358   :  { %1376 = vrot.lane.b32.xlu0 %v6245_v38, %s5490_s19  ;;  %v1361_v39 = vpop.f32.mrb[3].mxu1 }
 0x359   :  { %1378 = vrot.lane.b32.xlu1 %v1361_v39, %s5490_s19  ;;  %v4090_v39 = vld [vmem:[%s7494_s5 + $0xe8] sm:$0xff] }
 0x35a   :  { %v5020_v30 = vpack.c.bf16 %v4090_v39, %v4089_v37  ;;  %v1928_v39 = vld [vmem:[%s7498_s9 + $0x10] sm:$0xff] }
 0x35c   :  { %72 = vrot.lane.b32.xlu0 %v52_v20, %s5486_s23 }
 0x35d   :  { %74 = vrot.lane.b32.xlu1 %v53_v22, %s5486_s23 }
 0x3c6   :  { %v1373_v56 = vpop.permute.xlu0 %1372 }
 0x3c7   :  { %v1375_v57 = vpop.permute.xlu1 %1374 }
 0x3c8   :  { %v1381_v58 = vsel %vm1380_vm14, %v1373_v56, %v1375_v57  ;;  %v4104_v56 = vld [vmem:[%s7494_s5 + $0x148] sm:$0xff] }
 0x3c9   :  { %v1385_v59 = vmax.f32 %v1353_v24, %v1381_v58  ;;  %v5017_v24 = vpack.c.bf16 %v4088_v35, %v4087_v34 }
 0x3ca   :  { %v1377_v57 = vpop.permute.xlu0 %1376 }
 0x3cb   :  { %v1389_v60 = vrot.slane %v1385_v59, 1  ;;  %v1379_v58 = vpop.permute.xlu1 %1378 }
 0x3cc   :  { %v1382_v63 = vsel %vm1380_vm14, %v1377_v57, %v1379_v58 }
 0x3cd   :  { %v1391_v61 = vmax.f32 %v1385_v59, %v1389_v60  ;;  %v5038_v59 = vpack.c.bf16 %v4104_v56, %v4103_v55 }
 0x3ce   :  { %v73_v26 = vpop.permute.xlu0 %72 }
 0x3cf   :  { %v1392_v1 = vadd.f32 %v1391_v61, %v6302_v0  ;;  %v1485_v15 = vadd.f32 %v6324_v11, %v1391_v61  ;;  %v4105_v61 = vld [vmem:[%s7494_s5 + $0x150] sm:$0xff]  ;;  %94 = vst.msk [vmem:[#allocation2 + $0x22] sm:$0xff] %vm88_vm1, %v73_v26  ;;  %v75_v27 = vpop.permute.xlu1 %74  ;;  %v2026_v26 = vld [vmem:[%s7490_s1 + $0x28] sm:$0xff] }
 0x3d0   :  { %95 = vst.msk [vmem:[#allocation2 + $0x2a] sm:$0xff] %vm88_vm1, %v75_v27  ;;  %v2028_v27 = vld [vmem:[%s7490_s1 + $0x38] sm:$0xff] }
 0x3d1   :  { %v1393_v3 = vmax.f32 %v1392_v1, 0.0  ;;  %v6341_v17 = vmax.f32 %v1485_v15, 0.0  ;;  %v5041_v1 = vpack.c.bf16 %v4106_v62, %v4105_v61 }
 0x3d3   :  { %4512 = vmatmul.mubr.msk.f32.vlgmr.msra.gmra.mrb[8].mxu0 %vm7501_vm15, %v1393_v3  ;;  %v1499_v25 = vrot.slane %v6341_v17, 2  ;;  %v1584_v43 = vrot.slane %v6341_v17, 4  ;;  %v1669_v60 = vrot.slane %v6341_v17, 6  ;;  %v4107_v3 = vld [vmem:[%s7494_s5 + $0x160] sm:$0xff] }
 0x3d4   :  { %4994 = vmatpush3.bf16.msra.mxu0 %v4993_v2  ;;  %4534 = vmatprep.mubr.msk.f32.mxu0 %vm5491_vm13, %v5487_v5  ;;  %v1386_v2 = vmax.f32 %v6245_v38, %v1382_v63  ;;  %v5044_v6 = vpack.c.bf16 %v4108_v4, %v4107_v3  ;;  %v4110_v38 = vld [vmem:[%s7494_s5 + $0x178] sm:$0xff]  ;;  %v1850_v3 = vld [vmem:[%s7497_s8] sm:$0x1] }
 0x3d5   :  { %4995 = vmatprep.subr.bf16.mxu0 %v5489_v18  ;;  %v5047_v9 = vpack.c.bf16 %v4110_v38, %v4109_v8  ;;  %v4117_v4 = vld [vmem:[%s7490_s1 + $0x40] sm:$0xff]  ;;  %v4122_v8 = vld [vmem:[%s7490_s1 + $0x68] sm:$0xff]  ;;  %v4124_v38 = vld [vmem:[%s7490_s1 + $0x78] sm:$0xff] }
 0x3d6   :  { %v6548_v55 = vld [vmem:[#allocation2 + $0x20] sm:$0xff] }
 0x3d7   :  { %v6550_v56 = vld [vmem:[#allocation2 + $0x28] sm:$0xff] }
 0x3d8   :  { %4997 = vmatpush3.bf16.msra.mxu0 %v4996_v7  ;;  %v1744_v7 = vrot.slane %v1386_v2, 1  ;;  %v2042_v20 = vrot.slane %v6550_v56, 1 }
 0x3d9   :  { %4998 = vmatprep.subr.bf16.mxu0 %v5489_v18 }
 0x3dc   :  { %5000 = vmatpush3.bf16.msra.mxu0 %v4999_v10  ;;  %v1746_v10 = vmax.f32 %v1386_v2, %v1744_v7 }
 0x3dd   :  { %5001 = vmatprep.subr.bf16.mxu0 %v5489_v18 }
 0x3de   :  { %v1747_v15 = vadd.f32 %v1746_v10, %v6302_v0  ;;  %v1849_v0 = vld [vmem:[%s7496_s7 + $0x70] sm:$0xff] }
 0x3e0   :  { %5003 = vmatpush3.bf16.msra.mxu0 %v5002_v14  ;;  %v5050_v14 = vpack.c.bf16 %v4112_v13, %v4111_v12  ;;  %v1748_v19 = vmax.f32 %v1747_v15, 0.0  ;;  %v4121_v15 = vld [vmem:[%s7490_s1 + $0x60] sm:$0xff] }
 0x3e1   :  { %5004 = vmatprep.subr.bf16.mxu0 %v5489_v18 }
 0x3e4   :  { %5006 = vmatpush3.bf16.msra.mxu0 %v5005_v16  ;;  %v1848_v16 = vld [vmem:[%s7496_s7 + $0x68] sm:$0xff] }
 0x3e5   :  { %5007 = vmatprep.subr.bf16.mxu0 %v5489_v18  ;;  %v5071_v17 = vpack.c.bf16 %v1848_v16, %v1847_v21  ;;  %v2022_v21 = vld [vmem:[%s7490_s1 + $0x8] sm:$0xff]  ;;  %v2024_v16 = vld [vmem:[%s7490_s1 + $0x18] sm:$0xff] }
 0x3e6   :  { %v5096_v22 = vpack.c.bf16 %v2024_v16, %v2022_v21 }
 0x3e7   :  { %4535 = vmatmul.mubr.msk.f32.vlgmr.msra.gmra.mrb[8].mxu0 %vm7501_vm15, %v1499_v25  ;;  %5072 = vmatpush3.bf16.msra.mxu1 %v5071_v17  ;;  %v55_v25 = vld [vmem:[%s7489_s0 + $0x38] sm:$0xf] }
 0x3e8   :  { %5009 = vmatpush3.bf16.msra.mxu0 %v5008_v23  ;;  %4557 = vmatprep.mubr.msk.f32.mxu0 %vm5491_vm13, %v5487_v5  ;;  %v54_v23 = vld [vmem:[%s7489_s0 + $0x30] sm:$0xff] }
 0x3e9   :  { %5010 = vmatprep.subr.bf16.mxu0 %v5489_v18  ;;  %4634 = vmatprep.subr.mxu1 %v5487_v5 }
 0x3ea   :  { %76 = vrot.lane.b32.xlu0 %v54_v23, %s5486_s23  ;;  %78 = vrot.lane.b32.xlu1 %v55_v25, %s5486_s23  ;;  %v2021_v23 = vld [vmem:[%s7490_s1] sm:$0xff]  ;;  %v2023_v25 = vld [vmem:[%s7490_s1 + $0x10] sm:$0xff]  ;;  %s5492_s23 = smov [#allocation4]  }
 0x3eb   :  { %4635 = vmatpush3.msra.mxu1 %v1849_v0  ;;  %v2041_v0 = vrot.slane %v6548_v55, 1  ;;  %s3901_s16 = sshll.u32 %s5492_s23, 4  ;;  %s3902_s16 = int_to_ptr.vmem [resolvable:$true] %s3901_s16 }
 0x3ec   :  { %5012 = vmatpush3.bf16.msra.mxu0 %v5011_v31  ;;  %5073 = vmatprep.subr.bf16.mxu1 %v5489_v18  ;;  %v1387_v31 = vld [vmem:[%s7495_s6] sm:$0x1]  ;;  %p5467_p1 = scmp.lt.s32.totalorder %s3902_s16, %s3902_s16 }
 0x3ed   :  { %5013 = vmatprep.subr.bf16.mxu0 %v5489_v18 }
 0x3f0   :  { %5015 = vmatpush3.bf16.msra.mxu0 %v5014_v33 }
 0x3f1   :  { %5016 = vmatprep.subr.bf16.mxu0 %v5489_v18 }
 0x3f4   :  { %5018 = vmatpush3.bf16.msra.mxu0 %v5017_v24  ;;  %v5074_v24 = vpack.c.bf16 %v1927_v29, %v1926_v32  ;;  %v5098_v32 = vpack.c.bf16 %v2023_v25, %v2021_v23  ;;  %v5100_v29 = vpack.c.bf16 %v2028_v27, %v2026_v26  ;;  %v4162_v23 = vld [vmem:[%s7490_s1 + $0x128] sm:$0xff]  ;;  %v4164_v25 = vld [vmem:[%s7490_s1 + $0x138] sm:$0xff] }
 0x3f5   :  { %5019 = vmatprep.subr.bf16.mxu0 %v5489_v18  ;;  %v5124_v27 = vpack.c.bf16 %v4164_v25, %v4162_v23 }
 0x3f8   :  { %5021 = vmatpush3.bf16.msra.mxu0 %v5020_v30  ;;  %v1929_v30 = vld [vmem:[%s7498_s9 + $0x18] sm:$0xff] }
 0x3f9   :  { %5022 = vmatprep.subr.bf16.mxu0 %v5489_v18  ;;  %v5077_v40 = vpack.c.bf16 %v1929_v30, %v1928_v39 }
 0x3fb   :  { %4558 = vmatmul.mubr.msk.f32.vlgmr.msra.gmra.mrb[8].mxu0 %vm7501_vm15, %v1584_v43 }
 0x3fc   :  { %5024 = vmatpush3.bf16.msra.mxu0 %v5023_v42  ;;  %4580 = vmatprep.mubr.msk.f32.mxu0 %vm5491_vm13, %v5487_v5  ;;  %v1931_v42 = vld [vmem:[%s7498_s9 + $0x28] sm:$0xff] }
 0x3fd   :  { %5025 = vmatprep.subr.bf16.mxu0 %v5489_v18  ;;  %v5080_v43 = vpack.c.bf16 %v1931_v42, %v1930_v41 }
 0x400   :  { %5027 = vmatpush3.bf16.msra.mxu0 %v5026_v45  ;;  %v5083_v45 = vpack.c.bf16 %v1933_v44, %v1932_v36  ;;  %v4135_v36 = vld [vmem:[%s7490_s1 + $0x90] sm:$0xff]  ;;  %v4138_v44 = vld [vmem:[%s7490_s1 + $0xa8] sm:$0xff] }
 0x401   :  { %5028 = vmatprep.subr.bf16.mxu0 %v5489_v18 }
 0x404   :  { %5030 = vmatpush3.bf16.msra.mxu0 %v5029_v48  ;;  %v5086_v48 = vpack.c.bf16 %v1935_v47, %v1934_v46 }
 0x405   :  { %5031 = vmatprep.subr.bf16.mxu0 %v5489_v18 }
 0x408   :  { %5033 = vmatpush3.bf16.msra.mxu0 %v5032_v51  ;;  %v1936_v51 = vld [vmem:[%s7498_s9 + $0x50] sm:$0xf] }
 0x409   :  { %5034 = vmatprep.subr.bf16.mxu0 %v5489_v18 }
 0x40c   :  { %5036 = vmatpush3.bf16.msra.mxu0 %v5035_v54  ;;  %v5088_v54 = vpack.c.bf16 %v4120_v53, %v4118_v52 }
 0x40d   :  { %5037 = vmatprep.subr.bf16.mxu0 %v5489_v18 }
 0x40f   :  { %4581 = vmatmul.mubr.msk.f32.vlgmr.msra.gmra.mrb[8].mxu0 %vm7501_vm15, %v1669_v60  ;;  %v2491_v60 = vrot.slane %v6550_v56, 4 }
 0x410   :  { %5039 = vmatpush3.bf16.msra.mxu0 %v5038_v59  ;;  %4603 = vmatprep.mubr.msk.f32.mxu0 %vm5491_vm13, %v5487_v5  ;;  %v2490_v59 = vrot.slane %v6548_v55, 4 }
 0x411   :  { %5040 = vmatprep.subr.bf16.mxu0 %v5489_v18 }
 0x412   :  { %v6561_v63 = vsel %vm580_vm4, %v2490_v59, %v2491_v60  ;;  %v4147_v59 = vld [vmem:[%s7490_s1 + $0xd0] sm:$0xff] }
 0x414   :  { %5042 = vmatpush3.bf16.msra.mxu0 %v5041_v1 }
 0x415   :  { %5043 = vmatprep.subr.bf16.mxu0 %v5489_v18 }
 0x418   :  { %5045 = vmatpush3.bf16.msra.mxu0 %v5044_v6  ;;  %v4119_v6 = vld [vmem:[%s7490_s1 + $0x50] sm:$0xff] }
 0x419   :  { %5046 = vmatprep.subr.bf16.mxu0 %v5489_v18  ;;  %v5090_v12 = vpack.c.bf16 %v4119_v6, %v4117_v4  ;;  %v4152_v4 = vld [vmem:[%s7490_s1 + $0xf8] sm:$0xff] }
 0x41c   :  { %5048 = vmatpush3.bf16.msra.mxu0 %v5047_v9 }
 0x41d   :  { %5049 = vmatprep.subr.bf16.mxu0 %v5489_v18 }
 0x420   :  { %5051 = vmatpush3.bf16.msra.mxu0 %v5050_v14  ;;  %v5092_v14 = vpack.c.bf16 %v4124_v38, %v4122_v8  ;;  %v4149_v8 = vld [vmem:[%s7490_s1 + $0xe0] sm:$0xff]  ;;  %v4151_v38 = vld [vmem:[%s7490_s1 + $0xf0] sm:$0xff] }
 0x423   :  { %4604 = vmatmul.mubr.msk.f32.vlgmr.msra.gmra.mrb[8].mxu0 %vm7501_vm15, %v1748_v19  ;;  %vm1851_vm15 = vcmask 982016   ;;  %v4123_v19 = vld [vmem:[%s7490_s1 + $0x70] sm:$0xff] }
 0x424   :  { %2808 = vmatprep.mubr.f32.mxu0 %v5487_v5  ;;  %v5094_v17 = vpack.c.bf16 %v4123_v19, %v4121_v15 }
 0x45c   :  { %v77_v49 = vpop.permute.xlu0 %76  ;;  %v79_v50 = vpop.permute.xlu1 %78 }
 0x45d   :  { %96 = vst.msk [vmem:[#allocation2 + $0x32] sm:$0xff] %vm88_vm1, %v77_v49  ;;  %v4139_v49 = vld [vmem:[%s7490_s1 + $0xb0] sm:$0xff]  ;;  %vm2014_vm1 = vcmask 73728  }
 0x45e   :  { %97 = vst.msk [vmem:[#allocation2 + $0x3a] sm:$0xf] %vm92_vm2, %v79_v50  ;;  %v4146_v50 = vld [vmem:[%s7490_s1 + $0xc8] sm:$0xff] }
 0x464   :  { %v6552_v57 = vld [vmem:[#allocation2 + $0x30] sm:$0xff] }
 0x465   :  { %v6554_v58 = vld [vmem:[#allocation2 + $0x38] sm:$0xff]  ;;  %v2493_v61 = vrot.slane %v6552_v57, 4 }
 0x466   :  { %v2495_v62 = vrot.slane %v6554_v58, 4  ;;  %v2046_v41 = vrot.slane %v6554_v58, 1  ;;  %v2255_v21 = vrot.slane %v6554_v58, 2 }
 0x467   :  { %v6564_v1 = vsel %vm580_vm4, %v2491_v60, %v2493_v61  ;;  %v2250_v60 = vrot.slane %v6548_v55, 2 }
 0x468   :  { %v6569_v2 = vsel %vm580_vm4, %v2493_v61, %v2495_v62  ;;  %v2251_v61 = vrot.slane %v6550_v56, 2 }
 0x4f6   :  { %v1829_v33 = vpop.f32.mrb[8].mxu0 }
 0x4f7   :  { %v5339_v34 = vadd.f32 %v1829_v33, %v1387_v31  ;;  %v4605_v35 = vpop.f32.mrb[9].mxu0  ;;  %v2043_v31 = vsel %vm125_vm3, %v2041_v0, %v2042_v20  ;;  %v2025_v33 = vld [vmem:[%s7490_s1 + $0x20] sm:$0xff]  ;;  %v4159_v0 = vld [vmem:[%s7490_s1 + $0x110] sm:$0xff] }
 0x4f8   :  { %v2044_v35 = vrot.slane %v6552_v57, 1 }
 0x4f9   :  { %v1834_v37 = vmax.f32 %v5339_v34, 0.0  ;;  %v2027_v34 = vld [vmem:[%s7490_s1 + $0x30] sm:$0xff] }
 0x4fa   :  { %v5102_v39 = vpack.c.bf16 %v2027_v34, %v2025_v33  ;;  %v2047_v42 = vsel %vm125_vm3, %v2044_v35, %v2046_v41  ;;  %v2375_v34 = vrot.slane %v6554_v58, 3 }
 0x4fb   :  { %4637 = vmatmul.mubr.msk.f32.vlgmr.msra.gmra.mrb[4].mxu1 %vm1851_vm15, %v1834_v37  ;;  %v4136_v37 = vld [vmem:[%s7490_s1 + $0x98] sm:$0xff] }
 0x4fc   :  { %5075 = vmatpush3.bf16.msra.mxu1 %v5074_v24  ;;  %4661 = vmatprep.mubr.msk.f32.mxu1 %vm5491_vm13, %v5487_v5  ;;  %v4134_v24 = vld [vmem:[%s7490_s1 + $0x88] sm:$0xff] }
 0x4fd   :  { %5076 = vmatprep.subr.bf16.mxu1 %v5489_v18  ;;  %v5104_v30 = vpack.c.bf16 %v4136_v37, %v4134_v24  ;;  %v4169_v37 = vld [vmem:[%s7492_s3 + $0xb0] sm:$0xff] }
 0x500   :  { %5078 = vmatpush3.bf16.msra.mxu1 %v5077_v40  ;;  %v2045_v40 = vsel %vm125_vm3, %v2042_v20, %v2044_v35  ;;  %v2370_v20 = vrot.slane %v6548_v55, 3 }
 0x501   :  { %5079 = vmatprep.subr.bf16.mxu1 %v5489_v18 }
 0x504   :  { %5081 = vmatpush3.bf16.msra.mxu1 %v5080_v43  ;;  %v4133_v43 = vld [vmem:[%s7490_s1 + $0x80] sm:$0xff] }
 0x505   :  { %5082 = vmatprep.subr.bf16.mxu1 %v5489_v18  ;;  %v5106_v46 = vpack.c.bf16 %v4135_v36, %v4133_v43  ;;  %v4173_v43 = vld [vmem:[%s7492_s3 + $0xd0] sm:$0xff]  ;;  %v4175_v36 = vld [vmem:[%s7492_s3 + $0xe0] sm:$0xff] }
 0x508   :  { %5084 = vmatpush3.bf16.msra.mxu1 %v5083_v45  ;;  %v4140_v45 = vld [vmem:[%s7490_s1 + $0xb8] sm:$0xff] }
 0x509   :  { %5085 = vmatprep.subr.bf16.mxu1 %v5489_v18  ;;  %v5108_v47 = vpack.c.bf16 %v4140_v45, %v4138_v44  ;;  %v5134_v44 = vpack.c.bf16 %v4175_v36, %v4173_v43  ;;  %v4178_v45 = vld [vmem:[%s7492_s3 + $0xf8] sm:$0xff] }
 0x50c   :  { %5087 = vmatpush3.bf16.msra.mxu1 %v5086_v48  ;;  %v4137_v48 = vld [vmem:[%s7490_s1 + $0xa0] sm:$0xff] }
 0x50d   :  { %4659 = vmatprep.subr.mxu1 %v5487_v5  ;;  %v5110_v52 = vpack.c.bf16 %v4139_v49, %v4137_v48  ;;  %v4177_v49 = vld [vmem:[%s7492_s3 + $0xf0] sm:$0xff] }
 0x510   :  { %4660 = vmatpush3.msk.msra.mxu1 %vm580_vm4, %v1936_v51  ;;  %v4148_v51 = vld [vmem:[%s7490_s1 + $0xd8] sm:$0xff] }
 0x511   :  { %5089 = vmatprep.subr.bf16.mxu1 %v5088_v54  ;;  %v5112_v53 = vpack.c.bf16 %v4148_v51, %v4146_v50  ;;  %v4145_v54 = vld [vmem:[%s7490_s1 + $0xc0] sm:$0xff] }
 0x512   :  { %v5114_v6 = vpack.c.bf16 %v4147_v59, %v4145_v54  ;;  %v4179_v50 = vld [vmem:[%s7492_s3 + $0x100] sm:$0xff]  ;;  %v4184_v54 = vld [vmem:[%s7492_s3 + $0x128] sm:$0xff] }
 0x5ce   :  { %v1921_v7 = vpop.f32.mrb[4].mxu1 }
 0x5cf   :  { %v1922_v9 = vadd.f32 %v1921_v7, %v1850_v3  ;;  %v4638_v10 = vpop.f32.mrb[5].mxu1  ;;  %v4150_v3 = vld [vmem:[%s7490_s1 + $0xe8] sm:$0xff] }
 0x5d0   :  { %v5116_v7 = vpack.c.bf16 %v4152_v4, %v4150_v3  ;;  %v2253_v10 = vrot.slane %v6552_v57, 2  ;;  %v4183_v3 = vld [vmem:[%s7492_s3 + $0x120] sm:$0xff] }
 0x5d1   :  { %v1925_v13 = vmax.f32 %v1922_v9, 0.0  ;;  %v2252_v9 = vsel %vm336_vm5, %v2250_v60, %v2251_v61 }
 0x5d2   :  { %v2254_v19 = vsel %vm336_vm5, %v2251_v61, %v2253_v10  ;;  %v2256_v16 = vsel %vm336_vm5, %v2253_v10, %v2255_v21  ;;  %v4181_v61 = vld [vmem:[%s7492_s3 + $0x110] sm:$0xff] }
 0x5d3   :  { %4662 = vmatmul.mubr.msk.f32.vlgmr.msra.gmra.mrb[6].mxu1 %vm835_vm12, %v1925_v13  ;;  %v4160_v13 = vld [vmem:[%s7490_s1 + $0x118] sm:$0xff]  ;;  %v4185_v10 = vld [vmem:[%s7492_s3 + $0x130] sm:$0xff] }
 0x5d4   :  { %5091 = vmatpush1.bf16.msra.mxu1 %v5090_v12  ;;  %2120 = vmatprep.mubr.f32.mxu1 %v5487_v5  ;;  %v4158_v12 = vld [vmem:[%s7490_s1 + $0x108] sm:$0xff] }
 0x5d5   :  { %5093 = vmatprep.subr.bf16.mxu1 %v5092_v14  ;;  %v5118_v14 = vpack.c.bf16 %v4151_v38, %v4149_v8  ;;  %v5120_v15 = vpack.c.bf16 %v4160_v13, %v4158_v12  ;;  %v4188_v8 = vld [vmem:[%s7492_s3 + $0x148] sm:$0xff]  ;;  %v4187_v12 = vld [vmem:[%s7492_s3 + $0x140] sm:$0xff] }
 0x5d8   :  { %5095 = vmatpush1.bf16.msra.mxu1 %v5094_v17  ;;  %v4157_v17 = vld [vmem:[%s7490_s1 + $0x100] sm:$0xff] }
 0x5d9   :  { %5097 = vmatprep.subr.bf16.mxu1 %v5096_v22  ;;  %v2371_v22 = vrot.slane %v6550_v56, 3  ;;  %v5122_v26 = vpack.c.bf16 %v4159_v0, %v4157_v17  ;;  %v2689_v0 = vld [vmem:[%s7492_s3 + $0x18] sm:$0xff] }
 0x5db   :  { %4125 = vmatmul.mubr.msk.f32.vlgmr.msra.gmra.mrb[8].mxu1 %vm39_vm0, %v2043_v31  ;;  %v2372_v31 = vsel %vm458_vm6, %v2370_v20, %v2371_v22 }
 0x5dc   :  { %5099 = vmatpush1.bf16.msra.mxu1 %v5098_v32  ;;  %2126 = vmatprep.mubr.f32.mxu1 %v5487_v5  ;;  %v2373_v32 = vrot.slane %v6552_v57, 3 }
 0x5dd   :  { %5101 = vmatprep.subr.bf16.mxu1 %v5100_v29 }
 0x5de   :  { %v2374_v33 = vsel %vm458_vm6, %v2371_v22, %v2373_v32 }
 0x5df   :  { %4126 = vmatmul.mubr.msk.f32.gmra.mrb[10].mxu1 %vm39_vm0, %v2045_v40  ;;  %v4174_v40 = vld [vmem:[%s7492_s3 + $0xd8] sm:$0xff] }
 0x5e0   :  { %2132 = vmatprep.mubr.f32.mxu1 %v5487_v5  ;;  %5103 = vmatpush1.bf16.msra.mxu1 %v5102_v39  ;;  %v4171_v39 = vld [vmem:[%s7492_s3 + $0xc0] sm:$0xff] }
 0x5e1   :  { %5105 = vmatprep.subr.bf16.mxu1 %v5104_v30  ;;  %v5130_v30 = vpack.c.bf16 %v4171_v39, %v4169_v37 }
 0x5e3   :  { %4127 = vmatmul.mubr.msk.f32.gmra.mrb[12].mxu1 %vm39_vm0, %v2047_v42 }
 0x5e4   :  { %2138 = vmatprep.mubr.f32.mxu1 %v5487_v5 }
 0x5e7   :  { %4128 = vmatmul.mubr.msk.f32.gmra.mrb[14].mxu1 %vm39_vm0, %v2046_v41  ;;  %v4176_v41 = vld [vmem:[%s7492_s3 + $0xe8] sm:$0xff] }
 0x5e8   :  { %2217 = vmatprep.mubr.f32.mxu1 %v5487_v5  ;;  %v5132_v42 = vpack.c.bf16 %v4176_v41, %v4174_v40 }
 0x5eb   :  { %4129 = vmatmul.mubr.msk.f32.vlgmr.msra.gmra.mrb[8].mxu1 %vm39_vm0, %v6548_v55  ;;  %v4161_v55 = vld [vmem:[%s7490_s1 + $0x120] sm:$0xff] }
 0x5ec   :  { %5107 = vmatpush1.bf16.msra.mxu1 %v5106_v46  ;;  %2223 = vmatprep.mubr.f32.mxu1 %v5487_v5  ;;  %v4180_v46 = vld [vmem:[%s7492_s3 + $0x108] sm:$0xff] }
 0x5ed   :  { %5109 = vmatprep.subr.bf16.mxu1 %v5108_v47  ;;  %v5136_v48 = vpack.c.bf16 %v4180_v46, %v4178_v45 }
 0x5ef   :  { %4130 = vmatmul.mubr.msk.f32.gmra.mrb[10].mxu1 %vm39_vm0, %v6550_v56  ;;  %v4163_v56 = vld [vmem:[%s7490_s1 + $0x130] sm:$0xff] }
 0x5f0   :  { %2229 = vmatprep.mubr.f32.mxu1 %v5487_v5  ;;  %5111 = vmatpush1.bf16.msra.mxu1 %v5110_v52  ;;  %v5126_v29 = vpack.c.bf16 %v4163_v56, %v4161_v55  ;;  %v5138_v52 = vpack.c.bf16 %v4179_v50, %v4177_v49 }
 0x5f1   :  { %5113 = vmatprep.subr.bf16.mxu1 %v5112_v53  ;;  %v4182_v53 = vld [vmem:[%s7492_s3 + $0x118] sm:$0xff] }
 0x5f2   :  { %v5140_v60 = vpack.c.bf16 %v4184_v54, %v4182_v53 }
 0x5f3   :  { %4131 = vmatmul.mubr.msk.f32.gmra.mrb[12].mxu1 %vm39_vm0, %v6552_v57  ;;  %v2376_v57 = vsel %vm458_vm6, %v2373_v32, %v2375_v34 }
 0x5f4   :  { %2235 = vmatprep.mubr.f32.mxu1 %v5487_v5 }
 0x5f7   :  { %4132 = vmatmul.mubr.msk.f32.gmra.mrb[14].mxu1 %vm39_vm0, %v6554_v58  ;;  %v4172_v58 = vld [vmem:[%s7492_s3 + $0xc8] sm:$0xff] }
 0x5f8   :  { %2329 = vmatprep.mubr.f32.mxu1 %v5487_v5 }
 0x5fb   :  { %4141 = vmatmul.mubr.msk.f32.vlgmr.msra.gmra.mrb[8].mxu1 %vm39_vm0, %v2252_v9 }
 0x5fc   :  { %5115 = vmatpush1.bf16.msra.mxu1 %v5114_v6  ;;  %2335 = vmatprep.mubr.f32.mxu1 %v5487_v5  ;;  %v5142_v6 = vpack.c.bf16 %v4183_v3, %v4181_v61  ;;  %v2686_v61 = vld [vmem:[%s7492_s3] sm:$0xff]  ;;  %v2688_v3 = vld [vmem:[%s7492_s3 + $0x10] sm:$0xff] }
 0x5fd   :  { %5117 = vmatprep.subr.bf16.mxu1 %v5116_v7  ;;  %v4186_v7 = vld [vmem:[%s7492_s3 + $0x138] sm:$0xff] }
 0x5fe   :  { %v5144_v9 = vpack.c.bf16 %v4188_v8, %v4186_v7  ;;  %v2690_v8 = vld [vmem:[%s7492_s3 + $0x20] sm:$0xff] }
 0x5ff   :  { %4142 = vmatmul.mubr.msk.f32.gmra.mrb[10].mxu1 %vm39_vm0, %v2254_v19  ;;  %v4190_v19 = vld [vmem:[%s7492_s3 + $0x158] sm:$0xf] }
 0x600   :  { %2341 = vmatprep.mubr.f32.mxu1 %v5487_v5  ;;  %5119 = vmatpush1.bf16.msra.mxu1 %v5118_v14  ;;  %v5146_v14 = vpack.c.bf16 %v4187_v12, %v4185_v10  ;;  %v2695_v10 = vld [vmem:[%s7492_s3 + $0x48] sm:$0xff]  ;;  %v2697_v12 = vld [vmem:[%s7492_s3 + $0x58] sm:$0xff] }
 0x601   :  { %5121 = vmatprep.subr.bf16.mxu1 %v5120_v15 }
 0x603   :  { %4143 = vmatmul.mubr.msk.f32.gmra.mrb[12].mxu1 %vm39_vm0, %v2256_v16  ;;  %v2687_v16 = vld [vmem:[%s7492_s3 + $0x8] sm:$0xff] }
 0x604   :  { %2347 = vmatprep.mubr.f32.mxu1 %v5487_v5  ;;  %v5148_v20 = vpack.c.bf16 %v2689_v0, %v2687_v16  ;;  %v2699_v16 = vld [vmem:[%s7492_s3 + $0x68] sm:$0xff] }
 0x607   :  { %4144 = vmatmul.mubr.msk.f32.gmra.mrb[14].mxu1 %vm39_vm0, %v2255_v21  ;;  %v4189_v21 = vld [vmem:[%s7492_s3 + $0x150] sm:$0xf] }
 0x608   :  { %2449 = vmatprep.mubr.f32.mxu1 %v5487_v5 }
 0x60b   :  { %4153 = vmatmul.mubr.msk.f32.vlgmr.msra.gmra.mrb[8].mxu1 %vm39_vm0, %v2372_v31 }
 0x60c   :  { %5123 = vmatpush1.bf16.msra.mxu1 %v5122_v26  ;;  %2455 = vmatprep.mubr.f32.mxu1 %v5487_v5 }
 0x60d   :  { %5125 = vmatprep.subr.bf16.mxu1 %v5124_v27 }
 0x60f   :  { %4154 = vmatmul.mubr.msk.f32.gmra.mrb[10].mxu1 %vm39_vm0, %v2374_v33 }
 0x610   :  { %2461 = vmatprep.mubr.f32.mxu1 %v5487_v5  ;;  %5127 = vmatpush1.bf16.msra.mxu1 %v5126_v29 }
 0x611   :  { %5228 = vmatprep.subr.bf16.mxu1 %v5489_v18 }
 0x613   :  { %4155 = vmatmul.mubr.msk.f32.gmra.mrb[12].mxu1 %vm39_vm0, %v2376_v57 }
 0x614   :  { %2467 = vmatprep.mubr.f32.mxu1 %v5487_v5 }
 0x617   :  { %4156 = vmatmul.mubr.msk.f32.gmra.mrb[14].mxu1 %vm39_vm0, %v2375_v34  ;;  %v5460_v34 = vld [vmem:[%s7491_s2] sm:$0x1] }
 0x618   :  { %2569 = vmatprep.mubr.f32.mxu1 %v5487_v5 }
 0x61b   :  { %4165 = vmatmul.mubr.msk.f32.vlgmr.msra.gmra.mrb[8].mxu1 %vm39_vm0, %v6561_v63  ;;  %v1937_v63 = vld [vmem:[%s7499_s10] sm:$0x1] }
 0x61c   :  { %2575 = vmatprep.mubr.f32.mxu1 %v5487_v5 }
 0x61f   :  { %4166 = vmatmul.mubr.msk.f32.gmra.mrb[10].mxu1 %vm39_vm0, %v6564_v1 }
 0x620   :  { %2581 = vmatprep.mubr.f32.mxu1 %v5487_v5 }
 0x623   :  { %4167 = vmatmul.mubr.msk.f32.gmra.mrb[12].mxu1 %vm39_vm0, %v6569_v2  ;;  %v4170_v2 = vld [vmem:[%s7492_s3 + $0xb8] sm:$0xff] }
 0x624   :  { %2587 = vmatprep.mubr.f32.mxu1 %v5487_v5 }
 0x627   :  { %4168 = vmatmul.mubr.msk.f32.gmra.mrb[14].mxu1 %vm39_vm0, %v2495_v62  ;;  %v5128_v62 = vpack.c.bf16 %v4172_v58, %v4170_v2  ;;  %vm7502_vm0 = vcmask 654336  }
 0x628   :  { %4684 = vmatprep.mubr.msk.f32.mxu1 %vm5491_vm13, %v5487_v5  ;;  %vm7503_vm2 = vmmov %vm7502_vm0 }
 0x629   :  { %5129 = vmatprep.subr.bf16.mxu0 %v5128_v62  ;;  %vm7504_vm3 = vmmov %vm7502_vm0 }
 0x62a   :  { %5131 = vmatpush1.bf16.msra.mxu0 %v5130_v30  ;;  %vm7505_vm5 = vmmov %vm7502_vm0 }
 0x62b   :  { %5133 = vmatprep.subr.bf16.mxu0 %v5132_v42  ;;  %vm7506_vm6 = vmmov %vm7502_vm0 }
 0x62e   :  { %5135 = vmatpush1.bf16.msra.mxu0 %v5134_v44 }
 0x62f   :  { %5137 = vmatprep.subr.bf16.mxu0 %v5136_v48 }
 0x632   :  { %5139 = vmatpush1.bf16.msra.mxu0 %v5138_v52 }
 0x633   :  { %5141 = vmatprep.subr.bf16.mxu0 %v5140_v60 }
 0x636   :  { %5143 = vmatpush1.bf16.msra.mxu0 %v5142_v6  ;;  %v2693_v6 = vld [vmem:[%s7492_s3 + $0x38] sm:$0xff] }
 0x637   :  { %5145 = vmatprep.subr.bf16.mxu0 %v5144_v9 }
 0x63a   :  { %5147 = vmatpush1.bf16.msra.mxu0 %v5146_v14  ;;  %v5156_v14 = vpack.c.bf16 %v2697_v12, %v2695_v10  ;;  %v4219_v10 = vld [vmem:[%s7492_s3 + $0x200] sm:$0xf] }
 0x63b   :  { %4191 = vmatprep.subr.msk.mxu0 %vm580_vm4, %v4190_v19  ;;  %v2696_v19 = vld [vmem:[%s7492_s3 + $0x50] sm:$0xff] }
 0x63e   :  { %4192 = vmatpush1.msk.msra.mxu0 %vm580_vm4, %v4189_v21 }
 0x63f   :  { %5149 = vmatprep.subr.bf16.mxu0 %v5148_v20 }
 0x6a6   :  { %v2010_v35 = vpop.f32.mrb[6].mxu1 }
 0x6a7   :  { %v2011_v1 = vadd.f32 %v2010_v35, %v1937_v63  ;;  %v4663_v24 = vpop.f32.mrb[7].mxu1 }
 0x6a9   :  { %2015 = vst.msk [vmem:[#allocation4] sm:$0x1] %vm2014_vm1, %v2011_v1 }
 0x6ee   :  { %v2571_v47 = vpop.f32.mrb[8].mxu1 }
 0x6ef   :  { %2610 = vrot.lane.b32.xlu0 %v2571_v47, %s5488_s13  ;;  %v2573_v51 = vpop.f32.mrb[9].mxu1 }
 0x6f0   :  { %2612 = vrot.lane.b32.xlu1 %v2573_v51, %s5488_s13 }
 0x6f2   :  { %v2577_v59 = vpop.f32.mrb[10].mxu1 }
 0x6f3   :  { %2614 = vrot.lane.b32.xlu0 %v2577_v59, %s5488_s13  ;;  %v2579_v4 = vpop.f32.mrb[11].mxu1 }
 0x6f4   :  { %2616 = vrot.lane.b32.xlu1 %v2579_v4, %s5488_s13  ;;  %v2691_v4 = vld [vmem:[%s7492_s3 + $0x28] sm:$0xff] }
 0x6f5   :  { %v5152_v7 = vpack.c.bf16 %v2693_v6, %v2691_v4  ;;  %v4220_v4 = vld [vmem:[%s7492_s3 + $0x208] sm:$0xf]  ;;  %v4226_v6 = vld [vmem:[%s7492_s3 + $0x218] sm:$0xff] }
 0x6f6   :  { %v2583_v38 = vpop.f32.mrb[12].mxu1 }
 0x6f7   :  { %2618 = vrot.lane.b32.xlu0 %v2583_v38, %s5488_s13  ;;  %v2585_v13 = vpop.f32.mrb[13].mxu1 }
 0x6f8   :  { %2620 = vrot.lane.b32.xlu1 %v2585_v13, %s5488_s13 }
 0x6fa   :  { %v2589_v15 = vpop.f32.mrb[14].mxu1 }
 0x6fb   :  { %2622 = vrot.lane.b32.xlu0 %v2589_v15, %s5488_s13  ;;  %v2591_v17 = vpop.f32.mrb[15].mxu1 }
 0x6fc   :  { %2624 = vrot.lane.b32.xlu1 %v2591_v17, %s5488_s13  ;;  %v2701_v17 = vld [vmem:[%s7492_s3 + $0x78] sm:$0xff] }
 0x6fd   :  { %v5160_v20 = vpack.c.bf16 %v2701_v17, %v2699_v16  ;;  %v4234_v16 = vld [vmem:[%s7492_s3 + $0x258] sm:$0xff]  ;;  %v4236_v17 = vld [vmem:[%s7492_s3 + $0x268] sm:$0xff] }
 0x761   :  { %v2611_v22 = vpop.permute.xlu0 %2610 }
 0x762   :  { %v2613_v23 = vpop.permute.xlu1 %2612 }
 0x763   :  { %v2626_v25 = vsel %vm717_vm7, %v2611_v22, %v2613_v23  ;;  %v2698_v22 = vld [vmem:[%s7492_s3 + $0x60] sm:$0xff]  ;;  %v2700_v23 = vld [vmem:[%s7492_s3 + $0x70] sm:$0xff] }
 0x764   :  { %v2634_v26 = vmax.f32 %v2571_v47, %v2626_v25  ;;  %v2703_v25 = vld [vmem:[%s7492_s3 + $0x88] sm:$0xff] }
 0x765   :  { %v2615_v27 = vpop.permute.xlu0 %2614 }
 0x766   :  { %v2639_v55 = vrot.slane %v2634_v26, 1  ;;  %v2617_v56 = vpop.permute.xlu1 %2616 }
 0x767   :  { %v2627_v31 = vsel %vm717_vm7, %v2615_v27, %v2617_v56  ;;  %v5162_v27 = vpack.c.bf16 %v2700_v23, %v2698_v22  ;;  %v2702_v56 = vld [vmem:[%s7492_s3 + $0x80] sm:$0xff]  ;;  %v4233_v22 = vld [vmem:[%s7492_s3 + $0x250] sm:$0xff] }
 0x768   :  { %v2641_v32 = vmax.f32 %v2634_v26, %v2639_v55  ;;  %v2635_v29 = vmax.f32 %v2577_v59, %v2627_v31  ;;  %v2705_v26 = vld [vmem:[%s7492_s3 + $0x98] sm:$0xff]  ;;  %v2704_v31 = vld [vmem:[%s7492_s3 + $0x90] sm:$0xff]  ;;  %v4235_v23 = vld [vmem:[%s7492_s3 + $0x260] sm:$0xff] }
 0x769   :  { %v2619_v33 = vpop.permute.xlu0 %2618  ;;  %v5164_v55 = vpack.c.bf16 %v2705_v26, %v2703_v25  ;;  %v4238_v26 = vld [vmem:[%s7492_s3 + $0x278] sm:$0xff] }
 0x76a   :  { %v2642_v57 = vadd.f32 %v5460_v34, %v2641_v32  ;;  %v2645_v63 = vadd.f32 %v2641_v32, %v5894_v28  ;;  %v2651_v35 = vrot.slane %v2635_v29, 1  ;;  %v2621_v1 = vpop.permute.xlu1 %2620  ;;  %v5166_v32 = vpack.c.bf16 %v2704_v31, %v2702_v56  ;;  %v4237_v31 = vld [vmem:[%s7492_s3 + $0x270] sm:$0xff] }
 0x76b   :  { %v2628_v24 = vsel %vm717_vm7, %v2619_v33, %v2621_v1  ;;  %v4200_v33 = vld [vmem:[%s7492_s3 + $0x168] sm:$0xff]  ;;  %v4206_v1 = vld [vmem:[%s7492_s3 + $0x198] sm:$0xff] }
 0x76c   :  { %v2643_v2 = vmax.f32 %v2642_v57, 0.0  ;;  %v2646_v58 = vmax.f32 %v2645_v63, 0.0  ;;  %v2653_v62 = vmax.f32 %v2635_v29, %v2651_v35  ;;  %v2636_v37 = vmax.f32 %v2583_v38, %v2628_v24  ;;  %v2692_v38 = vld [vmem:[%s7492_s3 + $0x30] sm:$0xff]  ;;  %v2707_v29 = vld [vmem:[%s7492_s3 + $0xa8] sm:$0xf]  ;;  %v4199_v57 = vld [vmem:[%s7492_s3 + $0x160] sm:$0xff] }
 0x76d   :  { %v2623_v39 = vpop.permute.xlu0 %2622  ;;  %v5154_v13 = vpack.c.bf16 %v2692_v38, %v2690_v8  ;;  %v4201_v63 = vld [vmem:[%s7492_s3 + $0x170] sm:$0xff]  ;;  %v4204_v35 = vld [vmem:[%s7492_s3 + $0x188] sm:$0xff]  ;;  %v2706_v24 = vld [vmem:[%s7492_s3 + $0xa0] sm:$0xf] }
 0x76e   :  { %2644 = vst.msk [vmem:[#allocation3] sm:$0x1] %vm736_vm8, %v2643_v2  ;;  %v2654_v30 = vadd.f32 %v5460_v34, %v2653_v62  ;;  %v2657_v40 = vadd.f32 %v2653_v62, %v5894_v28  ;;  %v2663_v41 = vrot.slane %v2636_v37, 1  ;;  %v2625_v42 = vpop.permute.xlu1 %2624  ;;  %v5172_v62 = vpack.c.bf16 %v4206_v1, %v4204_v35  ;;  %v4227_v8 = vld [vmem:[%s7492_s3 + $0x220] sm:$0xff]  ;;  %v4230_v38 = vld [vmem:[%s7492_s3 + $0x238] sm:$0xff] }
 0x76f   :  { %2647 = vst.msk [vmem:[#allocation3 - $0x1] sm:$0x4] %vm746_vm9, %v2646_v58  ;;  %v2629_v43 = vsel %vm717_vm7, %v2623_v39, %v2625_v42  ;;  %v4205_v39 = vld [vmem:[%s7492_s3 + $0x190] sm:$0xff]  ;;  %v4243_v35 = vld [vmem:[%s7492_s3 + $0x2a0] sm:$0xff] }
 0x770   :  { %2648 = vst.msk [vmem:[#allocation3 - $0x2] sm:$0x10] %vm748_vm10, %v2646_v58  ;;  %v2655_v36 = vmax.f32 %v2654_v30, 0.0  ;;  %v2658_v44 = vmax.f32 %v2657_v40, 0.0  ;;  %v2665_v45 = vmax.f32 %v2636_v37, %v2663_v41  ;;  %v2637_v46 = vmax.f32 %v2589_v15, %v2629_v43  ;;  %v2694_v15 = vld [vmem:[%s7492_s3 + $0x40] sm:$0xff]  ;;  %v4208_v40 = vld [vmem:[%s7492_s3 + $0x1a8] sm:$0xff] }
 0x771   :  { %2649 = vst.msk [vmem:[#allocation3 - $0x3] sm:$0x40] %vm750_vm11, %v2646_v58  ;;  %v5158_v0 = vpack.c.bf16 %v2696_v19, %v2694_v15  ;;  %v5170_v58 = vpack.c.bf16 %v4201_v63, %v4199_v57  ;;  %v4203_v37 = vld [vmem:[%s7492_s3 + $0x180] sm:$0xff]  ;;  %v4210_v41 = vld [vmem:[%s7492_s3 + $0x1b8] sm:$0xff]  ;;  %v4229_v15 = vld [vmem:[%s7492_s3 + $0x230] sm:$0xff] }
 0x772   :  { %2656 = vst.msk [vmem:[#allocation3 + $0x4] sm:$0x1] %vm736_vm8, %v2655_v36  ;;  %v2666_v47 = vadd.f32 %v5460_v34, %v2665_v45  ;;  %v2669_v48 = vadd.f32 %v2665_v45, %v5894_v28  ;;  %v2675_v49 = vrot.slane %v2637_v46, 1  ;;  %v5174_v42 = vpack.c.bf16 %v4205_v39, %v4203_v37  ;;  %v4207_v36 = vld [vmem:[%s7492_s3 + $0x1a0] sm:$0xff]  ;;  %v4241_v63 = vld [vmem:[%s7492_s3 + $0x290] sm:$0xff]  ;;  %v4256_v39 = vld [vmem:[%s7492_s3 + $0x2e8] sm:$0xff] }
 0x773   :  { %2659 = vst.msk [vmem:[#allocation3 + $0x3] sm:$0x4] %vm746_vm9, %v2658_v44  ;;  %v5176_v43 = vpack.c.bf16 %v4210_v41, %v4208_v40  ;;  %v4231_v19 = vld [vmem:[%s7492_s3 + $0x240] sm:$0xff]  ;;  %v5206_v1 = vpack.c.bf16 %v4243_v35, %v4241_v63  ;;  %v4253_v37 = vld [vmem:[%s7492_s3 + $0x2d0] sm:$0xff]  ;;  %v3717_v63 = vld [vmem:[%s7496_s7 + $0x8] sm:$0xff] }
 0x774   :  { %2660 = vst.msk [vmem:[#allocation3 + $0x2] sm:$0x10] %vm748_vm10, %v2658_v44  ;;  %v2667_v50 = vmax.f32 %v2666_v47, 0.0  ;;  %v2670_v51 = vmax.f32 %v2669_v48, 0.0  ;;  %v2677_v52 = vmax.f32 %v2637_v46, %v2675_v49  ;;  %v4212_v46 = vld [vmem:[%s7492_s3 + $0x1c8] sm:$0xff]  ;;  %v4214_v47 = vld [vmem:[%s7492_s3 + $0x1d8] sm:$0xff] }
 0x775   :  { %2661 = vst.msk [vmem:[#allocation3 + $0x1] sm:$0x40] %vm750_vm11, %v2658_v44  ;;  %v4209_v44 = vld [vmem:[%s7492_s3 + $0x1b0] sm:$0xff]  ;;  %v5180_v49 = vpack.c.bf16 %v4214_v47, %v4212_v46  ;;  %v4260_v46 = vld [vmem:[%s7492_s3 + $0x308] sm:$0xff]  ;;  %v4262_v47 = vld [vmem:[%s7492_s3 + $0x318] sm:$0xff] }
 0x776   :  { %2672 = vst.msk [vmem:[#allocation3 + $0x6] sm:$0x10] %vm748_vm10, %v2670_v51  ;;  %v2678_v53 = vadd.f32 %v5460_v34, %v2677_v52  ;;  %v2681_v54 = vadd.f32 %v2677_v52, %v5894_v28  ;;  %v5150_v28 = vpack.c.bf16 %v2688_v3, %v2686_v61  ;;  %v4202_v34 = vld [vmem:[%s7492_s3 + $0x178] sm:$0xff]  ;;  %v5178_v48 = vpack.c.bf16 %v4209_v44, %v4207_v36  ;;  %v4216_v52 = vld [vmem:[%s7492_s3 + $0x1e8] sm:$0xff]  ;;  %v4217_v61 = vld [vmem:[%s7492_s3 + $0x1f0] sm:$0xff] }
 0x777   :  { %2673 = vst.msk [vmem:[#allocation3 + $0x5] sm:$0x40] %vm750_vm11, %v2670_v51  ;;  %v5168_v2 = vpack.c.bf16 %v4202_v34, %v4200_v33  ;;  %v4244_v33 = vld [vmem:[%s7492_s3 + $0x2a8] sm:$0xff]  ;;  %v4245_v40 = vld [vmem:[%s7492_s3 + $0x2b0] sm:$0xf]  ;;  %v4255_v36 = vld [vmem:[%s7492_s3 + $0x2e0] sm:$0xff] }
 0x778   :  { %2668 = vst.msk [vmem:[#allocation3 + $0x8] sm:$0x1] %vm736_vm8, %v2667_v50  ;;  %v2679_v59 = vmax.f32 %v2678_v53, 0.0  ;;  %v2682_v60 = vmax.f32 %v2681_v54, 0.0  ;;  %v4211_v50 = vld [vmem:[%s7492_s3 + $0x1c0] sm:$0xff]  ;;  %v4218_v53 = vld [vmem:[%s7492_s3 + $0x1f8] sm:$0xff] }
 0x779   :  { %2671 = vst.msk [vmem:[#allocation3 + $0x7] sm:$0x4] %vm746_vm9, %v2670_v51  ;;  %v4213_v51 = vld [vmem:[%s7492_s3 + $0x1d0] sm:$0xff] }
 0x77a   :  { %2680 = vst.msk [vmem:[#allocation3 + $0xc] sm:$0x1] %vm736_vm8, %v2679_v59  ;;  %v5182_v54 = vpack.c.bf16 %v4213_v51, %v4211_v50  ;;  %v5184_v59 = vpack.c.bf16 %v4218_v53, %v4216_v52  ;;  %v4257_v44 = vld [vmem:[%s7492_s3 + $0x2f0] sm:$0xff]  ;;  %v4259_v50 = vld [vmem:[%s7492_s3 + $0x300] sm:$0xff]  ;;  %v4264_v53 = vld [vmem:[%s7492_s3 + $0x328] sm:$0xff] }
 0x77b   :  { %2683 = vst.msk [vmem:[#allocation3 + $0xb] sm:$0x4] %vm746_vm9, %v2682_v60  ;;  %v4215_v60 = vld [vmem:[%s7492_s3 + $0x1e0] sm:$0xff]  ;;  %v4261_v51 = vld [vmem:[%s7492_s3 + $0x310] sm:$0xff] }
 0x77c   :  { %v2684_v30 = vld [vmem:[#allocation3] sm:$0xff]  ;;  %v5186_v3 = vpack.c.bf16 %v4217_v61, %v4215_v60  ;;  %v3718_v35 = vld [vmem:[%s7496_s7 + $0x10] sm:$0xff] }
 0x77d   :  { %v4263_v61 = vld [vmem:[%s7492_s3 + $0x320] sm:$0xff] }
 0x77e   :  { %v2911_v25 = vld [vmem:[#allocation3 + $0xa] sm:$0x3] }
 0x77f   :  { %v2708_v9 = vld [vmem:[#allocation3 + $0x1] sm:$0xff] }
 0x780   :  { %4193 = vmatmul.mubr.msk.f32.vlgmr.msra.gmra.mrb[10].mxu0 %vm835_vm12, %v2708_v9  ;;  %v2709_v21 = vld [vmem:[#allocation3 + $0x9] sm:$0x3] }
 0x781   :  { %5151 = vmatpush1.bf16.msra.mxu0 %v5150_v28  ;;  %2814 = vmatprep.mubr.f32.mxu0 %v5487_v5  ;;  %v2685_v45 = vld [vmem:[#allocation3 + $0x8] sm:$0x3]  ;;  %v3028_v52 = vld [vmem:[#allocation3 + $0xb] sm:$0x3] }
 0x782   :  { %5153 = vmatprep.subr.bf16.mxu0 %v5152_v7  ;;  %v4228_v28 = vld [vmem:[%s7492_s3 + $0x228] sm:$0xff]  ;;  %v4225_v7 = vld [vmem:[%s7492_s3 + $0x210] sm:$0xff] }
 0x783   :  { %v4232_v9 = vld [vmem:[%s7492_s3 + $0x248] sm:$0xff]  ;;  %v5188_v12 = vpack.c.bf16 %v4228_v28, %v4226_v6  ;;  %v4270_v6 = vld [vmem:[%s7492_s3 + $0x358] sm:$0xff] }
 0x784   :  { %4194 = vmatmul.mubr.msk.f32.gmra.mrb[12].mxu0 %vm835_vm12, %v2709_v21  ;;  %v2910_v21 = vld [vmem:[#allocation3 + $0x2] sm:$0xff] }
 0x785   :  { %5155 = vmatpush1.bf16.msra.mxu0 %v5154_v13  ;;  %2897 = vmatprep.mubr.f32.mxu0 %v5487_v5  ;;  %v5190_v13 = vpack.c.bf16 %v4227_v8, %v4225_v7  ;;  %v4267_v8 = vld [vmem:[%s7492_s3 + $0x340] sm:$0xff] }
 0x786   :  { %5157 = vmatprep.subr.bf16.mxu0 %v5156_v14  ;;  %v5192_v14 = vpack.c.bf16 %v4232_v9, %v4230_v38  ;;  %v4269_v38 = vld [vmem:[%s7492_s3 + $0x350] sm:$0xff] }
 0x787   :  { %v5226_v9 = vpack.c.bf16 %v4269_v38, %v4267_v8  ;;  %v4284_v38 = vld [vmem:[%s7494_s5 + $0x80] sm:$0xff] }
 0x789   :  { %5159 = vmatpush1.bf16.msra.mxu0 %v5158_v0  ;;  %v5194_v0 = vpack.c.bf16 %v4231_v19, %v4229_v15  ;;  %v3286_v15 = vld [vmem:[%s7494_s5] sm:$0xff]  ;;  %v3287_v19 = vld [vmem:[%s7494_s5 + $0x8] sm:$0xff] }
 0x78a   :  { %5161 = vmatprep.subr.bf16.mxu0 %v5160_v20  ;;  %v5196_v20 = vpack.c.bf16 %v4236_v17, %v4234_v16  ;;  %v5229_v16 = vpack.c.bf16 %v3287_v19, %v3286_v15  ;;  %v3289_v17 = vld [vmem:[%s7494_s5 + $0x18] sm:$0xff] }
 0x78c   :  { %5230 = vmatpush3.bf16.msra.mxu1 %v5229_v16 }
 0x78d   :  { %5163 = vmatpush1.bf16.msra.mxu0 %v5162_v27  ;;  %v4240_v27 = vld [vmem:[%s7492_s3 + $0x288] sm:$0xff]  ;;  %5231 = vmatprep.subr.bf16.mxu1 %v5489_v18 }
 0x78e   :  { %5165 = vmatprep.subr.bf16.mxu0 %v5164_v55  ;;  %v5198_v55 = vpack.c.bf16 %v4235_v23, %v4233_v22  ;;  %v5200_v56 = vpack.c.bf16 %v4240_v27, %v4238_v26  ;;  %v3291_v22 = vld [vmem:[%s7494_s5 + $0x28] sm:$0xff]  ;;  %v3293_v26 = vld [vmem:[%s7494_s5 + $0x38] sm:$0xff] }
 0x791   :  { %5167 = vmatpush1.bf16.msra.mxu0 %v5166_v32  ;;  %v4239_v32 = vld [vmem:[%s7492_s3 + $0x280] sm:$0xff] }
 0x792   :  { %4195 = vmatprep.subr.msk.mxu0 %vm580_vm4, %v2707_v29  ;;  %v4242_v29 = vld [vmem:[%s7492_s3 + $0x298] sm:$0xff]  ;;  %v5202_v34 = vpack.c.bf16 %v4239_v32, %v4237_v31 }
 0x793   :  { %v5204_v57 = vpack.c.bf16 %v4244_v33, %v4242_v29 }
 0x795   :  { %4196 = vmatpush1.msk.msra.mxu0 %vm580_vm4, %v2706_v24  ;;  %v4246_v24 = vld [vmem:[%s7492_s3 + $0x2b8] sm:$0xf] }
 0x796   :  { %4197 = vmatmul.mubr.msk.f32.vlgmr.msra.gmra.mrb[10].mxu0 %vm835_vm12, %v2684_v30  ;;  %5169 = vmatprep.subr.bf16.mxu0 %v5168_v2  ;;  %v4252_v2 = vld [vmem:[%s7492_s3 + $0x2c8] sm:$0xff]  ;;  %v4258_v30 = vld [vmem:[%s7492_s3 + $0x2f8] sm:$0xff] }
 0x797   :  { %5171 = vmatpush1.bf16.msra.mxu0 %v5170_v58  ;;  %2903 = vmatprep.mubr.f32.mxu0 %v5487_v5  ;;  %v4254_v58 = vld [vmem:[%s7492_s3 + $0x2d8] sm:$0xff] }
 0x798   :  { %5173 = vmatprep.subr.bf16.mxu0 %v5172_v62  ;;  %v4251_v62 = vld [vmem:[%s7492_s3 + $0x2c0] sm:$0xff]  ;;  %v5208_v41 = vpack.c.bf16 %v4254_v58, %v4252_v2 }
 0x799   :  { %v3720_v58 = vld [vmem:[%s7496_s7 + $0x20] sm:$0xff] }
 0x79a   :  { %4198 = vmatmul.mubr.msk.f32.gmra.mrb[12].mxu0 %vm835_vm12, %v2685_v45  ;;  %v3027_v45 = vld [vmem:[#allocation3 + $0x3] sm:$0xff] }
 0x79b   :  { %5175 = vmatpush1.bf16.msra.mxu0 %v5174_v42  ;;  %3010 = vmatprep.mubr.f32.mxu0 %v5487_v5  ;;  %v5210_v42 = vpack.c.bf16 %v4253_v37, %v4251_v62  ;;  %v3721_v62 = vld [vmem:[%s7496_s7 + $0x28] sm:$0xff] }
 0x79c   :  { %5177 = vmatprep.subr.bf16.mxu0 %v5176_v43  ;;  %v5212_v43 = vpack.c.bf16 %v4258_v30, %v4256_v39  ;;  %v5310_v37 = vpack.c.bf16 %v3721_v62, %v3720_v58  ;;  %v3722_v39 = vld [vmem:[%s7496_s7 + $0x30] sm:$0xff]  ;;  %v3723_v30 = vld [vmem:[%s7496_s7 + $0x38] sm:$0xff] }
 0x79d   :  { %v4304_v58 = vld [vmem:[%s7494_s5 + $0x110] sm:$0xff]  ;;  %v4305_v62 = vld [vmem:[%s7494_s5 + $0x118] sm:$0xff] }
 0x79f   :  { %5179 = vmatpush1.bf16.msra.mxu0 %v5178_v48  ;;  %v5214_v48 = vpack.c.bf16 %v4257_v44, %v4255_v36  ;;  %v3726_v36 = vld [vmem:[%s7496_s7 + $0x50] sm:$0xff]  ;;  %v3727_v44 = vld [vmem:[%s7496_s7 + $0x58] sm:$0xff] }
 0x7a0   :  { %5181 = vmatprep.subr.bf16.mxu0 %v5180_v49  ;;  %v5216_v49 = vpack.c.bf16 %v4262_v47, %v4260_v46 }
 0x7a3   :  { %5183 = vmatpush1.bf16.msra.mxu0 %v5182_v54  ;;  %v4266_v54 = vld [vmem:[%s7492_s3 + $0x338] sm:$0xff] }
 0x7a4   :  { %5185 = vmatprep.subr.bf16.mxu0 %v5184_v59  ;;  %v5218_v59 = vpack.c.bf16 %v4261_v51, %v4259_v50  ;;  %v5220_v60 = vpack.c.bf16 %v4266_v54, %v4264_v53  ;;  %v4279_v53 = vld [vmem:[%s7494_s5 + $0x58] sm:$0xff]  ;;  %v7255_v54 = vld [vmem:[%s7493_s4] sm:$0x1] }
 0x7a7   :  { %5187 = vmatpush1.bf16.msra.mxu0 %v5186_v3  ;;  %v4265_v3 = vld [vmem:[%s7492_s3 + $0x330] sm:$0xff] }
 0x7a8   :  { %4221 = vmatprep.subr.msk.mxu0 %vm580_vm4, %v4220_v4  ;;  %v4268_v4 = vld [vmem:[%s7492_s3 + $0x348] sm:$0xff]  ;;  %v5222_v28 = vpack.c.bf16 %v4265_v3, %v4263_v61  ;;  %v4280_v3 = vld [vmem:[%s7494_s5 + $0x60] sm:$0xff] }
 0x7a9   :  { %v5224_v7 = vpack.c.bf16 %v4270_v6, %v4268_v4  ;;  %v4281_v4 = vld [vmem:[%s7494_s5 + $0x68] sm:$0xff] }
 0x7aa   :  { %v5247_v6 = vpack.c.bf16 %v4281_v4, %v4280_v3  ;;  %v4317_v4 = vld [vmem:[%s7494_s5 + $0x170] sm:$0xff] }
 0x7ab   :  { %4222 = vmatpush1.msk.msra.mxu0 %vm580_vm4, %v4219_v10  ;;  %v4272_v10 = vld [vmem:[%s7492_s3 + $0x368] sm:$0xf] }
 0x7ac   :  { %4223 = vmatmul.mubr.msk.f32.vlgmr.msra.gmra.mrb[10].mxu0 %vm835_vm12, %v2910_v21  ;;  %5189 = vmatprep.subr.bf16.mxu0 %v5188_v12  ;;  %v4271_v12 = vld [vmem:[%s7492_s3 + $0x360] sm:$0xf]  ;;  %v3288_v21 = vld [vmem:[%s7494_s5 + $0x10] sm:$0xff] }
 0x7ad   :  { %5191 = vmatpush1.bf16.msra.mxu0 %v5190_v13  ;;  %3016 = vmatprep.mubr.f32.mxu0 %v5487_v5  ;;  %v3144_v13 = vld [vmem:[#allocation3 + $0x4] sm:$0xff] }
 0x7ae   :  { %5193 = vmatprep.subr.bf16.mxu0 %v5192_v14  ;;  %v3145_v14 = vld [vmem:[#allocation3 + $0xc] sm:$0x3] }
 0x7b0   :  { %4224 = vmatmul.mubr.msk.f32.gmra.mrb[12].mxu0 %vm835_vm12, %v2911_v25  ;;  %v3292_v25 = vld [vmem:[%s7494_s5 + $0x30] sm:$0xff] }
 0x7b1   :  { %5195 = vmatpush1.bf16.msra.mxu0 %v5194_v0  ;;  %3127 = vmatprep.mubr.f32.mxu0 %v5487_v5  ;;  %v5232_v0 = vpack.c.bf16 %v3289_v17, %v3288_v21  ;;  %v5238_v27 = vpack.c.bf16 %v3293_v26, %v3292_v25  ;;  %v4290_v21 = vld [vmem:[%s7494_s5 + $0xa8] sm:$0xff] }
 0x7b2   :  { %5197 = vmatprep.subr.bf16.mxu0 %v5196_v20  ;;  %v3290_v20 = vld [vmem:[%s7494_s5 + $0x20] sm:$0xff]  ;;  %v4294_v25 = vld [vmem:[%s7494_s5 + $0xc8] sm:$0xff] }
 0x7b3   :  { %5233 = vmatpush3.bf16.msra.mxu1 %v5232_v0  ;;  %v5235_v23 = vpack.c.bf16 %v3291_v22, %v3290_v20  ;;  %v4291_v0 = vld [vmem:[%s7494_s5 + $0xb0] sm:$0xff]  ;;  %v4292_v20 = vld [vmem:[%s7494_s5 + $0xb8] sm:$0xff] }
 0x7b4   :  { %5234 = vmatprep.subr.bf16.mxu1 %v5489_v18  ;;  %v5262_v22 = vpack.c.bf16 %v4292_v20, %v4291_v0 }
 0x7b5   :  { %5199 = vmatpush1.bf16.msra.mxu0 %v5198_v55  ;;  %v3294_v55 = vld [vmem:[%s7494_s5 + $0x40] sm:$0xff] }
 0x7b6   :  { %5201 = vmatprep.subr.bf16.mxu0 %v5200_v56  ;;  %v3295_v56 = vld [vmem:[%s7494_s5 + $0x48] sm:$0xff] }
 0x7b7   :  { %5236 = vmatpush3.bf16.msra.mxu1 %v5235_v23  ;;  %v5241_v31 = vpack.c.bf16 %v3295_v56, %v3294_v55  ;;  %v4293_v23 = vld [vmem:[%s7494_s5 + $0xc0] sm:$0xff]  ;;  %v4296_v55 = vld [vmem:[%s7494_s5 + $0xd8] sm:$0xff] }
 0x7b8   :  { %5237 = vmatprep.subr.bf16.mxu1 %v5489_v18  ;;  %v5265_v26 = vpack.c.bf16 %v4294_v25, %v4293_v23  ;;  %v3809_v23 = vld [vmem:[%s7498_s9 + $0x18] sm:$0xff] }
 0x7b9   :  { %5203 = vmatpush1.bf16.msra.mxu0 %v5202_v34 }
 0x7ba   :  { %5205 = vmatprep.subr.bf16.mxu0 %v5204_v57  ;;  %v3716_v57 = vld [vmem:[%s7496_s7] sm:$0xff] }
 0x7bb   :  { %5239 = vmatpush3.bf16.msra.mxu1 %v5238_v27  ;;  %v4295_v27 = vld [vmem:[%s7494_s5 + $0xd0] sm:$0xff] }
 0x7bc   :  { %5240 = vmatprep.subr.bf16.mxu1 %v5489_v18  ;;  %v5268_v56 = vpack.c.bf16 %v4296_v55, %v4295_v27  ;;  %v3811_v27 = vld [vmem:[%s7498_s9 + $0x28] sm:$0xff] }
 0x7bd   :  { %5207 = vmatpush1.bf16.msra.mxu0 %v5206_v1  ;;  %v5304_v1 = vpack.c.bf16 %v3717_v63, %v3716_v57  ;;  %v4301_v57 = vld [vmem:[%s7494_s5 + $0xf8] sm:$0xff] }
 0x7be   :  { %4247 = vmatprep.subr.msk.mxu0 %vm580_vm4, %v4246_v24  ;;  %v3719_v24 = vld [vmem:[%s7496_s7 + $0x18] sm:$0xff] }
 0x7bf   :  { %5242 = vmatpush3.bf16.msra.mxu1 %v5241_v31  ;;  %v5307_v2 = vpack.c.bf16 %v3719_v24, %v3718_v35  ;;  %v4297_v31 = vld [vmem:[%s7494_s5 + $0xe0] sm:$0xff]  ;;  %v4303_v24 = vld [vmem:[%s7494_s5 + $0x108] sm:$0xff] }
 0x7c0   :  { %5243 = vmatprep.subr.bf16.mxu1 %v5489_v18 }
 0x7c1   :  { %4248 = vmatpush1.msk.msra.mxu0 %vm580_vm4, %v4245_v40  ;;  %v5313_v40 = vpack.c.bf16 %v3723_v30, %v3722_v39  ;;  %v4306_v39 = vld [vmem:[%s7494_s5 + $0x120] sm:$0xff]  ;;  %v4307_v30 = vld [vmem:[%s7494_s5 + $0x128] sm:$0xff] }
 0x7c2   :  { %4249 = vmatmul.mubr.msk.f32.vlgmr.msra.gmra.mrb[10].mxu0 %vm835_vm12, %v3027_v45  ;;  %5209 = vmatprep.subr.bf16.mxu0 %v5208_v41  ;;  %v3724_v41 = vld [vmem:[%s7496_s7 + $0x40] sm:$0xff]  ;;  %v5319_v45 = vpack.c.bf16 %v3727_v44, %v3726_v36  ;;  %v4312_v44 = vld [vmem:[%s7494_s5 + $0x148] sm:$0xff] }
 0x7c3   :  { %5211 = vmatpush1.bf16.msra.mxu0 %v5210_v42  ;;  %3133 = vmatprep.mubr.f32.mxu0 %v5487_v5  ;;  %v3725_v42 = vld [vmem:[%s7496_s7 + $0x48] sm:$0xff]  ;;  %v4311_v36 = vld [vmem:[%s7494_s5 + $0x140] sm:$0xff] }
 0x7c4   :  { %5213 = vmatprep.subr.bf16.mxu0 %v5212_v43  ;;  %v5316_v43 = vpack.c.bf16 %v3725_v42, %v3724_v41  ;;  %v4308_v41 = vld [vmem:[%s7494_s5 + $0x130] sm:$0xff]  ;;  %v4309_v42 = vld [vmem:[%s7494_s5 + $0x138] sm:$0xff] }
 0x7c6   :  { %4250 = vmatmul.mubr.msk.f32.gmra.mrb[12].mxu0 %vm835_vm12, %v3028_v52  ;;  %v4278_v52 = vld [vmem:[%s7494_s5 + $0x50] sm:$0xff] }
 0x7c7   :  { %5215 = vmatpush1.bf16.msra.mxu0 %v5214_v48  ;;  %3244 = vmatprep.mubr.f32.mxu0 %v5487_v5 }
 0x7c8   :  { %5217 = vmatprep.subr.bf16.mxu0 %v5216_v49 }
 0x7cb   :  { %5219 = vmatpush1.bf16.msra.mxu0 %v5218_v59 }
 0x7cc   :  { %5221 = vmatprep.subr.bf16.mxu0 %v5220_v60  ;;  %v5244_v60 = vpack.c.bf16 %v4279_v53, %v4278_v52 }
 0x7cf   :  { %5223 = vmatpush1.bf16.msra.mxu0 %v5222_v28  ;;  %v4282_v28 = vld [vmem:[%s7494_s5 + $0x70] sm:$0xff] }
 0x7d0   :  { %5225 = vmatprep.subr.bf16.mxu0 %v5224_v7  ;;  %v4283_v7 = vld [vmem:[%s7494_s5 + $0x78] sm:$0xff] }
 0x7d1   :  { %v5250_v8 = vpack.c.bf16 %v4283_v7, %v4282_v28  ;;  %v4319_v7 = vld [vmem:[%s7494_s5 + $0x180] sm:$0xff] }
 0x7d3   :  { %5227 = vmatpush1.bf16.msra.mxu0 %v5226_v9  ;;  %v4285_v9 = vld [vmem:[%s7494_s5 + $0x88] sm:$0xff] }
 0x7d4   :  { %4273 = vmatprep.subr.msk.mxu0 %vm580_vm4, %v4272_v10  ;;  %v5253_v10 = vpack.c.bf16 %v4285_v9, %v4284_v38 }
 0x7d7   :  { %4274 = vmatpush1.msk.msra.mxu0 %vm580_vm4, %v4271_v12 }
 0x7d8   :  { %4275 = vmatmul.mubr.msk.f32.vlgmr.msra.gmra.mrb[10].mxu0 %vm835_vm12, %v3144_v13  ;;  %5303 = vmatprep.subr.bf16.mxu0 %v5489_v18  ;;  %v4286_v13 = vld [vmem:[%s7494_s5 + $0x90] sm:$0xff] }
 0x7d9   :  { %3250 = vmatprep.mubr.f32.mxu0 %v5487_v5  ;;  %5305 = vmatpush3.bf16.msra.mxu0 %v5304_v1  ;;  %v4302_v1 = vld [vmem:[%s7494_s5 + $0x100] sm:$0xff] }
 0x7da   :  { %5306 = vmatprep.subr.bf16.mxu0 %v5489_v18 }
 0x7dc   :  { %4276 = vmatmul.mubr.msk.f32.gmra.mrb[12].mxu0 %vm835_vm12, %v3145_v14  ;;  %v4287_v14 = vld [vmem:[%s7494_s5 + $0x98] sm:$0xff] }
 0x7dd   :  { %4809 = vmatprep.mubr.msk.f32.mxu0 %vm5491_vm13, %v5487_v5  ;;  %5308 = vmatpush3.bf16.msra.mxu0 %v5307_v2  ;;  %v5256_v15 = vpack.c.bf16 %v4287_v14, %v4286_v13  ;;  %v5277_v2 = vpack.c.bf16 %v4303_v24, %v4302_v1  ;;  %v3729_v13 = vld [vmem:[%s7496_s7 + $0x68] sm:$0xff] }
 0x7de   :  { %5309 = vmatprep.subr.bf16.mxu0 %v5489_v18 }
 0x7e1   :  { %5311 = vmatpush3.bf16.msra.mxu0 %v5310_v37  ;;  %v5280_v37 = vpack.c.bf16 %v4305_v62, %v4304_v58 }
 0x7e2   :  { %5312 = vmatprep.subr.bf16.mxu0 %v5489_v18 }
 0x7e5   :  { %5314 = vmatpush3.bf16.msra.mxu0 %v5313_v40  ;;  %v5283_v40 = vpack.c.bf16 %v4307_v30, %v4306_v39 }
 0x7e6   :  { %5315 = vmatprep.subr.bf16.mxu0 %v5489_v18 }
 0x7e9   :  { %5317 = vmatpush3.bf16.msra.mxu0 %v5316_v43  ;;  %v5286_v43 = vpack.c.bf16 %v4309_v42, %v4308_v41 }
 0x7ea   :  { %5318 = vmatprep.subr.bf16.mxu0 %v5489_v18 }
 0x7ed   :  { %5320 = vmatpush3.bf16.msra.mxu0 %v5319_v45 }
 0x7ee   :  { %5321 = vmatprep.subr.bf16.mxu0 %v5489_v18 }
 0x8ab   :  { %v3246_v32 = vpop.f32.mrb[10].mxu0 }
 0x8ac   :  { %3265 = vrot.lane.b32.xlu0 %v3246_v32, %s5490_s19  ;;  %v3248_v29 = vpop.f32.mrb[11].mxu0 }
 0x8ad   :  { %3267 = vrot.lane.b32.xlu1 %v3248_v29, %s5490_s19 }
 0x8af   :  { %v7198_v33 = vpop.f32.mrb[12].mxu0 }
 0x8b0   :  { %3269 = vrot.lane.b32.xlu0 %v7198_v33, %s5490_s19  ;;  %v3254_v34 = vpop.f32.mrb[13].mxu0 }
 0x8b1   :  { %3271 = vrot.lane.b32.xlu1 %v3254_v34, %s5490_s19  ;;  %v4300_v34 = vld [vmem:[%s7494_s5 + $0xf0] sm:$0xff] }
 0x8b2   :  { %v5274_v63 = vpack.c.bf16 %v4301_v57, %v4300_v34  ;;  %v3815_v34 = vld [vmem:[%s7498_s9 + $0x48] sm:$0xff] }
 0x91e   :  { %v3266_v46 = vpop.permute.xlu0 %3265 }
 0x91f   :  { %v3268_v47 = vpop.permute.xlu1 %3267 }
 0x920   :  { %v3273_v48 = vsel %vm1380_vm14, %v3266_v46, %v3268_v47  ;;  %v5289_v47 = vpack.c.bf16 %v4312_v44, %v4311_v36 }
 0x921   :  { %v3277_v49 = vmax.f32 %v3246_v32, %v3273_v48  ;;  %v4298_v32 = vld [vmem:[%s7494_s5 + $0xe8] sm:$0xff] }
 0x922   :  { %v5271_v29 = vpack.c.bf16 %v4298_v32, %v4297_v31  ;;  %v3270_v45 = vpop.permute.xlu0 %3269  ;;  %v3813_v31 = vld [vmem:[%s7498_s9 + $0x38] sm:$0xff] }
 0x923   :  { %v3281_v50 = vrot.slane %v3277_v49, 1  ;;  %v3272_v46 = vpop.permute.xlu1 %3271 }
 0x925   :  { %v3283_v51 = vmax.f32 %v3277_v49, %v3281_v50  ;;  %v4313_v49 = vld [vmem:[%s7494_s5 + $0x150] sm:$0xff]  ;;  %v4314_v50 = vld [vmem:[%s7494_s5 + $0x158] sm:$0xff] }
 0x926   :  { %v5292_v52 = vpack.c.bf16 %v4314_v50, %v4313_v49 }
 0x927   :  { %v3284_v59 = vadd.f32 %v7255_v54, %v3283_v51  ;;  %v3370_v12 = vadd.f32 %v3283_v51, %v6324_v11  ;;  %v4289_v11 = vld [vmem:[%s7494_s5 + $0xa0] sm:$0xff]  ;;  %v3274_v51 = vsel %vm1380_vm14, %v3270_v45, %v3272_v46 }
 0x928   :  { %v5259_v16 = vpack.c.bf16 %v4290_v21, %v4289_v11  ;;  %v3278_v53 = vmax.f32 %v7198_v33, %v3274_v51  ;;  %v4318_v33 = vld [vmem:[%s7494_s5 + $0x178] sm:$0xff]  ;;  %v3807_v11 = vld [vmem:[%s7498_s9 + $0x8] sm:$0xff] }
 0x929   :  { %v3285_v61 = vmax.f32 %v3284_v59, 0.0  ;;  %v7289_v19 = vmax.f32 %v3370_v12, 0.0  ;;  %v4315_v59 = vld [vmem:[%s7494_s5 + $0x160] sm:$0xff] }
 0x92a   :  { %v3626_v3 = vrot.slane %v3278_v53, 1  ;;  %v3728_v12 = vld [vmem:[%s7496_s7 + $0x60] sm:$0xff] }
 0x92b   :  { %4685 = vmatmul.mubr.msk.f32.vlgmr.msra.gmra.mrb[16].mxu1 %vm7502_vm0, %v3285_v61  ;;  %v3383_v17 = vrot.slane %v7289_v19, 2  ;;  %v3467_v35 = vrot.slane %v7289_v19, 4  ;;  %v3551_v48 = vrot.slane %v7289_v19, 6  ;;  %v5322_v14 = vpack.c.bf16 %v3729_v13, %v3728_v12  ;;  %v3806_v19 = vld [vmem:[%s7498_s9] sm:$0xff] }
 0x92c   :  { %5245 = vmatpush3.bf16.msra.mxu1 %v5244_v60  ;;  %4707 = vmatprep.mubr.msk.f32.mxu1 %vm5491_vm13, %v5487_v5  ;;  %v4316_v60 = vld [vmem:[%s7494_s5 + $0x168] sm:$0xff]  ;;  %v3628_v28 = vmax.f32 %v3278_v53, %v3626_v3  ;;  %v5325_v0 = vpack.c.bf16 %v3807_v11, %v3806_v19 }
 0x92d   :  { %5246 = vmatprep.subr.bf16.mxu1 %v5489_v18  ;;  %v5295_v61 = vpack.c.bf16 %v4316_v60, %v4315_v59  ;;  %5323 = vmatpush3.bf16.msra.mxu0 %v5322_v14 }
 0x92e   :  { %v3629_v9 = vadd.f32 %v7255_v54, %v3628_v28  ;;  %4807 = vmatprep.subr.mxu0 %v5487_v5  ;;  %v3730_v54 = vld [vmem:[%s7496_s7 + $0x70] sm:$0xff] }
 0x930   :  { %5248 = vmatpush3.bf16.msra.mxu1 %v5247_v6  ;;  %v5298_v6 = vpack.c.bf16 %v4318_v33, %v4317_v4 }
 0x931   :  { %5249 = vmatprep.subr.bf16.mxu1 %v5489_v18  ;;  %4808 = vmatpush3.msra.mxu0 %v3730_v54 }
 0x932   :  { %5324 = vmatprep.subr.bf16.mxu0 %v5489_v18 }
 0x934   :  { %5251 = vmatpush3.bf16.msra.mxu1 %v5250_v8  ;;  %v4320_v8 = vld [vmem:[%s7494_s5 + $0x188] sm:$0xff] }
 0x935   :  { %5252 = vmatprep.subr.bf16.mxu1 %v5489_v18  ;;  %v5301_v38 = vpack.c.bf16 %v4320_v8, %v4319_v7 }
 0x938   :  { %5254 = vmatpush3.bf16.msra.mxu1 %v5253_v10  ;;  %v3630_v10 = vmax.f32 %v3629_v9, 0.0 }
 0x939   :  { %5255 = vmatprep.subr.bf16.mxu1 %v5489_v18 }
 0x93c   :  { %5257 = vmatpush3.bf16.msra.mxu1 %v5256_v15  ;;  %v3279_v15 = vld [vmem:[%s7495_s6] sm:$0x1] }
 0x93d   :  { %5258 = vmatprep.subr.bf16.mxu1 %v5489_v18 }
 0x93f   :  { %4708 = vmatmul.mubr.msk.f32.vlgmr.msra.gmra.mrb[16].mxu1 %vm7503_vm2, %v3383_v17 }
 0x940   :  { %5260 = vmatpush3.bf16.msra.mxu1 %v5259_v16  ;;  %4730 = vmatprep.mubr.msk.f32.mxu1 %vm5491_vm13, %v5487_v5 }
 0x941   :  { %5261 = vmatprep.subr.bf16.mxu1 %v5489_v18 }
 0x944   :  { %5263 = vmatpush3.bf16.msra.mxu1 %v5262_v22  ;;  %v3808_v22 = vld [vmem:[%s7498_s9 + $0x10] sm:$0xff] }
 0x945   :  { %5264 = vmatprep.subr.bf16.mxu1 %v5489_v18  ;;  %v5328_v25 = vpack.c.bf16 %v3809_v23, %v3808_v22 }
 0x948   :  { %5266 = vmatpush3.bf16.msra.mxu1 %v5265_v26  ;;  %v3810_v26 = vld [vmem:[%s7498_s9 + $0x20] sm:$0xff] }
 0x949   :  { %5267 = vmatprep.subr.bf16.mxu1 %v5489_v18  ;;  %v5331_v55 = vpack.c.bf16 %v3811_v27, %v3810_v26 }
 0x94c   :  { %5269 = vmatpush3.bf16.msra.mxu1 %v5268_v56  ;;  %v3812_v56 = vld [vmem:[%s7498_s9 + $0x30] sm:$0xff] }
 0x94d   :  { %5270 = vmatprep.subr.bf16.mxu1 %v5489_v18  ;;  %v5334_v32 = vpack.c.bf16 %v3813_v31, %v3812_v56 }
 0x950   :  { %5272 = vmatpush3.bf16.msra.mxu1 %v5271_v29  ;;  %v3814_v29 = vld [vmem:[%s7498_s9 + $0x40] sm:$0xff] }
 0x951   :  { %5273 = vmatprep.subr.bf16.mxu1 %v5489_v18  ;;  %v5337_v57 = vpack.c.bf16 %v3815_v34, %v3814_v29 }
 0x953   :  { %4731 = vmatmul.mubr.msk.f32.vlgmr.msra.gmra.mrb[16].mxu1 %vm7504_vm3, %v3467_v35 }
 0x954   :  { %5275 = vmatpush3.bf16.msra.mxu1 %v5274_v63  ;;  %4753 = vmatprep.mubr.msk.f32.mxu1 %vm5491_vm13, %v5487_v5  ;;  %v3816_v63 = vld [vmem:[%s7498_s9 + $0x50] sm:$0xf]  ;;  %s5462_s9 = scalar_lea.vmem %s3902_s16, 32 }
 0x955   :  { %5276 = vmatprep.subr.bf16.mxu1 %v5489_v18  ;;  %p5463_p0 = scmp.ne.s32.totalorder %s3902_s16, %s5462_s9  ;;  %p5468_p2 = scmp.lt.s32.totalorder %s5462_s9, %s5462_s9 }
 0x957   :  { %p5469_p3 = por %p5468_p2, %p5467_p1 }
 0x958   :  { %5278 = vmatpush3.bf16.msra.mxu1 %v5277_v2 }
 0x959   :  { %5279 = vmatprep.subr.bf16.mxu1 %v5489_v18  ;;  %p5470_p4 = pnand %p5469_p3, %p5463_p0 }
 0x95c   :  { %5281 = vmatpush3.bf16.msra.mxu1 %v5280_v37 }
 0x95d   :  { %5282 = vmatprep.subr.bf16.mxu1 %v5489_v18 }
 0x960   :  { %5284 = vmatpush3.bf16.msra.mxu1 %v5283_v40 }
 0x961   :  { %5285 = vmatprep.subr.bf16.mxu1 %v5489_v18 }
 0x964   :  { %5287 = vmatpush3.bf16.msra.mxu1 %v5286_v43 }
 0x965   :  { %5288 = vmatprep.subr.bf16.mxu1 %v5489_v18 }
 0x967   :  { %4754 = vmatmul.mubr.msk.f32.vlgmr.msra.gmra.mrb[16].mxu1 %vm7505_vm5, %v3551_v48 }
 0x968   :  { %5290 = vmatpush3.bf16.msra.mxu1 %v5289_v47  ;;  %4776 = vmatprep.mubr.msk.f32.mxu1 %vm5491_vm13, %v5487_v5 }
 0x969   :  { %5291 = vmatprep.subr.bf16.mxu1 %v5489_v18 }
 0x96c   :  { %5293 = vmatpush3.bf16.msra.mxu1 %v5292_v52 }
 0x96d   :  { %5294 = vmatprep.subr.bf16.mxu1 %v5489_v18 }
 0x970   :  { %5296 = vmatpush3.bf16.msra.mxu1 %v5295_v61 }
 0x971   :  { %5297 = vmatprep.subr.bf16.mxu1 %v5489_v18 }
 0x974   :  { %5299 = vmatpush3.bf16.msra.mxu1 %v5298_v6 }
 0x975   :  { %5300 = vmatprep.subr.bf16.mxu1 %v5489_v18 }
 0x978   :  { %5302 = vmatpush3.bf16.msra.mxu1 %v5301_v38 }
 0x97b   :  { %4777 = vmatmul.mubr.msk.f32.vlgmr.msra.gmra.mrb[16].mxu1 %vm7506_vm6, %v3630_v10 }
 0xa4e   :  { %v3710_v21 = vpop.f32.mrb[16].mxu1 }
 0xa4f   :  { %v5340_v16 = vadd.f32 %v3710_v21, %v3279_v15  ;;  %v4778_v17 = vpop.f32.mrb[17].mxu1 }
 0xa51   :  { %v3715_v20 = vmax.f32 %v5340_v16, 0.0 }
 0xa53   :  { %4810 = vmatmul.mubr.msk.f32.vlgmr.msra.gmra.mrb[14].mxu0 %vm1851_vm15, %v3715_v20 }
 0xa54   :  { %5326 = vmatpush3.bf16.msra.mxu0 %v5325_v0  ;;  %4834 = vmatprep.mubr.msk.f32.mxu0 %vm5491_vm13, %v5487_v5 }
 0xa55   :  { %5327 = vmatprep.subr.bf16.mxu0 %v5489_v18 }
 0xa58   :  { %5329 = vmatpush3.bf16.msra.mxu0 %v5328_v25 }
 0xa59   :  { %5330 = vmatprep.subr.bf16.mxu0 %v5489_v18 }
 0xa5c   :  { %5332 = vmatpush3.bf16.msra.mxu0 %v5331_v55 }
 0xa5d   :  { %5333 = vmatprep.subr.bf16.mxu0 %v5489_v18 }
 0xa60   :  { %5335 = vmatpush3.bf16.msra.mxu0 %v5334_v32 }
 0xa61   :  { %5336 = vmatprep.subr.bf16.mxu0 %v5489_v18  ;;  %v3731_v18 = vld [vmem:[%s7497_s8] sm:$0x1] }
 0xa64   :  { %5338 = vmatpush3.bf16.msra.mxu0 %v5337_v57 }
 0xa65   :  { %4832 = vmatprep.subr.mxu0 %v5487_v5  ;;  %v3817_v5 = vld [vmem:[%s7499_s10] sm:$0x1] }
 0xa68   :  { %4833 = vmatpush3.msk.msra.mxu0 %vm580_vm4, %v3816_v63 }
 0xb26   :  { %v3801_v35 = vpop.f32.mrb[14].mxu0 }
 0xb27   :  { %v3802_v1 = vadd.f32 %v3801_v35, %v3731_v18  ;;  %v4811_v24 = vpop.f32.mrb[15].mxu0 }
 0xb29   :  { %v3805_v2 = vmax.f32 %v3802_v1, 0.0 }
 0xb2b   :  { %4835 = vmatmul.mubr.msk.f32.vlgmr.msra.gmra.mrb[16].mxu0 %vm835_vm12, %v3805_v2 }
 0xbfe   :  { %v3890_v58 = vpop.f32.mrb[16].mxu0 }
 0xbff   :  { %v3891_v62 = vadd.f32 %v3890_v58, %v3817_v5  ;;  %v4836_v37 = vpop.f32.mrb[17].mxu0 }
 0xc01   :  { %3894 = vst.msk [vmem:[#allocation4 + $0x1] sm:$0x1] %vm2014_vm1, %v3891_v62 }
 0xc02   :  { %5473 = shalt.err (!%p5470_p4)
}
 0xc03   :  { %s5474_s18 = scalar_lea.hbm %s7500_s11, 32 }
 0xc04   :  { %p5475_p5 = scmp.ne.s32.totalorder %s7500_s11, %s5474_s18  ;;  %p5478_p6 = scmp.lt.u32.totalorder %s5474_s18, %s7500_s11 }
 0xc06   :  { %p5480_p7 = pnand %p5478_p6, %p5475_p5 }
 0xc08   :  { %5483 = shalt.err (!%p5480_p7)
}
 0xc09   :  { %3904 = dma.vmem_to_hbm [thread:$0]  %s3902_s16, 32, %s7500_s11, [#allocation5]  }
 0xc0a   :  { %5484 = dma.done.wait [#allocation5], 32  }
 0xc0b   :  { %5485 = vsyncadd [#allocation5], 4294967264 }
 0xc0c   :  { %3908 = vsyncpa [#allocation5], 1 }

</bundles_post_ra>
